<compile_context>
chip_gen: v7x
topology: tpu7x:2x2x1
jax: 0.10.0
libtpu: 0.0.40
codegen_flags: <defaults>
</compile_context>

<pallas_src>
import math

import jax
import jax.numpy as jnp
import numpy as np
from jax.experimental import pallas as pl
from jax.experimental.pallas import tpu as pltpu

# --------------------------------------------------------------------------
# Model hyper-parameters (small synthetic config consistent with the module)
# --------------------------------------------------------------------------
IN_CHANNELS = 12
D_MODEL = 64
NUM_PROTOTYPES = 32
N_HEADS = 4
N_LAYERS = 2
NUM_CONCEPTS = 10
NUM_LABELS = 5
CONCEPT_HIDDEN = 128
CLASSIFIER_HIDDEN = 128
FF_HIDDEN = 4 * D_MODEL

BATCH = 2
SEQ_LEN = 64  # encoder downsamples by 4 -> transformer seq len 16


def _layernorm(x, g, b, eps=1e-5):
    mu = jnp.mean(x, axis=-1, keepdims=True)
    xc = x - mu
    var = jnp.mean(xc * xc, axis=-1, keepdims=True)
    return xc * jax.lax.rsqrt(var + eps) * g + b


# --------------------------------------------------------------------------
# The single fused kernel: one grid step == one batch element, end to end.
# --------------------------------------------------------------------------
def _hybrid_kernel(
    # ----- inputs -----
    x_ref,                                        # (1, S, C) channels-last
    c1w_ref, c1b_ref, c2w_ref, c2b_ref, pe_ref,
    wq_ref, wk_ref, wv_ref, bq_ref, bk_ref, bv_ref,
    wo_ref, bo_ref, ln1g_ref, ln1b_ref,
    f1w_ref, f1b_ref, f2w_ref, f2b_ref, ln2g_ref, ln2b_ref,
    proto_ref, cw1a_ref, cw1b_ref, cb1_ref, cw2_ref, cb2_ref,
    kw1_ref, kb1_ref, kw2_ref, kb2_ref,
    # ----- outputs -----
    logits_ref, concept_ref, sim_ref, attn_ref,
    # ----- scratch -----
    pad1_ref, pad2_ref,
):
    f32 = jnp.float32
    S, C = x_ref.shape[1], x_ref.shape[2]
    D = c1b_ref.shape[1]
    k1, k2 = c1w_ref.shape[0], c2w_ref.shape[0]
    p1, p2 = (k1 - 1) // 2, (k2 - 1) // 2
    L2 = pe_ref.shape[0]
    L1 = 2 * L2
    n_layers, n_heads, dh = wq_ref.shape[0], wq_ref.shape[1], wq_ref.shape[3]
    scale = 1.0 / math.sqrt(dh)

    x = x_ref[0]                                   # (S, C)

    # ---------------- shared CNN encoder ----------------
    # Conv1d(k=7,s=2,p=3)+ReLU then Conv1d(k=5,s=2,p=2)+ReLU.
    # stride-1 tap-sum matmuls on a zero-padded VMEM slab, then a stride-2
    # subsample done as an even-row selection MATMUL (keeps everything on MXU).
    pad1_ref[...] = jnp.zeros(pad1_ref.shape, f32)
    pad1_ref[pl.ds(p1, S), :] = x
    y1 = jnp.zeros((S, D), f32) + c1b_ref[...]
    for t in range(k1):
        y1 = y1 + jnp.dot(pad1_ref[pl.ds(t, S), :], c1w_ref[t],
                          preferred_element_type=f32)
    r = jax.lax.broadcasted_iota(jnp.int32, (L1, S), 0)
    cidx = jax.lax.broadcasted_iota(jnp.int32, (L1, S), 1)
    sel1 = jnp.where(cidx == 2 * r, 1.0, 0.0).astype(f32)
    h1 = jnp.maximum(jnp.dot(sel1, y1, preferred_element_type=f32), 0.0)   # (L1, D)

    pad2_ref[...] = jnp.zeros(pad2_ref.shape, f32)
    pad2_ref[pl.ds(p2, L1), :] = h1
    y2 = jnp.zeros((L1, D), f32) + c2b_ref[...]
    for t in range(k2):
        y2 = y2 + jnp.dot(pad2_ref[pl.ds(t, L1), :], c2w_ref[t],
                          preferred_element_type=f32)
    r = jax.lax.broadcasted_iota(jnp.int32, (L2, L1), 0)
    cidx = jax.lax.broadcasted_iota(jnp.int32, (L2, L1), 1)
    sel2 = jnp.where(cidx == 2 * r, 1.0, 0.0).astype(f32)
    feats = jnp.maximum(jnp.dot(sel2, y2, preferred_element_type=f32), 0.0)  # (L2, D)

    # ---------------- temporal self-attention (both layers fused) ----------
    a = feats + pe_ref[...]
    for l in range(n_layers):                      # static unroll over layers
        acc = jnp.zeros((L2, D), f32)
        for h in range(n_heads):                   # per-head pre-split weights:
            q = jnp.dot(a, wq_ref[l, h], preferred_element_type=f32) + bq_ref[l, h]
            k = jnp.dot(a, wk_ref[l, h], preferred_element_type=f32) + bk_ref[l, h]
            v = jnp.dot(a, wv_ref[l, h], preferred_element_type=f32) + bv_ref[l, h]
            s = jax.lax.dot_general(q, k, (((1,), (1,)), ((), ())),
                                    preferred_element_type=f32) * scale     # (L2, L2)
            m = jnp.max(s, axis=-1, keepdims=True)
            e = jnp.exp(s - m)
            p = e / jnp.sum(e, axis=-1, keepdims=True)                       # exact softmax
            hv = jnp.dot(p, v, preferred_element_type=f32)                   # (L2, dh)
            acc = acc + jnp.dot(hv, wo_ref[l, h], preferred_element_type=f32)
        attn = acc + bo_ref[l]
        y = _layernorm(a + attn, ln1g_ref[l], ln1b_ref[l])
        f = jnp.dot(y, f1w_ref[l], preferred_element_type=f32) + f1b_ref[l]
        f = jnp.maximum(f, 0.0)
        f = jnp.dot(f, f2w_ref[l], preferred_element_type=f32) + f2b_ref[l]
        a = _layernorm(y + f, ln2g_ref[l], ln2b_ref[l])

    attn_ref[0] = a                                # (L2, D); transposed outside

    # ---------------- fused tail ----------------
    pool = jnp.full((1, L2), 1.0 / L2, f32)        # matmul-ized mean pooling
    pooled = jnp.dot(pool, a, preferred_element_type=f32)              # (1, D)
    fpool = jnp.dot(pool, feats, preferred_element_type=f32)           # (1, D)

    protos = proto_ref[...]                                            # (P, D)
    # NOTE: eps added inside rsqrt of the squared norm (torch clamps the norm).
    xn = fpool * jax.lax.rsqrt(jnp.sum(fpool * fpool, axis=-1, keepdims=True) + 1e-8)
    pn = protos * jax.lax.rsqrt(jnp.sum(protos * protos, axis=-1, keepdims=True) + 1e-8)
    sim = jax.lax.dot_general(xn, pn, (((1,), (1,)), ((), ())),
                              preferred_element_type=f32)              # (1, P)
    sim_ref[0] = sim

    # concept bottleneck: split first weight so no lane concat of [pooled, sim]
    z = (jnp.dot(pooled, cw1a_ref[...], preferred_element_type=f32)
         + jnp.dot(sim, cw1b_ref[...], preferred_element_type=f32) + cb1_ref[...])
    z = jnp.maximum(z, 0.0)
    pre = jnp.dot(z, cw2_ref[...], preferred_element_type=f32) + cb2_ref[...]
    c = 1.0 / (1.0 + jnp.exp(-pre))                                    # sigmoid
    concept_ref[0] = c

    t1 = jnp.maximum(jnp.dot(c, kw1_ref[...], preferred_element_type=f32) + kb1_ref[...], 0.0)
    logits_ref[0] = jnp.dot(t1, kw2_ref[...], preferred_element_type=f32) + kb2_ref[...]


# --------------------------------------------------------------------------
# Wrapper: one pallas_call for the whole forward.
# --------------------------------------------------------------------------
def _sinusoidal_pe(L, D):
    pos = np.arange(L, dtype=np.float32)[:, None]
    i = np.arange(0, D, 2, dtype=np.float32)
    div = np.exp(-np.log(10000.0) * i / D)
    pe = np.zeros((L, D), np.float32)
    pe[:, 0::2] = np.sin(pos * div)
    pe[:, 1::2] = np.cos(pos * div)
    return jnp.asarray(pe)


def hybrid_forward(params, x):
    """x: (B, in_channels, seq_len) -> dict matching HybridECGModel.forward."""
    B, C, S = x.shape
    D = D_MODEL
    DH = D // N_HEADS
    L2 = S // 4
    x_nlc = jnp.transpose(x, (0, 2, 1))            # single boundary transpose

    def cs(shape):                                 # full-array (constant) block
        zero = (0,) * len(shape)
        return pl.BlockSpec(shape, lambda b: zero)

    in_specs = [
        pl.BlockSpec((1, S, C), lambda b: (b, 0, 0)),
        cs((7, C, D)), cs((1, D)), cs((5, D, D)), cs((1, D)), cs((L2, D)),
        cs((N_LAYERS, N_HEADS, D, DH)), cs((N_LAYERS, N_HEADS, D, DH)),
        cs((N_LAYERS, N_HEADS, D, DH)),
        cs((N_LAYERS, N_HEADS, 1, DH)), cs((N_LAYERS, N_HEADS, 1, DH)),
        cs((N_LAYERS, N_HEADS, 1, DH)),
        cs((N_LAYERS, N_HEADS, DH, D)), cs((N_LAYERS, 1, D)),
        cs((N_LAYERS, 1, D)), cs((N_LAYERS, 1, D)),
        cs((N_LAYERS, D, FF_HIDDEN)), cs((N_LAYERS, 1, FF_HIDDEN)),
        cs((N_LAYERS, FF_HIDDEN, D)), cs((N_LAYERS, 1, D)),
        cs((N_LAYERS, 1, D)), cs((N_LAYERS, 1, D)),
        cs((NUM_PROTOTYPES, D)),
        cs((D, CONCEPT_HIDDEN)), cs((NUM_PROTOTYPES, CONCEPT_HIDDEN)),
        cs((1, CONCEPT_HIDDEN)),
        cs((CONCEPT_HIDDEN, NUM_CONCEPTS)), cs((1, NUM_CONCEPTS)),
        cs((NUM_CONCEPTS, CLASSIFIER_HIDDEN)), cs((1, CLASSIFIER_HIDDEN)),
        cs((CLASSIFIER_HIDDEN, NUM_LABELS)), cs((1, NUM_LABELS)),
    ]
    out_specs = (
        pl.BlockSpec((1, 1, NUM_LABELS), lambda b: (b, 0, 0)),
        pl.BlockSpec((1, 1, NUM_CONCEPTS), lambda b: (b, 0, 0)),
        pl.BlockSpec((1, 1, NUM_PROTOTYPES), lambda b: (b, 0, 0)),
        pl.BlockSpec((1, L2, D), lambda b: (b, 0, 0)),
    )
    out_shape = (
        jax.ShapeDtypeStruct((B, 1, NUM_LABELS), jnp.float32),
        jax.ShapeDtypeStruct((B, 1, NUM_CONCEPTS), jnp.float32),
        jax.ShapeDtypeStruct((B, 1, NUM_PROTOTYPES), jnp.float32),
        jax.ShapeDtypeStruct((B, L2, D), jnp.float32),
    )

    logits, concepts, sim, attn_nlc = pl.pallas_call(
        _hybrid_kernel,
        grid=(B,),
        in_specs=in_specs,
        out_specs=out_specs,
        out_shape=out_shape,
        scratch_shapes=[
            pltpu.VMEM((S + 8, C), jnp.float32),        # conv1 zero-padded slab
            pltpu.VMEM((S // 2 + 8, D), jnp.float32),   # conv2 zero-padded slab
        ],
        compiler_params=pltpu.CompilerParams(
            # 2 TensorCores on v7x; on v5e/v6e this is one extra ~0.35us step.
            dimension_semantics=("parallel",)),
    )(
        x_nlc,
        params["conv1_w"], params["conv1_b"], params["conv2_w"], params["conv2_b"],
        params["pe"],
        params["wq"], params["wk"], params["wv"],
        params["bq"], params["bk"], params["bv"],
        params["wo"], params["bo"], params["ln1_g"], params["ln1_b"],
        params["ff_w1"], params["ff_b1"], params["ff_w2"], params["ff_b2"],
        params["ln2_g"], params["ln2_b"],
        params["prototypes"],
        params["cb_w1a"], params["cb_w1b"], params["cb_b1"],
        params["cb_w2"], params["cb_b2"],
        params["cls_w1"], params["cls_b1"], params["cls_w2"], params["cls_b2"],
    )

    return {
        "logits": logits[:, 0, :],
        "concept_scores": concepts[:, 0, :],
        "proto_sim": sim[:, 0, :],
        "attn_feats": jnp.transpose(attn_nlc, (0, 2, 1)),   # (B, D, S/4)
    }


# --------------------------------------------------------------------------
# Deterministic parameter initialization (kernel-friendly layouts)
# --------------------------------------------------------------------------
def init_params(key):
    keys = iter(jax.random.split(key, 32))
    DH = D_MODEL // N_HEADS

    def dense(shape, fan_in):
        return jax.random.normal(next(keys), shape, jnp.float32) / np.sqrt(fan_in)

    def zeros(*s):
        return jnp.zeros(s, jnp.float32)

    def ones(*s):
        return jnp.ones(s, jnp.float32)

    return {
        # Conv weights tap-major (k, C_in, C_out). NOTE: real PyTorch Conv1d
        # weights (C_out, C_in, k) must be transposed (2,1,0) to this layout.
        "conv1_w": dense((7, IN_CHANNELS, D_MODEL), 7 * IN_CHANNELS),
        "conv1_b": zeros(1, D_MODEL),
        "conv2_w": dense((5, D_MODEL, D_MODEL), 5 * D_MODEL),
        "conv2_b": zeros(1, D_MODEL),
        "pe": _sinusoidal_pe(SEQ_LEN // 4, D_MODEL),
        # attention weights pre-split per layer & head
        "wq": dense((N_LAYERS, N_HEADS, D_MODEL, DH), D_MODEL),
        "wk": dense((N_LAYERS, N_HEADS, D_MODEL, DH), D_MODEL),
        "wv": dense((N_LAYERS, N_HEADS, D_MODEL, DH), D_MODEL),
        "bq": zeros(N_LAYERS, N_HEADS, 1, DH),
        "bk": zeros(N_LAYERS, N_HEADS, 1, DH),
        "bv": zeros(N_LAYERS, N_HEADS, 1, DH),
        "wo": dense((N_LAYERS, N_HEADS, DH, D_MODEL), D_MODEL),
        "bo": zeros(N_LAYERS, 1, D_MODEL),
        "ln1_g": ones(N_LAYERS, 1, D_MODEL),
        "ln1_b": zeros(N_LAYERS, 1, D_MODEL),
        "ff_w1": dense((N_LAYERS, D_MODEL, FF_HIDDEN), D_MODEL),
        "ff_b1": zeros(N_LAYERS, 1, FF_HIDDEN),
        "ff_w2": dense((N_LAYERS, FF_HIDDEN, D_MODEL), FF_HIDDEN),
        "ff_b2": zeros(N_LAYERS, 1, D_MODEL),
        "ln2_g": ones(N_LAYERS, 1, D_MODEL),
        "ln2_b": zeros(N_LAYERS, 1, D_MODEL),
        "prototypes": jax.random.normal(next(keys), (NUM_PROTOTYPES, D_MODEL), jnp.float32),
        # concept-bottleneck first layer split: rows for pooled (D) and sim (P)
        "cb_w1a": dense((D_MODEL, CONCEPT_HIDDEN), D_MODEL + NUM_PROTOTYPES),
        "cb_w1b": dense((NUM_PROTOTYPES, CONCEPT_HIDDEN), D_MODEL + NUM_PROTOTYPES),
        "cb_b1": zeros(1, CONCEPT_HIDDEN),
        "cb_w2": dense((CONCEPT_HIDDEN, NUM_CONCEPTS), CONCEPT_HIDDEN),
        "cb_b2": zeros(1, NUM_CONCEPTS),
        "cls_w1": dense((NUM_CONCEPTS, CLASSIFIER_HIDDEN), NUM_CONCEPTS),
        "cls_b1": zeros(1, CLASSIFIER_HIDDEN),
        "cls_w2": dense((CLASSIFIER_HIDDEN, NUM_LABELS), CLASSIFIER_HIDDEN),
        "cls_b2": zeros(1, NUM_LABELS),
    }


# --------------------------------------------------------------------------
# Main
# --------------------------------------------------------------------------
if __name__ == "__main__":
    key = jax.random.PRNGKey(0)
    k_param, k_x = jax.random.split(key)
    params = init_params(k_param)
    x = jax.random.normal(k_x, (BATCH, IN_CHANNELS, SEQ_LEN), jnp.float32)

    fwd = jax.jit(hybrid_forward)
    out = jax.block_until_ready(fwd(params, x))

    assert out["logits"].shape == (BATCH, NUM_LABELS)
    assert out["concept_scores"].shape == (BATCH, NUM_CONCEPTS)
    assert out["proto_sim"].shape == (BATCH, NUM_PROTOTYPES)
    assert out["attn_feats"].shape == (BATCH, D_MODEL, SEQ_LEN // 4)
    assert all(bool(jnp.all(jnp.isfinite(v))) for v in out.values())
    assert bool(jnp.all(out["concept_scores"] >= 0.0)) and bool(jnp.all(out["concept_scores"] <= 1.0))
    assert bool(jnp.all(jnp.abs(out["proto_sim"]) <= 1.0 + 1e-4))

    print("KERNEL_OK")
</pallas_src>

<mosaic_0001>
module attributes {stable_mosaic.version = 11 : i64} {
  func.func @_hybrid_kernel(%arg0: i32, %arg1: memref<1x64x12xf32, #tpu.memory_space<vmem>>, %arg2: memref<7x12x64xf32, #tpu.memory_space<vmem>>, %arg3: memref<1x64xf32, #tpu.memory_space<vmem>>, %arg4: memref<5x64x64xf32, #tpu.memory_space<vmem>>, %arg5: memref<1x64xf32, #tpu.memory_space<vmem>>, %arg6: memref<16x64xf32, #tpu.memory_space<vmem>>, %arg7: memref<2x4x64x16xf32, #tpu.memory_space<vmem>>, %arg8: memref<2x4x64x16xf32, #tpu.memory_space<vmem>>, %arg9: memref<2x4x64x16xf32, #tpu.memory_space<vmem>>, %arg10: memref<2x4x1x16xf32, #tpu.memory_space<vmem>>, %arg11: memref<2x4x1x16xf32, #tpu.memory_space<vmem>>, %arg12: memref<2x4x1x16xf32, #tpu.memory_space<vmem>>, %arg13: memref<2x4x16x64xf32, #tpu.memory_space<vmem>>, %arg14: memref<2x1x64xf32, #tpu.memory_space<vmem>>, %arg15: memref<2x1x64xf32, #tpu.memory_space<vmem>>, %arg16: memref<2x1x64xf32, #tpu.memory_space<vmem>>, %arg17: memref<2x64x256xf32, #tpu.memory_space<vmem>>, %arg18: memref<2x1x256xf32, #tpu.memory_space<vmem>>, %arg19: memref<2x256x64xf32, #tpu.memory_space<vmem>>, %arg20: memref<2x1x64xf32, #tpu.memory_space<vmem>>, %arg21: memref<2x1x64xf32, #tpu.memory_space<vmem>>, %arg22: memref<2x1x64xf32, #tpu.memory_space<vmem>>, %arg23: memref<32x64xf32, #tpu.memory_space<vmem>>, %arg24: memref<64x128xf32, #tpu.memory_space<vmem>>, %arg25: memref<32x128xf32, #tpu.memory_space<vmem>>, %arg26: memref<1x128xf32, #tpu.memory_space<vmem>>, %arg27: memref<128x10xf32, #tpu.memory_space<vmem>>, %arg28: memref<1x10xf32, #tpu.memory_space<vmem>>, %arg29: memref<10x128xf32, #tpu.memory_space<vmem>>, %arg30: memref<1x128xf32, #tpu.memory_space<vmem>>, %arg31: memref<128x5xf32, #tpu.memory_space<vmem>>, %arg32: memref<1x5xf32, #tpu.memory_space<vmem>>, %arg33: memref<1x1x5xf32, #tpu.memory_space<vmem>>, %arg34: memref<1x1x10xf32, #tpu.memory_space<vmem>>, %arg35: memref<1x1x32xf32, #tpu.memory_space<vmem>>, %arg36: memref<1x16x64xf32, #tpu.memory_space<vmem>>, %arg37: memref<72x12xf32, #tpu.memory_space<vmem>>, %arg38: memref<40x64xf32, #tpu.memory_space<vmem>>) attributes {dimension_semantics = [#tpu.dimension_semantics<parallel>], iteration_bounds = array<i64: 2>, scalar_prefetch = 0 : i64, scratch_operands = 2 : i64, tpu.core_type = #tpu.core_type<tc>, window_params = [{transform_indices = @transform_0, window_bounds = array<i64: 1, 64, 12>}, {pipeline_mode = #tpu.pipeline_mode<synchronous>, transform_indices = @transform_1, window_bounds = array<i64: 7, 12, 64>}, {pipeline_mode = #tpu.pipeline_mode<synchronous>, transform_indices = @transform_2, window_bounds = array<i64: 1, 64>}, {pipeline_mode = #tpu.pipeline_mode<synchronous>, transform_indices = @transform_3, window_bounds = array<i64: 5, 64, 64>}, {pipeline_mode = #tpu.pipeline_mode<synchronous>, transform_indices = @transform_4, window_bounds = array<i64: 1, 64>}, {pipeline_mode = #tpu.pipeline_mode<synchronous>, transform_indices = @transform_5, window_bounds = array<i64: 16, 64>}, {pipeline_mode = #tpu.pipeline_mode<synchronous>, transform_indices = @transform_6, window_bounds = array<i64: 2, 4, 64, 16>}, {pipeline_mode = #tpu.pipeline_mode<synchronous>, transform_indices = @transform_7, window_bounds = array<i64: 2, 4, 64, 16>}, {pipeline_mode = #tpu.pipeline_mode<synchronous>, transform_indices = @transform_8, window_bounds = array<i64: 2, 4, 64, 16>}, {pipeline_mode = #tpu.pipeline_mode<synchronous>, transform_indices = @transform_9, window_bounds = array<i64: 2, 4, 1, 16>}, {pipeline_mode = #tpu.pipeline_mode<synchronous>, transform_indices = @transform_10, window_bounds = array<i64: 2, 4, 1, 16>}, {pipeline_mode = #tpu.pipeline_mode<synchronous>, transform_indices = @transform_11, window_bounds = array<i64: 2, 4, 1, 16>}, {pipeline_mode = #tpu.pipeline_mode<synchronous>, transform_indices = @transform_12, window_bounds = array<i64: 2, 4, 16, 64>}, {pipeline_mode = #tpu.pipeline_mode<synchronous>, transform_indices = @transform_13, window_bounds = array<i64: 2, 1, 64>}, {pipeline_mode = #tpu.pipeline_mode<synchronous>, transform_indices = @transform_14, window_bounds = array<i64: 2, 1, 64>}, {pipeline_mode = #tpu.pipeline_mode<synchronous>, transform_indices = @transform_15, window_bounds = array<i64: 2, 1, 64>}, {pipeline_mode = #tpu.pipeline_mode<synchronous>, transform_indices = @transform_16, window_bounds = array<i64: 2, 64, 256>}, {pipeline_mode = #tpu.pipeline_mode<synchronous>, transform_indices = @transform_17, window_bounds = array<i64: 2, 1, 256>}, {pipeline_mode = #tpu.pipeline_mode<synchronous>, transform_indices = @transform_18, window_bounds = array<i64: 2, 256, 64>}, {pipeline_mode = #tpu.pipeline_mode<synchronous>, transform_indices = @transform_19, window_bounds = array<i64: 2, 1, 64>}, {pipeline_mode = #tpu.pipeline_mode<synchronous>, transform_indices = @transform_20, window_bounds = array<i64: 2, 1, 64>}, {pipeline_mode = #tpu.pipeline_mode<synchronous>, transform_indices = @transform_21, window_bounds = array<i64: 2, 1, 64>}, {pipeline_mode = #tpu.pipeline_mode<synchronous>, transform_indices = @transform_22, window_bounds = array<i64: 32, 64>}, {pipeline_mode = #tpu.pipeline_mode<synchronous>, transform_indices = @transform_23, window_bounds = array<i64: 64, 128>}, {pipeline_mode = #tpu.pipeline_mode<synchronous>, transform_indices = @transform_24, window_bounds = array<i64: 32, 128>}, {pipeline_mode = #tpu.pipeline_mode<synchronous>, transform_indices = @transform_25, window_bounds = array<i64: 1, 128>}, {pipeline_mode = #tpu.pipeline_mode<synchronous>, transform_indices = @transform_26, window_bounds = array<i64: 128, 10>}, {pipeline_mode = #tpu.pipeline_mode<synchronous>, transform_indices = @transform_27, window_bounds = array<i64: 1, 10>}, {pipeline_mode = #tpu.pipeline_mode<synchronous>, transform_indices = @transform_28, window_bounds = array<i64: 10, 128>}, {pipeline_mode = #tpu.pipeline_mode<synchronous>, transform_indices = @transform_29, window_bounds = array<i64: 1, 128>}, {pipeline_mode = #tpu.pipeline_mode<synchronous>, transform_indices = @transform_30, window_bounds = array<i64: 128, 5>}, {pipeline_mode = #tpu.pipeline_mode<synchronous>, transform_indices = @transform_31, window_bounds = array<i64: 1, 5>}, {transform_indices = @transform_32, window_bounds = array<i64: 1, 1, 5>}, {transform_indices = @transform_33, window_bounds = array<i64: 1, 1, 10>}, {transform_indices = @transform_34, window_bounds = array<i64: 1, 1, 32>}, {transform_indices = @transform_35, window_bounds = array<i64: 1, 16, 64>}]} {
    %c0 = arith.constant 0 : index
    %c0_0 = arith.constant 0 : index
    %c0_1 = arith.constant 0 : index
    %0 = vector.load %arg1[%c0, %c0_0, %c0_1] : memref<1x64x12xf32, #tpu.memory_space<vmem>>, vector<1x64x12xf32>
    %1 = vector.shape_cast %0 : vector<1x64x12xf32> to vector<64x12xf32>
    %cst = arith.constant 0.000000e+00 : f32
    %2 = vector.broadcast %cst : f32 to vector<72x12xf32>
    %c0_2 = arith.constant 0 : index
    %c0_3 = arith.constant 0 : index
    %3 = vector.load %arg37[%c0_2, %c0_3] : memref<72x12xf32, #tpu.memory_space<vmem>>, vector<72x12xf32>
    tpu.vector_store %arg37[%c0_2, %c0_3], %2 {strides = array<i32>} : memref<72x12xf32, #tpu.memory_space<vmem>>, vector<72x12xf32>,
    %c3 = arith.constant 3 : index
    %c0_4 = arith.constant 0 : index
    %4 = vector.load %arg37[%c3, %c0_4] : memref<72x12xf32, #tpu.memory_space<vmem>>, vector<64x12xf32>
    tpu.vector_store %arg37[%c3, %c0_4], %1 {strides = array<i32>} : memref<72x12xf32, #tpu.memory_space<vmem>>, vector<64x12xf32>,
    %cst_5 = arith.constant 0.000000e+00 : f32
    %5 = vector.broadcast %cst_5 : f32 to vector<64x64xf32>
    %c0_6 = arith.constant 0 : index
    %c0_7 = arith.constant 0 : index
    %6 = vector.load %arg3[%c0_6, %c0_7] : memref<1x64xf32, #tpu.memory_space<vmem>>, vector<1x64xf32>
    %7 = vector.broadcast %6 : vector<1x64xf32> to vector<64x64xf32>
    %8 = arith.addf %5, %7 : vector<64x64xf32>
    %c0_8 = arith.constant 0 : index
    %c0_9 = arith.constant 0 : index
    %9 = vector.load %arg37[%c0_8, %c0_9] : memref<72x12xf32, #tpu.memory_space<vmem>>, vector<64x12xf32>
    %c0_10 = arith.constant 0 : index
    %c0_11 = arith.constant 0 : index
    %c0_12 = arith.constant 0 : index
    %10 = vector.load %arg2[%c0_10, %c0_11, %c0_12] : memref<7x12x64xf32, #tpu.memory_space<vmem>>, vector<1x12x64xf32>
    %11 = vector.shape_cast %10 : vector<1x12x64xf32> to vector<12x64xf32>
    %cst_13 = arith.constant dense<0.000000e+00> : vector<64x64xf32>
    %12 = tpu.matmul %9, %11, %cst_13 {dimension_numbers = #tpu.dot_dimension_numbers<[1], [0], [0], [1], [0, 0, 1, 1], [], []>} : vector<64x12xf32>, vector<12x64xf32>, vector<64x64xf32> -> vector<64x64xf32>
    %13 = arith.addf %8, %12 : vector<64x64xf32>
    %c1 = arith.constant 1 : index
    %c0_14 = arith.constant 0 : index
    %14 = vector.load %arg37[%c1, %c0_14] : memref<72x12xf32, #tpu.memory_space<vmem>>, vector<64x12xf32>
    %c1_15 = arith.constant 1 : index
    %c0_16 = arith.constant 0 : index
    %c0_17 = arith.constant 0 : index
    %15 = vector.load %arg2[%c1_15, %c0_16, %c0_17] : memref<7x12x64xf32, #tpu.memory_space<vmem>>, vector<1x12x64xf32>
    %16 = vector.shape_cast %15 : vector<1x12x64xf32> to vector<12x64xf32>
    %cst_18 = arith.constant dense<0.000000e+00> : vector<64x64xf32>
    %17 = tpu.matmul %14, %16, %cst_18 {dimension_numbers = #tpu.dot_dimension_numbers<[1], [0], [0], [1], [0, 0, 1, 1], [], []>} : vector<64x12xf32>, vector<12x64xf32>, vector<64x64xf32> -> vector<64x64xf32>
    %18 = arith.addf %13, %17 : vector<64x64xf32>
    %c2 = arith.constant 2 : index
    %c0_19 = arith.constant 0 : index
    %19 = vector.load %arg37[%c2, %c0_19] : memref<72x12xf32, #tpu.memory_space<vmem>>, vector<64x12xf32>
    %c2_20 = arith.constant 2 : index
    %c0_21 = arith.constant 0 : index
    %c0_22 = arith.constant 0 : index
    %20 = vector.load %arg2[%c2_20, %c0_21, %c0_22] : memref<7x12x64xf32, #tpu.memory_space<vmem>>, vector<1x12x64xf32>
    %21 = vector.shape_cast %20 : vector<1x12x64xf32> to vector<12x64xf32>
    %cst_23 = arith.constant dense<0.000000e+00> : vector<64x64xf32>
    %22 = tpu.matmul %19, %21, %cst_23 {dimension_numbers = #tpu.dot_dimension_numbers<[1], [0], [0], [1], [0, 0, 1, 1], [], []>} : vector<64x12xf32>, vector<12x64xf32>, vector<64x64xf32> -> vector<64x64xf32>
    %23 = arith.addf %18, %22 : vector<64x64xf32>
    %c3_24 = arith.constant 3 : index
    %c0_25 = arith.constant 0 : index
    %24 = vector.load %arg37[%c3_24, %c0_25] : memref<72x12xf32, #tpu.memory_space<vmem>>, vector<64x12xf32>
    %c3_26 = arith.constant 3 : index
    %c0_27 = arith.constant 0 : index
    %c0_28 = arith.constant 0 : index
    %25 = vector.load %arg2[%c3_26, %c0_27, %c0_28] : memref<7x12x64xf32, #tpu.memory_space<vmem>>, vector<1x12x64xf32>
    %26 = vector.shape_cast %25 : vector<1x12x64xf32> to vector<12x64xf32>
    %cst_29 = arith.constant dense<0.000000e+00> : vector<64x64xf32>
    %27 = tpu.matmul %24, %26, %cst_29 {dimension_numbers = #tpu.dot_dimension_numbers<[1], [0], [0], [1], [0, 0, 1, 1], [], []>} : vector<64x12xf32>, vector<12x64xf32>, vector<64x64xf32> -> vector<64x64xf32>
    %28 = arith.addf %23, %27 : vector<64x64xf32>
    %c4 = arith.constant 4 : index
    %c0_30 = arith.constant 0 : index
    %29 = vector.load %arg37[%c4, %c0_30] : memref<72x12xf32, #tpu.memory_space<vmem>>, vector<64x12xf32>
    %c4_31 = arith.constant 4 : index
    %c0_32 = arith.constant 0 : index
    %c0_33 = arith.constant 0 : index
    %30 = vector.load %arg2[%c4_31, %c0_32, %c0_33] : memref<7x12x64xf32, #tpu.memory_space<vmem>>, vector<1x12x64xf32>
    %31 = vector.shape_cast %30 : vector<1x12x64xf32> to vector<12x64xf32>
    %cst_34 = arith.constant dense<0.000000e+00> : vector<64x64xf32>
    %32 = tpu.matmul %29, %31, %cst_34 {dimension_numbers = #tpu.dot_dimension_numbers<[1], [0], [0], [1], [0, 0, 1, 1], [], []>} : vector<64x12xf32>, vector<12x64xf32>, vector<64x64xf32> -> vector<64x64xf32>
    %33 = arith.addf %28, %32 : vector<64x64xf32>
    %c5 = arith.constant 5 : index
    %c0_35 = arith.constant 0 : index
    %34 = vector.load %arg37[%c5, %c0_35] : memref<72x12xf32, #tpu.memory_space<vmem>>, vector<64x12xf32>
    %c5_36 = arith.constant 5 : index
    %c0_37 = arith.constant 0 : index
    %c0_38 = arith.constant 0 : index
    %35 = vector.load %arg2[%c5_36, %c0_37, %c0_38] : memref<7x12x64xf32, #tpu.memory_space<vmem>>, vector<1x12x64xf32>
    %36 = vector.shape_cast %35 : vector<1x12x64xf32> to vector<12x64xf32>
    %cst_39 = arith.constant dense<0.000000e+00> : vector<64x64xf32>
    %37 = tpu.matmul %34, %36, %cst_39 {dimension_numbers = #tpu.dot_dimension_numbers<[1], [0], [0], [1], [0, 0, 1, 1], [], []>} : vector<64x12xf32>, vector<12x64xf32>, vector<64x64xf32> -> vector<64x64xf32>
    %38 = arith.addf %33, %37 : vector<64x64xf32>
    %c6 = arith.constant 6 : index
    %c0_40 = arith.constant 0 : index
    %39 = vector.load %arg37[%c6, %c0_40] : memref<72x12xf32, #tpu.memory_space<vmem>>, vector<64x12xf32>
    %c6_41 = arith.constant 6 : index
    %c0_42 = arith.constant 0 : index
    %c0_43 = arith.constant 0 : index
    %40 = vector.load %arg2[%c6_41, %c0_42, %c0_43] : memref<7x12x64xf32, #tpu.memory_space<vmem>>, vector<1x12x64xf32>
    %41 = vector.shape_cast %40 : vector<1x12x64xf32> to vector<12x64xf32>
    %cst_44 = arith.constant dense<0.000000e+00> : vector<64x64xf32>
    %42 = tpu.matmul %39, %41, %cst_44 {dimension_numbers = #tpu.dot_dimension_numbers<[1], [0], [0], [1], [0, 0, 1, 1], [], []>} : vector<64x12xf32>, vector<12x64xf32>, vector<64x64xf32> -> vector<64x64xf32>
    %43 = arith.addf %38, %42 : vector<64x64xf32>
    %44 = tpu.iota {dimensions = array<i32: 0>} : vector<32x64xi32>
    %45 = tpu.iota {dimensions = array<i32: 1>} : vector<32x64xi32>
    %c2_i32 = arith.constant 2 : i32
    %46 = vector.broadcast %c2_i32 : i32 to vector<32x64xi32>
    %47 = arith.muli %46, %44 : vector<32x64xi32>
    %48 = arith.cmpi eq, %45, %47 : vector<32x64xi32>
    %cst_45 = arith.constant 1.000000e+00 : f32
    %cst_46 = arith.constant 0.000000e+00 : f32
    %49 = vector.broadcast %cst_45 : f32 to vector<32x64xf32>
    %50 = vector.broadcast %cst_46 : f32 to vector<32x64xf32>
    %51 = arith.select %48, %49, %50 : vector<32x64xi1>, vector<32x64xf32>
    %cst_47 = arith.constant dense<0.000000e+00> : vector<32x64xf32>
    %52 = tpu.matmul %51, %43, %cst_47 {dimension_numbers = #tpu.dot_dimension_numbers<[1], [0], [0], [1], [0, 0, 1, 1], [], []>} : vector<32x64xf32>, vector<64x64xf32>, vector<32x64xf32> -> vector<32x64xf32>
    %cst_48 = arith.constant 0.000000e+00 : f32
    %53 = vector.broadcast %cst_48 : f32 to vector<32x64xf32>
    %54 = arith.maximumf %52, %53 : vector<32x64xf32>
    %cst_49 = arith.constant 0.000000e+00 : f32
    %55 = vector.broadcast %cst_49 : f32 to vector<40x64xf32>
    %c0_50 = arith.constant 0 : index
    %c0_51 = arith.constant 0 : index
    %56 = vector.load %arg38[%c0_50, %c0_51] : memref<40x64xf32, #tpu.memory_space<vmem>>, vector<40x64xf32>
    tpu.vector_store %arg38[%c0_50, %c0_51], %55 {strides = array<i32>} : memref<40x64xf32, #tpu.memory_space<vmem>>, vector<40x64xf32>,
    %c2_52 = arith.constant 2 : index
    %c0_53 = arith.constant 0 : index
    %57 = vector.load %arg38[%c2_52, %c0_53] : memref<40x64xf32, #tpu.memory_space<vmem>>, vector<32x64xf32>
    tpu.vector_store %arg38[%c2_52, %c0_53], %54 {strides = array<i32>} : memref<40x64xf32, #tpu.memory_space<vmem>>, vector<32x64xf32>,
    %cst_54 = arith.constant 0.000000e+00 : f32
    %58 = vector.broadcast %cst_54 : f32 to vector<32x64xf32>
    %c0_55 = arith.constant 0 : index
    %c0_56 = arith.constant 0 : index
    %59 = vector.load %arg5[%c0_55, %c0_56] : memref<1x64xf32, #tpu.memory_space<vmem>>, vector<1x64xf32>
    %60 = vector.broadcast %59 : vector<1x64xf32> to vector<32x64xf32>
    %61 = arith.addf %58, %60 : vector<32x64xf32>
    %c0_57 = arith.constant 0 : index
    %c0_58 = arith.constant 0 : index
    %62 = vector.load %arg38[%c0_57, %c0_58] : memref<40x64xf32, #tpu.memory_space<vmem>>, vector<32x64xf32>
    %c0_59 = arith.constant 0 : index
    %c0_60 = arith.constant 0 : index
    %c0_61 = arith.constant 0 : index
    %63 = vector.load %arg4[%c0_59, %c0_60, %c0_61] : memref<5x64x64xf32, #tpu.memory_space<vmem>>, vector<1x64x64xf32>
    %64 = vector.shape_cast %63 : vector<1x64x64xf32> to vector<64x64xf32>
    %cst_62 = arith.constant dense<0.000000e+00> : vector<32x64xf32>
    %65 = tpu.matmul %62, %64, %cst_62 {dimension_numbers = #tpu.dot_dimension_numbers<[1], [0], [0], [1], [0, 0, 1, 1], [], []>} : vector<32x64xf32>, vector<64x64xf32>, vector<32x64xf32> -> vector<32x64xf32>
    %66 = arith.addf %61, %65 : vector<32x64xf32>
    %c1_63 = arith.constant 1 : index
    %c0_64 = arith.constant 0 : index
    %67 = vector.load %arg38[%c1_63, %c0_64] : memref<40x64xf32, #tpu.memory_space<vmem>>, vector<32x64xf32>
    %c1_65 = arith.constant 1 : index
    %c0_66 = arith.constant 0 : index
    %c0_67 = arith.constant 0 : index
    %68 = vector.load %arg4[%c1_65, %c0_66, %c0_67] : memref<5x64x64xf32, #tpu.memory_space<vmem>>, vector<1x64x64xf32>
    %69 = vector.shape_cast %68 : vector<1x64x64xf32> to vector<64x64xf32>
    %cst_68 = arith.constant dense<0.000000e+00> : vector<32x64xf32>
    %70 = tpu.matmul %67, %69, %cst_68 {dimension_numbers = #tpu.dot_dimension_numbers<[1], [0], [0], [1], [0, 0, 1, 1], [], []>} : vector<32x64xf32>, vector<64x64xf32>, vector<32x64xf32> -> vector<32x64xf32>
    %71 = arith.addf %66, %70 : vector<32x64xf32>
    %c2_69 = arith.constant 2 : index
    %c0_70 = arith.constant 0 : index
    %72 = vector.load %arg38[%c2_69, %c0_70] : memref<40x64xf32, #tpu.memory_space<vmem>>, vector<32x64xf32>
    %c2_71 = arith.constant 2 : index
    %c0_72 = arith.constant 0 : index
    %c0_73 = arith.constant 0 : index
    %73 = vector.load %arg4[%c2_71, %c0_72, %c0_73] : memref<5x64x64xf32, #tpu.memory_space<vmem>>, vector<1x64x64xf32>
    %74 = vector.shape_cast %73 : vector<1x64x64xf32> to vector<64x64xf32>
    %cst_74 = arith.constant dense<0.000000e+00> : vector<32x64xf32>
    %75 = tpu.matmul %72, %74, %cst_74 {dimension_numbers = #tpu.dot_dimension_numbers<[1], [0], [0], [1], [0, 0, 1, 1], [], []>} : vector<32x64xf32>, vector<64x64xf32>, vector<32x64xf32> -> vector<32x64xf32>
    %76 = arith.addf %71, %75 : vector<32x64xf32>
    %c3_75 = arith.constant 3 : index
    %c0_76 = arith.constant 0 : index
    %77 = vector.load %arg38[%c3_75, %c0_76] : memref<40x64xf32, #tpu.memory_space<vmem>>, vector<32x64xf32>
    %c3_77 = arith.constant 3 : index
    %c0_78 = arith.constant 0 : index
    %c0_79 = arith.constant 0 : index
    %78 = vector.load %arg4[%c3_77, %c0_78, %c0_79] : memref<5x64x64xf32, #tpu.memory_space<vmem>>, vector<1x64x64xf32>
    %79 = vector.shape_cast %78 : vector<1x64x64xf32> to vector<64x64xf32>
    %cst_80 = arith.constant dense<0.000000e+00> : vector<32x64xf32>
    %80 = tpu.matmul %77, %79, %cst_80 {dimension_numbers = #tpu.dot_dimension_numbers<[1], [0], [0], [1], [0, 0, 1, 1], [], []>} : vector<32x64xf32>, vector<64x64xf32>, vector<32x64xf32> -> vector<32x64xf32>
    %81 = arith.addf %76, %80 : vector<32x64xf32>
    %c4_81 = arith.constant 4 : index
    %c0_82 = arith.constant 0 : index
    %82 = vector.load %arg38[%c4_81, %c0_82] : memref<40x64xf32, #tpu.memory_space<vmem>>, vector<32x64xf32>
    %c4_83 = arith.constant 4 : index
    %c0_84 = arith.constant 0 : index
    %c0_85 = arith.constant 0 : index
    %83 = vector.load %arg4[%c4_83, %c0_84, %c0_85] : memref<5x64x64xf32, #tpu.memory_space<vmem>>, vector<1x64x64xf32>
    %84 = vector.shape_cast %83 : vector<1x64x64xf32> to vector<64x64xf32>
    %cst_86 = arith.constant dense<0.000000e+00> : vector<32x64xf32>
    %85 = tpu.matmul %82, %84, %cst_86 {dimension_numbers = #tpu.dot_dimension_numbers<[1], [0], [0], [1], [0, 0, 1, 1], [], []>} : vector<32x64xf32>, vector<64x64xf32>, vector<32x64xf32> -> vector<32x64xf32>
    %86 = arith.addf %81, %85 : vector<32x64xf32>
    %87 = tpu.iota {dimensions = array<i32: 0>} : vector<16x32xi32>
    %88 = tpu.iota {dimensions = array<i32: 1>} : vector<16x32xi32>
    %c2_i32_87 = arith.constant 2 : i32
    %89 = vector.broadcast %c2_i32_87 : i32 to vector<16x32xi32>
    %90 = arith.muli %89, %87 : vector<16x32xi32>
    %91 = arith.cmpi eq, %88, %90 : vector<16x32xi32>
    %cst_88 = arith.constant 1.000000e+00 : f32
    %cst_89 = arith.constant 0.000000e+00 : f32
    %92 = vector.broadcast %cst_88 : f32 to vector<16x32xf32>
    %93 = vector.broadcast %cst_89 : f32 to vector<16x32xf32>
    %94 = arith.select %91, %92, %93 : vector<16x32xi1>, vector<16x32xf32>
    %cst_90 = arith.constant dense<0.000000e+00> : vector<16x64xf32>
    %95 = tpu.matmul %94, %86, %cst_90 {dimension_numbers = #tpu.dot_dimension_numbers<[1], [0], [0], [1], [0, 0, 1, 1], [], []>} : vector<16x32xf32>, vector<32x64xf32>, vector<16x64xf32> -> vector<16x64xf32>
    %cst_91 = arith.constant 0.000000e+00 : f32
    %96 = vector.broadcast %cst_91 : f32 to vector<16x64xf32>
    %97 = arith.maximumf %95, %96 : vector<16x64xf32>
    %c0_92 = arith.constant 0 : index
    %c0_93 = arith.constant 0 : index
    %98 = vector.load %arg6[%c0_92, %c0_93] : memref<16x64xf32, #tpu.memory_space<vmem>>, vector<16x64xf32>
    %99 = arith.addf %97, %98 : vector<16x64xf32>
    %cst_94 = arith.constant 0.000000e+00 : f32
    %100 = vector.broadcast %cst_94 : f32 to vector<16x64xf32>
    %c0_95 = arith.constant 0 : index
    %c0_96 = arith.constant 0 : index
    %c0_97 = arith.constant 0 : index
    %c0_98 = arith.constant 0 : index
    %101 = vector.load %arg7[%c0_95, %c0_96, %c0_97, %c0_98] : memref<2x4x64x16xf32, #tpu.memory_space<vmem>>, vector<1x1x64x16xf32>
    %102 = vector.shape_cast %101 : vector<1x1x64x16xf32> to vector<64x16xf32>
    %cst_99 = arith.constant dense<0.000000e+00> : vector<16x16xf32>
    %103 = tpu.matmul %99, %102, %cst_99 {dimension_numbers = #tpu.dot_dimension_numbers<[1], [0], [0], [1], [0, 0, 1, 1], [], []>} : vector<16x64xf32>, vector<64x16xf32>, vector<16x16xf32> -> vector<16x16xf32>
    %c0_100 = arith.constant 0 : index
    %c0_101 = arith.constant 0 : index
    %c0_102 = arith.constant 0 : index
    %c0_103 = arith.constant 0 : index
    %104 = vector.load %arg10[%c0_100, %c0_101, %c0_102, %c0_103] : memref<2x4x1x16xf32, #tpu.memory_space<vmem>>, vector<1x1x1x16xf32>
    %105 = vector.shape_cast %104 : vector<1x1x1x16xf32> to vector<1x16xf32>
    %106 = vector.broadcast %105 : vector<1x16xf32> to vector<16x16xf32>
    %107 = arith.addf %103, %106 : vector<16x16xf32>
    %c0_104 = arith.constant 0 : index
    %c0_105 = arith.constant 0 : index
    %c0_106 = arith.constant 0 : index
    %c0_107 = arith.constant 0 : index
    %108 = vector.load %arg8[%c0_104, %c0_105, %c0_106, %c0_107] : memref<2x4x64x16xf32, #tpu.memory_space<vmem>>, vector<1x1x64x16xf32>
    %109 = vector.shape_cast %108 : vector<1x1x64x16xf32> to vector<64x16xf32>
    %cst_108 = arith.constant dense<0.000000e+00> : vector<16x16xf32>
    %110 = tpu.matmul %99, %109, %cst_108 {dimension_numbers = #tpu.dot_dimension_numbers<[1], [0], [0], [1], [0, 0, 1, 1], [], []>} : vector<16x64xf32>, vector<64x16xf32>, vector<16x16xf32> -> vector<16x16xf32>
    %c0_109 = arith.constant 0 : index
    %c0_110 = arith.constant 0 : index
    %c0_111 = arith.constant 0 : index
    %c0_112 = arith.constant 0 : index
    %111 = vector.load %arg11[%c0_109, %c0_110, %c0_111, %c0_112] : memref<2x4x1x16xf32, #tpu.memory_space<vmem>>, vector<1x1x1x16xf32>
    %112 = vector.shape_cast %111 : vector<1x1x1x16xf32> to vector<1x16xf32>
    %113 = vector.broadcast %112 : vector<1x16xf32> to vector<16x16xf32>
    %114 = arith.addf %110, %113 : vector<16x16xf32>
    %c0_113 = arith.constant 0 : index
    %c0_114 = arith.constant 0 : index
    %c0_115 = arith.constant 0 : index
    %c0_116 = arith.constant 0 : index
    %115 = vector.load %arg9[%c0_113, %c0_114, %c0_115, %c0_116] : memref<2x4x64x16xf32, #tpu.memory_space<vmem>>, vector<1x1x64x16xf32>
    %116 = vector.shape_cast %115 : vector<1x1x64x16xf32> to vector<64x16xf32>
    %cst_117 = arith.constant dense<0.000000e+00> : vector<16x16xf32>
    %117 = tpu.matmul %99, %116, %cst_117 {dimension_numbers = #tpu.dot_dimension_numbers<[1], [0], [0], [1], [0, 0, 1, 1], [], []>} : vector<16x64xf32>, vector<64x16xf32>, vector<16x16xf32> -> vector<16x16xf32>
    %c0_118 = arith.constant 0 : index
    %c0_119 = arith.constant 0 : index
    %c0_120 = arith.constant 0 : index
    %c0_121 = arith.constant 0 : index
    %118 = vector.load %arg12[%c0_118, %c0_119, %c0_120, %c0_121] : memref<2x4x1x16xf32, #tpu.memory_space<vmem>>, vector<1x1x1x16xf32>
    %119 = vector.shape_cast %118 : vector<1x1x1x16xf32> to vector<1x16xf32>
    %120 = vector.broadcast %119 : vector<1x16xf32> to vector<16x16xf32>
    %121 = arith.addf %117, %120 : vector<16x16xf32>
    %cst_122 = arith.constant dense<0.000000e+00> : vector<16x16xf32>
    %122 = tpu.matmul %107, %114, %cst_122 {dimension_numbers = #tpu.dot_dimension_numbers<[1], [1], [0], [0], [0, 0, 1, 0], [], []>} : vector<16x16xf32>, vector<16x16xf32>, vector<16x16xf32> -> vector<16x16xf32>
    %cst_123 = arith.constant 2.500000e-01 : f32
    %123 = vector.broadcast %cst_123 : f32 to vector<16x16xf32>
    %124 = arith.mulf %122, %123 : vector<16x16xf32>
    %cst_124 = arith.constant dense<0xFF800000> : vector<16xf32>
    %125 = vector.multi_reduction <maximumf>, %124, %cst_124 [1] : vector<16x16xf32> to vector<16xf32>
    %126 = vector.shape_cast %125 : vector<16xf32> to vector<16x1xf32>
    %127 = vector.broadcast %126 : vector<16x1xf32> to vector<16x16xf32>
    %128 = arith.subf %124, %127 : vector<16x16xf32>
    %129 = math.exp %128 : vector<16x16xf32>
    %cst_125 = arith.constant dense<0.000000e+00> : vector<16xf32>
    %130 = vector.multi_reduction <add>, %129, %cst_125 [1] : vector<16x16xf32> to vector<16xf32>
    %131 = vector.shape_cast %130 : vector<16xf32> to vector<16x1xf32>
    %132 = vector.broadcast %131 : vector<16x1xf32> to vector<16x16xf32>
    %133 = arith.divf %129, %132 : vector<16x16xf32>
    %cst_126 = arith.constant dense<0.000000e+00> : vector<16x16xf32>
    %134 = tpu.matmul %133, %121, %cst_126 {dimension_numbers = #tpu.dot_dimension_numbers<[1], [0], [0], [1], [0, 0, 1, 1], [], []>} : vector<16x16xf32>, vector<16x16xf32>, vector<16x16xf32> -> vector<16x16xf32>
    %c0_127 = arith.constant 0 : index
    %c0_128 = arith.constant 0 : index
    %c0_129 = arith.constant 0 : index
    %c0_130 = arith.constant 0 : index
    %135 = vector.load %arg13[%c0_127, %c0_128, %c0_129, %c0_130] : memref<2x4x16x64xf32, #tpu.memory_space<vmem>>, vector<1x1x16x64xf32>
    %136 = vector.shape_cast %135 : vector<1x1x16x64xf32> to vector<16x64xf32>
    %cst_131 = arith.constant dense<0.000000e+00> : vector<16x64xf32>
    %137 = tpu.matmul %134, %136, %cst_131 {dimension_numbers = #tpu.dot_dimension_numbers<[1], [0], [0], [1], [0, 0, 1, 1], [], []>} : vector<16x16xf32>, vector<16x64xf32>, vector<16x64xf32> -> vector<16x64xf32>
    %138 = arith.addf %100, %137 : vector<16x64xf32>
    %c0_132 = arith.constant 0 : index
    %c1_133 = arith.constant 1 : index
    %c0_134 = arith.constant 0 : index
    %c0_135 = arith.constant 0 : index
    %139 = vector.load %arg7[%c0_132, %c1_133, %c0_134, %c0_135] : memref<2x4x64x16xf32, #tpu.memory_space<vmem>>, vector<1x1x64x16xf32>
    %140 = vector.shape_cast %139 : vector<1x1x64x16xf32> to vector<64x16xf32>
    %cst_136 = arith.constant dense<0.000000e+00> : vector<16x16xf32>
    %141 = tpu.matmul %99, %140, %cst_136 {dimension_numbers = #tpu.dot_dimension_numbers<[1], [0], [0], [1], [0, 0, 1, 1], [], []>} : vector<16x64xf32>, vector<64x16xf32>, vector<16x16xf32> -> vector<16x16xf32>
    %c0_137 = arith.constant 0 : index
    %c1_138 = arith.constant 1 : index
    %c0_139 = arith.constant 0 : index
    %c0_140 = arith.constant 0 : index
    %142 = vector.load %arg10[%c0_137, %c1_138, %c0_139, %c0_140] : memref<2x4x1x16xf32, #tpu.memory_space<vmem>>, vector<1x1x1x16xf32>
    %143 = vector.shape_cast %142 : vector<1x1x1x16xf32> to vector<1x16xf32>
    %144 = vector.broadcast %143 : vector<1x16xf32> to vector<16x16xf32>
    %145 = arith.addf %141, %144 : vector<16x16xf32>
    %c0_141 = arith.constant 0 : index
    %c1_142 = arith.constant 1 : index
    %c0_143 = arith.constant 0 : index
    %c0_144 = arith.constant 0 : index
    %146 = vector.load %arg8[%c0_141, %c1_142, %c0_143, %c0_144] : memref<2x4x64x16xf32, #tpu.memory_space<vmem>>, vector<1x1x64x16xf32>
    %147 = vector.shape_cast %146 : vector<1x1x64x16xf32> to vector<64x16xf32>
    %cst_145 = arith.constant dense<0.000000e+00> : vector<16x16xf32>
    %148 = tpu.matmul %99, %147, %cst_145 {dimension_numbers = #tpu.dot_dimension_numbers<[1], [0], [0], [1], [0, 0, 1, 1], [], []>} : vector<16x64xf32>, vector<64x16xf32>, vector<16x16xf32> -> vector<16x16xf32>
    %c0_146 = arith.constant 0 : index
    %c1_147 = arith.constant 1 : index
    %c0_148 = arith.constant 0 : index
    %c0_149 = arith.constant 0 : index
    %149 = vector.load %arg11[%c0_146, %c1_147, %c0_148, %c0_149] : memref<2x4x1x16xf32, #tpu.memory_space<vmem>>, vector<1x1x1x16xf32>
    %150 = vector.shape_cast %149 : vector<1x1x1x16xf32> to vector<1x16xf32>
    %151 = vector.broadcast %150 : vector<1x16xf32> to vector<16x16xf32>
    %152 = arith.addf %148, %151 : vector<16x16xf32>
    %c0_150 = arith.constant 0 : index
    %c1_151 = arith.constant 1 : index
    %c0_152 = arith.constant 0 : index
    %c0_153 = arith.constant 0 : index
    %153 = vector.load %arg9[%c0_150, %c1_151, %c0_152, %c0_153] : memref<2x4x64x16xf32, #tpu.memory_space<vmem>>, vector<1x1x64x16xf32>
    %154 = vector.shape_cast %153 : vector<1x1x64x16xf32> to vector<64x16xf32>
    %cst_154 = arith.constant dense<0.000000e+00> : vector<16x16xf32>
    %155 = tpu.matmul %99, %154, %cst_154 {dimension_numbers = #tpu.dot_dimension_numbers<[1], [0], [0], [1], [0, 0, 1, 1], [], []>} : vector<16x64xf32>, vector<64x16xf32>, vector<16x16xf32> -> vector<16x16xf32>
    %c0_155 = arith.constant 0 : index
    %c1_156 = arith.constant 1 : index
    %c0_157 = arith.constant 0 : index
    %c0_158 = arith.constant 0 : index
    %156 = vector.load %arg12[%c0_155, %c1_156, %c0_157, %c0_158] : memref<2x4x1x16xf32, #tpu.memory_space<vmem>>, vector<1x1x1x16xf32>
    %157 = vector.shape_cast %156 : vector<1x1x1x16xf32> to vector<1x16xf32>
    %158 = vector.broadcast %157 : vector<1x16xf32> to vector<16x16xf32>
    %159 = arith.addf %155, %158 : vector<16x16xf32>
    %cst_159 = arith.constant dense<0.000000e+00> : vector<16x16xf32>
    %160 = tpu.matmul %145, %152, %cst_159 {dimension_numbers = #tpu.dot_dimension_numbers<[1], [1], [0], [0], [0, 0, 1, 0], [], []>} : vector<16x16xf32>, vector<16x16xf32>, vector<16x16xf32> -> vector<16x16xf32>
    %cst_160 = arith.constant 2.500000e-01 : f32
    %161 = vector.broadcast %cst_160 : f32 to vector<16x16xf32>
    %162 = arith.mulf %160, %161 : vector<16x16xf32>
    %cst_161 = arith.constant dense<0xFF800000> : vector<16xf32>
    %163 = vector.multi_reduction <maximumf>, %162, %cst_161 [1] : vector<16x16xf32> to vector<16xf32>
    %164 = vector.shape_cast %163 : vector<16xf32> to vector<16x1xf32>
    %165 = vector.broadcast %164 : vector<16x1xf32> to vector<16x16xf32>
    %166 = arith.subf %162, %165 : vector<16x16xf32>
    %167 = math.exp %166 : vector<16x16xf32>
    %cst_162 = arith.constant dense<0.000000e+00> : vector<16xf32>
    %168 = vector.multi_reduction <add>, %167, %cst_162 [1] : vector<16x16xf32> to vector<16xf32>
    %169 = vector.shape_cast %168 : vector<16xf32> to vector<16x1xf32>
    %170 = vector.broadcast %169 : vector<16x1xf32> to vector<16x16xf32>
    %171 = arith.divf %167, %170 : vector<16x16xf32>
    %cst_163 = arith.constant dense<0.000000e+00> : vector<16x16xf32>
    %172 = tpu.matmul %171, %159, %cst_163 {dimension_numbers = #tpu.dot_dimension_numbers<[1], [0], [0], [1], [0, 0, 1, 1], [], []>} : vector<16x16xf32>, vector<16x16xf32>, vector<16x16xf32> -> vector<16x16xf32>
    %c0_164 = arith.constant 0 : index
    %c1_165 = arith.constant 1 : index
    %c0_166 = arith.constant 0 : index
    %c0_167 = arith.constant 0 : index
    %173 = vector.load %arg13[%c0_164, %c1_165, %c0_166, %c0_167] : memref<2x4x16x64xf32, #tpu.memory_space<vmem>>, vector<1x1x16x64xf32>
    %174 = vector.shape_cast %173 : vector<1x1x16x64xf32> to vector<16x64xf32>
    %cst_168 = arith.constant dense<0.000000e+00> : vector<16x64xf32>
    %175 = tpu.matmul %172, %174, %cst_168 {dimension_numbers = #tpu.dot_dimension_numbers<[1], [0], [0], [1], [0, 0, 1, 1], [], []>} : vector<16x16xf32>, vector<16x64xf32>, vector<16x64xf32> -> vector<16x64xf32>
    %176 = arith.addf %138, %175 : vector<16x64xf32>
    %c0_169 = arith.constant 0 : index
    %c2_170 = arith.constant 2 : index
    %c0_171 = arith.constant 0 : index
    %c0_172 = arith.constant 0 : index
    %177 = vector.load %arg7[%c0_169, %c2_170, %c0_171, %c0_172] : memref<2x4x64x16xf32, #tpu.memory_space<vmem>>, vector<1x1x64x16xf32>
    %178 = vector.shape_cast %177 : vector<1x1x64x16xf32> to vector<64x16xf32>
    %cst_173 = arith.constant dense<0.000000e+00> : vector<16x16xf32>
    %179 = tpu.matmul %99, %178, %cst_173 {dimension_numbers = #tpu.dot_dimension_numbers<[1], [0], [0], [1], [0, 0, 1, 1], [], []>} : vector<16x64xf32>, vector<64x16xf32>, vector<16x16xf32> -> vector<16x16xf32>
    %c0_174 = arith.constant 0 : index
    %c2_175 = arith.constant 2 : index
    %c0_176 = arith.constant 0 : index
    %c0_177 = arith.constant 0 : index
    %180 = vector.load %arg10[%c0_174, %c2_175, %c0_176, %c0_177] : memref<2x4x1x16xf32, #tpu.memory_space<vmem>>, vector<1x1x1x16xf32>
    %181 = vector.shape_cast %180 : vector<1x1x1x16xf32> to vector<1x16xf32>
    %182 = vector.broadcast %181 : vector<1x16xf32> to vector<16x16xf32>
    %183 = arith.addf %179, %182 : vector<16x16xf32>
    %c0_178 = arith.constant 0 : index
    %c2_179 = arith.constant 2 : index
    %c0_180 = arith.constant 0 : index
    %c0_181 = arith.constant 0 : index
    %184 = vector.load %arg8[%c0_178, %c2_179, %c0_180, %c0_181] : memref<2x4x64x16xf32, #tpu.memory_space<vmem>>, vector<1x1x64x16xf32>
    %185 = vector.shape_cast %184 : vector<1x1x64x16xf32> to vector<64x16xf32>
    %cst_182 = arith.constant dense<0.000000e+00> : vector<16x16xf32>
    %186 = tpu.matmul %99, %185, %cst_182 {dimension_numbers = #tpu.dot_dimension_numbers<[1], [0], [0], [1], [0, 0, 1, 1], [], []>} : vector<16x64xf32>, vector<64x16xf32>, vector<16x16xf32> -> vector<16x16xf32>
    %c0_183 = arith.constant 0 : index
    %c2_184 = arith.constant 2 : index
    %c0_185 = arith.constant 0 : index
    %c0_186 = arith.constant 0 : index
    %187 = vector.load %arg11[%c0_183, %c2_184, %c0_185, %c0_186] : memref<2x4x1x16xf32, #tpu.memory_space<vmem>>, vector<1x1x1x16xf32>
    %188 = vector.shape_cast %187 : vector<1x1x1x16xf32> to vector<1x16xf32>
    %189 = vector.broadcast %188 : vector<1x16xf32> to vector<16x16xf32>
    %190 = arith.addf %186, %189 : vector<16x16xf32>
    %c0_187 = arith.constant 0 : index
    %c2_188 = arith.constant 2 : index
    %c0_189 = arith.constant 0 : index
    %c0_190 = arith.constant 0 : index
    %191 = vector.load %arg9[%c0_187, %c2_188, %c0_189, %c0_190] : memref<2x4x64x16xf32, #tpu.memory_space<vmem>>, vector<1x1x64x16xf32>
    %192 = vector.shape_cast %191 : vector<1x1x64x16xf32> to vector<64x16xf32>
    %cst_191 = arith.constant dense<0.000000e+00> : vector<16x16xf32>
    %193 = tpu.matmul %99, %192, %cst_191 {dimension_numbers = #tpu.dot_dimension_numbers<[1], [0], [0], [1], [0, 0, 1, 1], [], []>} : vector<16x64xf32>, vector<64x16xf32>, vector<16x16xf32> -> vector<16x16xf32>
    %c0_192 = arith.constant 0 : index
    %c2_193 = arith.constant 2 : index
    %c0_194 = arith.constant 0 : index
    %c0_195 = arith.constant 0 : index
    %194 = vector.load %arg12[%c0_192, %c2_193, %c0_194, %c0_195] : memref<2x4x1x16xf32, #tpu.memory_space<vmem>>, vector<1x1x1x16xf32>
    %195 = vector.shape_cast %194 : vector<1x1x1x16xf32> to vector<1x16xf32>
    %196 = vector.broadcast %195 : vector<1x16xf32> to vector<16x16xf32>
    %197 = arith.addf %193, %196 : vector<16x16xf32>
    %cst_196 = arith.constant dense<0.000000e+00> : vector<16x16xf32>
    %198 = tpu.matmul %183, %190, %cst_196 {dimension_numbers = #tpu.dot_dimension_numbers<[1], [1], [0], [0], [0, 0, 1, 0], [], []>} : vector<16x16xf32>, vector<16x16xf32>, vector<16x16xf32> -> vector<16x16xf32>
    %cst_197 = arith.constant 2.500000e-01 : f32
    %199 = vector.broadcast %cst_197 : f32 to vector<16x16xf32>
    %200 = arith.mulf %198, %199 : vector<16x16xf32>
    %cst_198 = arith.constant dense<0xFF800000> : vector<16xf32>
    %201 = vector.multi_reduction <maximumf>, %200, %cst_198 [1] : vector<16x16xf32> to vector<16xf32>
    %202 = vector.shape_cast %201 : vector<16xf32> to vector<16x1xf32>
    %203 = vector.broadcast %202 : vector<16x1xf32> to vector<16x16xf32>
    %204 = arith.subf %200, %203 : vector<16x16xf32>
    %205 = math.exp %204 : vector<16x16xf32>
    %cst_199 = arith.constant dense<0.000000e+00> : vector<16xf32>
    %206 = vector.multi_reduction <add>, %205, %cst_199 [1] : vector<16x16xf32> to vector<16xf32>
    %207 = vector.shape_cast %206 : vector<16xf32> to vector<16x1xf32>
    %208 = vector.broadcast %207 : vector<16x1xf32> to vector<16x16xf32>
    %209 = arith.divf %205, %208 : vector<16x16xf32>
    %cst_200 = arith.constant dense<0.000000e+00> : vector<16x16xf32>
    %210 = tpu.matmul %209, %197, %cst_200 {dimension_numbers = #tpu.dot_dimension_numbers<[1], [0], [0], [1], [0, 0, 1, 1], [], []>} : vector<16x16xf32>, vector<16x16xf32>, vector<16x16xf32> -> vector<16x16xf32>
    %c0_201 = arith.constant 0 : index
    %c2_202 = arith.constant 2 : index
    %c0_203 = arith.constant 0 : index
    %c0_204 = arith.constant 0 : index
    %211 = vector.load %arg13[%c0_201, %c2_202, %c0_203, %c0_204] : memref<2x4x16x64xf32, #tpu.memory_space<vmem>>, vector<1x1x16x64xf32>
    %212 = vector.shape_cast %211 : vector<1x1x16x64xf32> to vector<16x64xf32>
    %cst_205 = arith.constant dense<0.000000e+00> : vector<16x64xf32>
    %213 = tpu.matmul %210, %212, %cst_205 {dimension_numbers = #tpu.dot_dimension_numbers<[1], [0], [0], [1], [0, 0, 1, 1], [], []>} : vector<16x16xf32>, vector<16x64xf32>, vector<16x64xf32> -> vector<16x64xf32>
    %214 = arith.addf %176, %213 : vector<16x64xf32>
    %c0_206 = arith.constant 0 : index
    %c3_207 = arith.constant 3 : index
    %c0_208 = arith.constant 0 : index
    %c0_209 = arith.constant 0 : index
    %215 = vector.load %arg7[%c0_206, %c3_207, %c0_208, %c0_209] : memref<2x4x64x16xf32, #tpu.memory_space<vmem>>, vector<1x1x64x16xf32>
    %216 = vector.shape_cast %215 : vector<1x1x64x16xf32> to vector<64x16xf32>
    %cst_210 = arith.constant dense<0.000000e+00> : vector<16x16xf32>
    %217 = tpu.matmul %99, %216, %cst_210 {dimension_numbers = #tpu.dot_dimension_numbers<[1], [0], [0], [1], [0, 0, 1, 1], [], []>} : vector<16x64xf32>, vector<64x16xf32>, vector<16x16xf32> -> vector<16x16xf32>
    %c0_211 = arith.constant 0 : index
    %c3_212 = arith.constant 3 : index
    %c0_213 = arith.constant 0 : index
    %c0_214 = arith.constant 0 : index
    %218 = vector.load %arg10[%c0_211, %c3_212, %c0_213, %c0_214] : memref<2x4x1x16xf32, #tpu.memory_space<vmem>>, vector<1x1x1x16xf32>
    %219 = vector.shape_cast %218 : vector<1x1x1x16xf32> to vector<1x16xf32>
    %220 = vector.broadcast %219 : vector<1x16xf32> to vector<16x16xf32>
    %221 = arith.addf %217, %220 : vector<16x16xf32>
    %c0_215 = arith.constant 0 : index
    %c3_216 = arith.constant 3 : index
    %c0_217 = arith.constant 0 : index
    %c0_218 = arith.constant 0 : index
    %222 = vector.load %arg8[%c0_215, %c3_216, %c0_217, %c0_218] : memref<2x4x64x16xf32, #tpu.memory_space<vmem>>, vector<1x1x64x16xf32>
    %223 = vector.shape_cast %222 : vector<1x1x64x16xf32> to vector<64x16xf32>
    %cst_219 = arith.constant dense<0.000000e+00> : vector<16x16xf32>
    %224 = tpu.matmul %99, %223, %cst_219 {dimension_numbers = #tpu.dot_dimension_numbers<[1], [0], [0], [1], [0, 0, 1, 1], [], []>} : vector<16x64xf32>, vector<64x16xf32>, vector<16x16xf32> -> vector<16x16xf32>
    %c0_220 = arith.constant 0 : index
    %c3_221 = arith.constant 3 : index
    %c0_222 = arith.constant 0 : index
    %c0_223 = arith.constant 0 : index
    %225 = vector.load %arg11[%c0_220, %c3_221, %c0_222, %c0_223] : memref<2x4x1x16xf32, #tpu.memory_space<vmem>>, vector<1x1x1x16xf32>
    %226 = vector.shape_cast %225 : vector<1x1x1x16xf32> to vector<1x16xf32>
    %227 = vector.broadcast %226 : vector<1x16xf32> to vector<16x16xf32>
    %228 = arith.addf %224, %227 : vector<16x16xf32>
    %c0_224 = arith.constant 0 : index
    %c3_225 = arith.constant 3 : index
    %c0_226 = arith.constant 0 : index
    %c0_227 = arith.constant 0 : index
    %229 = vector.load %arg9[%c0_224, %c3_225, %c0_226, %c0_227] : memref<2x4x64x16xf32, #tpu.memory_space<vmem>>, vector<1x1x64x16xf32>
    %230 = vector.shape_cast %229 : vector<1x1x64x16xf32> to vector<64x16xf32>
    %cst_228 = arith.constant dense<0.000000e+00> : vector<16x16xf32>
    %231 = tpu.matmul %99, %230, %cst_228 {dimension_numbers = #tpu.dot_dimension_numbers<[1], [0], [0], [1], [0, 0, 1, 1], [], []>} : vector<16x64xf32>, vector<64x16xf32>, vector<16x16xf32> -> vector<16x16xf32>
    %c0_229 = arith.constant 0 : index
    %c3_230 = arith.constant 3 : index
    %c0_231 = arith.constant 0 : index
    %c0_232 = arith.constant 0 : index
    %232 = vector.load %arg12[%c0_229, %c3_230, %c0_231, %c0_232] : memref<2x4x1x16xf32, #tpu.memory_space<vmem>>, vector<1x1x1x16xf32>
    %233 = vector.shape_cast %232 : vector<1x1x1x16xf32> to vector<1x16xf32>
    %234 = vector.broadcast %233 : vector<1x16xf32> to vector<16x16xf32>
    %235 = arith.addf %231, %234 : vector<16x16xf32>
    %cst_233 = arith.constant dense<0.000000e+00> : vector<16x16xf32>
    %236 = tpu.matmul %221, %228, %cst_233 {dimension_numbers = #tpu.dot_dimension_numbers<[1], [1], [0], [0], [0, 0, 1, 0], [], []>} : vector<16x16xf32>, vector<16x16xf32>, vector<16x16xf32> -> vector<16x16xf32>
    %cst_234 = arith.constant 2.500000e-01 : f32
    %237 = vector.broadcast %cst_234 : f32 to vector<16x16xf32>
    %238 = arith.mulf %236, %237 : vector<16x16xf32>
    %cst_235 = arith.constant dense<0xFF800000> : vector<16xf32>
    %239 = vector.multi_reduction <maximumf>, %238, %cst_235 [1] : vector<16x16xf32> to vector<16xf32>
    %240 = vector.shape_cast %239 : vector<16xf32> to vector<16x1xf32>
    %241 = vector.broadcast %240 : vector<16x1xf32> to vector<16x16xf32>
    %242 = arith.subf %238, %241 : vector<16x16xf32>
    %243 = math.exp %242 : vector<16x16xf32>
    %cst_236 = arith.constant dense<0.000000e+00> : vector<16xf32>
    %244 = vector.multi_reduction <add>, %243, %cst_236 [1] : vector<16x16xf32> to vector<16xf32>
    %245 = vector.shape_cast %244 : vector<16xf32> to vector<16x1xf32>
    %246 = vector.broadcast %245 : vector<16x1xf32> to vector<16x16xf32>
    %247 = arith.divf %243, %246 : vector<16x16xf32>
    %cst_237 = arith.constant dense<0.000000e+00> : vector<16x16xf32>
    %248 = tpu.matmul %247, %235, %cst_237 {dimension_numbers = #tpu.dot_dimension_numbers<[1], [0], [0], [1], [0, 0, 1, 1], [], []>} : vector<16x16xf32>, vector<16x16xf32>, vector<16x16xf32> -> vector<16x16xf32>
    %c0_238 = arith.constant 0 : index
    %c3_239 = arith.constant 3 : index
    %c0_240 = arith.constant 0 : index
    %c0_241 = arith.constant 0 : index
    %249 = vector.load %arg13[%c0_238, %c3_239, %c0_240, %c0_241] : memref<2x4x16x64xf32, #tpu.memory_space<vmem>>, vector<1x1x16x64xf32>
    %250 = vector.shape_cast %249 : vector<1x1x16x64xf32> to vector<16x64xf32>
    %cst_242 = arith.constant dense<0.000000e+00> : vector<16x64xf32>
    %251 = tpu.matmul %248, %250, %cst_242 {dimension_numbers = #tpu.dot_dimension_numbers<[1], [0], [0], [1], [0, 0, 1, 1], [], []>} : vector<16x16xf32>, vector<16x64xf32>, vector<16x64xf32> -> vector<16x64xf32>
    %252 = arith.addf %214, %251 : vector<16x64xf32>
    %c0_243 = arith.constant 0 : index
    %c0_244 = arith.constant 0 : index
    %c0_245 = arith.constant 0 : index
    %253 = vector.load %arg14[%c0_243, %c0_244, %c0_245] : memref<2x1x64xf32, #tpu.memory_space<vmem>>, vector<1x1x64xf32>
    %254 = vector.shape_cast %253 : vector<1x1x64xf32> to vector<1x64xf32>
    %255 = vector.broadcast %254 : vector<1x64xf32> to vector<16x64xf32>
    %256 = arith.addf %252, %255 : vector<16x64xf32>
    %257 = arith.addf %99, %256 : vector<16x64xf32>
    %c0_246 = arith.constant 0 : index
    %c0_247 = arith.constant 0 : index
    %c0_248 = arith.constant 0 : index
    %258 = vector.load %arg15[%c0_246, %c0_247, %c0_248] : memref<2x1x64xf32, #tpu.memory_space<vmem>>, vector<1x1x64xf32>
    %259 = vector.shape_cast %258 : vector<1x1x64xf32> to vector<1x64xf32>
    %c0_249 = arith.constant 0 : index
    %c0_250 = arith.constant 0 : index
    %c0_251 = arith.constant 0 : index
    %260 = vector.load %arg16[%c0_249, %c0_250, %c0_251] : memref<2x1x64xf32, #tpu.memory_space<vmem>>, vector<1x1x64xf32>
    %261 = vector.shape_cast %260 : vector<1x1x64xf32> to vector<1x64xf32>
    %cst_252 = arith.constant dense<0.000000e+00> : vector<16xf32>
    %262 = vector.multi_reduction <add>, %257, %cst_252 [1] : vector<16x64xf32> to vector<16xf32>
    %263 = vector.shape_cast %262 : vector<16xf32> to vector<16x1xf32>
    %cst_253 = arith.constant 6.400000e+01 : f32
    %264 = vector.broadcast %cst_253 : f32 to vector<16x1xf32>
    %265 = arith.divf %263, %264 : vector<16x1xf32>
    %266 = vector.broadcast %265 : vector<16x1xf32> to vector<16x64xf32>
    %267 = arith.subf %257, %266 : vector<16x64xf32>
    %268 = arith.mulf %267, %267 : vector<16x64xf32>
    %cst_254 = arith.constant dense<0.000000e+00> : vector<16xf32>
    %269 = vector.multi_reduction <add>, %268, %cst_254 [1] : vector<16x64xf32> to vector<16xf32>
    %270 = vector.shape_cast %269 : vector<16xf32> to vector<16x1xf32>
    %cst_255 = arith.constant 6.400000e+01 : f32
    %271 = vector.broadcast %cst_255 : f32 to vector<16x1xf32>
    %272 = arith.divf %270, %271 : vector<16x1xf32>
    %cst_256 = arith.constant 9.99999974E-6 : f32
    %273 = vector.broadcast %cst_256 : f32 to vector<16x1xf32>
    %274 = arith.addf %272, %273 : vector<16x1xf32>
    %275 = math.rsqrt %274 : vector<16x1xf32>
    %276 = vector.broadcast %275 : vector<16x1xf32> to vector<16x64xf32>
    %277 = arith.mulf %267, %276 : vector<16x64xf32>
    %278 = vector.broadcast %259 : vector<1x64xf32> to vector<16x64xf32>
    %279 = arith.mulf %277, %278 : vector<16x64xf32>
    %280 = vector.broadcast %261 : vector<1x64xf32> to vector<16x64xf32>
    %281 = arith.addf %279, %280 : vector<16x64xf32>
    %c0_257 = arith.constant 0 : index
    %c0_258 = arith.constant 0 : index
    %c0_259 = arith.constant 0 : index
    %282 = vector.load %arg17[%c0_257, %c0_258, %c0_259] : memref<2x64x256xf32, #tpu.memory_space<vmem>>, vector<1x64x256xf32>
    %283 = vector.shape_cast %282 : vector<1x64x256xf32> to vector<64x256xf32>
    %cst_260 = arith.constant dense<0.000000e+00> : vector<16x256xf32>
    %284 = tpu.matmul %281, %283, %cst_260 {dimension_numbers = #tpu.dot_dimension_numbers<[1], [0], [0], [1], [0, 0, 1, 1], [], []>} : vector<16x64xf32>, vector<64x256xf32>, vector<16x256xf32> -> vector<16x256xf32>
    %c0_261 = arith.constant 0 : index
    %c0_262 = arith.constant 0 : index
    %c0_263 = arith.constant 0 : index
    %285 = vector.load %arg18[%c0_261, %c0_262, %c0_263] : memref<2x1x256xf32, #tpu.memory_space<vmem>>, vector<1x1x256xf32>
    %286 = vector.shape_cast %285 : vector<1x1x256xf32> to vector<1x256xf32>
    %287 = vector.broadcast %286 : vector<1x256xf32> to vector<16x256xf32>
    %288 = arith.addf %284, %287 : vector<16x256xf32>
    %cst_264 = arith.constant 0.000000e+00 : f32
    %289 = vector.broadcast %cst_264 : f32 to vector<16x256xf32>
    %290 = arith.maximumf %288, %289 : vector<16x256xf32>
    %c0_265 = arith.constant 0 : index
    %c0_266 = arith.constant 0 : index
    %c0_267 = arith.constant 0 : index
    %291 = vector.load %arg19[%c0_265, %c0_266, %c0_267] : memref<2x256x64xf32, #tpu.memory_space<vmem>>, vector<1x256x64xf32>
    %292 = vector.shape_cast %291 : vector<1x256x64xf32> to vector<256x64xf32>
    %cst_268 = arith.constant dense<0.000000e+00> : vector<16x64xf32>
    %293 = tpu.matmul %290, %292, %cst_268 {dimension_numbers = #tpu.dot_dimension_numbers<[1], [0], [0], [1], [0, 0, 1, 1], [], []>} : vector<16x256xf32>, vector<256x64xf32>, vector<16x64xf32> -> vector<16x64xf32>
    %c0_269 = arith.constant 0 : index
    %c0_270 = arith.constant 0 : index
    %c0_271 = arith.constant 0 : index
    %294 = vector.load %arg20[%c0_269, %c0_270, %c0_271] : memref<2x1x64xf32, #tpu.memory_space<vmem>>, vector<1x1x64xf32>
    %295 = vector.shape_cast %294 : vector<1x1x64xf32> to vector<1x64xf32>
    %296 = vector.broadcast %295 : vector<1x64xf32> to vector<16x64xf32>
    %297 = arith.addf %293, %296 : vector<16x64xf32>
    %298 = arith.addf %281, %297 : vector<16x64xf32>
    %c0_272 = arith.constant 0 : index
    %c0_273 = arith.constant 0 : index
    %c0_274 = arith.constant 0 : index
    %299 = vector.load %arg21[%c0_272, %c0_273, %c0_274] : memref<2x1x64xf32, #tpu.memory_space<vmem>>, vector<1x1x64xf32>
    %300 = vector.shape_cast %299 : vector<1x1x64xf32> to vector<1x64xf32>
    %c0_275 = arith.constant 0 : index
    %c0_276 = arith.constant 0 : index
    %c0_277 = arith.constant 0 : index
    %301 = vector.load %arg22[%c0_275, %c0_276, %c0_277] : memref<2x1x64xf32, #tpu.memory_space<vmem>>, vector<1x1x64xf32>
    %302 = vector.shape_cast %301 : vector<1x1x64xf32> to vector<1x64xf32>
    %cst_278 = arith.constant dense<0.000000e+00> : vector<16xf32>
    %303 = vector.multi_reduction <add>, %298, %cst_278 [1] : vector<16x64xf32> to vector<16xf32>
    %304 = vector.shape_cast %303 : vector<16xf32> to vector<16x1xf32>
    %cst_279 = arith.constant 6.400000e+01 : f32
    %305 = vector.broadcast %cst_279 : f32 to vector<16x1xf32>
    %306 = arith.divf %304, %305 : vector<16x1xf32>
    %307 = vector.broadcast %306 : vector<16x1xf32> to vector<16x64xf32>
    %308 = arith.subf %298, %307 : vector<16x64xf32>
    %309 = arith.mulf %308, %308 : vector<16x64xf32>
    %cst_280 = arith.constant dense<0.000000e+00> : vector<16xf32>
    %310 = vector.multi_reduction <add>, %309, %cst_280 [1] : vector<16x64xf32> to vector<16xf32>
    %311 = vector.shape_cast %310 : vector<16xf32> to vector<16x1xf32>
    %cst_281 = arith.constant 6.400000e+01 : f32
    %312 = vector.broadcast %cst_281 : f32 to vector<16x1xf32>
    %313 = arith.divf %311, %312 : vector<16x1xf32>
    %cst_282 = arith.constant 9.99999974E-6 : f32
    %314 = vector.broadcast %cst_282 : f32 to vector<16x1xf32>
    %315 = arith.addf %313, %314 : vector<16x1xf32>
    %316 = math.rsqrt %315 : vector<16x1xf32>
    %317 = vector.broadcast %316 : vector<16x1xf32> to vector<16x64xf32>
    %318 = arith.mulf %308, %317 : vector<16x64xf32>
    %319 = vector.broadcast %300 : vector<1x64xf32> to vector<16x64xf32>
    %320 = arith.mulf %318, %319 : vector<16x64xf32>
    %321 = vector.broadcast %302 : vector<1x64xf32> to vector<16x64xf32>
    %322 = arith.addf %320, %321 : vector<16x64xf32>
    %cst_283 = arith.constant 0.000000e+00 : f32
    %323 = vector.broadcast %cst_283 : f32 to vector<16x64xf32>
    %c1_284 = arith.constant 1 : index
    %c0_285 = arith.constant 0 : index
    %c0_286 = arith.constant 0 : index
    %c0_287 = arith.constant 0 : index
    %324 = vector.load %arg7[%c1_284, %c0_285, %c0_286, %c0_287] : memref<2x4x64x16xf32, #tpu.memory_space<vmem>>, vector<1x1x64x16xf32>
    %325 = vector.shape_cast %324 : vector<1x1x64x16xf32> to vector<64x16xf32>
    %cst_288 = arith.constant dense<0.000000e+00> : vector<16x16xf32>
    %326 = tpu.matmul %322, %325, %cst_288 {dimension_numbers = #tpu.dot_dimension_numbers<[1], [0], [0], [1], [0, 0, 1, 1], [], []>} : vector<16x64xf32>, vector<64x16xf32>, vector<16x16xf32> -> vector<16x16xf32>
    %c1_289 = arith.constant 1 : index
    %c0_290 = arith.constant 0 : index
    %c0_291 = arith.constant 0 : index
    %c0_292 = arith.constant 0 : index
    %327 = vector.load %arg10[%c1_289, %c0_290, %c0_291, %c0_292] : memref<2x4x1x16xf32, #tpu.memory_space<vmem>>, vector<1x1x1x16xf32>
    %328 = vector.shape_cast %327 : vector<1x1x1x16xf32> to vector<1x16xf32>
    %329 = vector.broadcast %328 : vector<1x16xf32> to vector<16x16xf32>
    %330 = arith.addf %326, %329 : vector<16x16xf32>
    %c1_293 = arith.constant 1 : index
    %c0_294 = arith.constant 0 : index
    %c0_295 = arith.constant 0 : index
    %c0_296 = arith.constant 0 : index
    %331 = vector.load %arg8[%c1_293, %c0_294, %c0_295, %c0_296] : memref<2x4x64x16xf32, #tpu.memory_space<vmem>>, vector<1x1x64x16xf32>
    %332 = vector.shape_cast %331 : vector<1x1x64x16xf32> to vector<64x16xf32>
    %cst_297 = arith.constant dense<0.000000e+00> : vector<16x16xf32>
    %333 = tpu.matmul %322, %332, %cst_297 {dimension_numbers = #tpu.dot_dimension_numbers<[1], [0], [0], [1], [0, 0, 1, 1], [], []>} : vector<16x64xf32>, vector<64x16xf32>, vector<16x16xf32> -> vector<16x16xf32>
    %c1_298 = arith.constant 1 : index
    %c0_299 = arith.constant 0 : index
    %c0_300 = arith.constant 0 : index
    %c0_301 = arith.constant 0 : index
    %334 = vector.load %arg11[%c1_298, %c0_299, %c0_300, %c0_301] : memref<2x4x1x16xf32, #tpu.memory_space<vmem>>, vector<1x1x1x16xf32>
    %335 = vector.shape_cast %334 : vector<1x1x1x16xf32> to vector<1x16xf32>
    %336 = vector.broadcast %335 : vector<1x16xf32> to vector<16x16xf32>
    %337 = arith.addf %333, %336 : vector<16x16xf32>
    %c1_302 = arith.constant 1 : index
    %c0_303 = arith.constant 0 : index
    %c0_304 = arith.constant 0 : index
    %c0_305 = arith.constant 0 : index
    %338 = vector.load %arg9[%c1_302, %c0_303, %c0_304, %c0_305] : memref<2x4x64x16xf32, #tpu.memory_space<vmem>>, vector<1x1x64x16xf32>
    %339 = vector.shape_cast %338 : vector<1x1x64x16xf32> to vector<64x16xf32>
    %cst_306 = arith.constant dense<0.000000e+00> : vector<16x16xf32>
    %340 = tpu.matmul %322, %339, %cst_306 {dimension_numbers = #tpu.dot_dimension_numbers<[1], [0], [0], [1], [0, 0, 1, 1], [], []>} : vector<16x64xf32>, vector<64x16xf32>, vector<16x16xf32> -> vector<16x16xf32>
    %c1_307 = arith.constant 1 : index
    %c0_308 = arith.constant 0 : index
    %c0_309 = arith.constant 0 : index
    %c0_310 = arith.constant 0 : index
    %341 = vector.load %arg12[%c1_307, %c0_308, %c0_309, %c0_310] : memref<2x4x1x16xf32, #tpu.memory_space<vmem>>, vector<1x1x1x16xf32>
    %342 = vector.shape_cast %341 : vector<1x1x1x16xf32> to vector<1x16xf32>
    %343 = vector.broadcast %342 : vector<1x16xf32> to vector<16x16xf32>
    %344 = arith.addf %340, %343 : vector<16x16xf32>
    %cst_311 = arith.constant dense<0.000000e+00> : vector<16x16xf32>
    %345 = tpu.matmul %330, %337, %cst_311 {dimension_numbers = #tpu.dot_dimension_numbers<[1], [1], [0], [0], [0, 0, 1, 0], [], []>} : vector<16x16xf32>, vector<16x16xf32>, vector<16x16xf32> -> vector<16x16xf32>
    %cst_312 = arith.constant 2.500000e-01 : f32
    %346 = vector.broadcast %cst_312 : f32 to vector<16x16xf32>
    %347 = arith.mulf %345, %346 : vector<16x16xf32>
    %cst_313 = arith.constant dense<0xFF800000> : vector<16xf32>
    %348 = vector.multi_reduction <maximumf>, %347, %cst_313 [1] : vector<16x16xf32> to vector<16xf32>
    %349 = vector.shape_cast %348 : vector<16xf32> to vector<16x1xf32>
    %350 = vector.broadcast %349 : vector<16x1xf32> to vector<16x16xf32>
    %351 = arith.subf %347, %350 : vector<16x16xf32>
    %352 = math.exp %351 : vector<16x16xf32>
    %cst_314 = arith.constant dense<0.000000e+00> : vector<16xf32>
    %353 = vector.multi_reduction <add>, %352, %cst_314 [1] : vector<16x16xf32> to vector<16xf32>
    %354 = vector.shape_cast %353 : vector<16xf32> to vector<16x1xf32>
    %355 = vector.broadcast %354 : vector<16x1xf32> to vector<16x16xf32>
    %356 = arith.divf %352, %355 : vector<16x16xf32>
    %cst_315 = arith.constant dense<0.000000e+00> : vector<16x16xf32>
    %357 = tpu.matmul %356, %344, %cst_315 {dimension_numbers = #tpu.dot_dimension_numbers<[1], [0], [0], [1], [0, 0, 1, 1], [], []>} : vector<16x16xf32>, vector<16x16xf32>, vector<16x16xf32> -> vector<16x16xf32>
    %c1_316 = arith.constant 1 : index
    %c0_317 = arith.constant 0 : index
    %c0_318 = arith.constant 0 : index
    %c0_319 = arith.constant 0 : index
    %358 = vector.load %arg13[%c1_316, %c0_317, %c0_318, %c0_319] : memref<2x4x16x64xf32, #tpu.memory_space<vmem>>, vector<1x1x16x64xf32>
    %359 = vector.shape_cast %358 : vector<1x1x16x64xf32> to vector<16x64xf32>
    %cst_320 = arith.constant dense<0.000000e+00> : vector<16x64xf32>
    %360 = tpu.matmul %357, %359, %cst_320 {dimension_numbers = #tpu.dot_dimension_numbers<[1], [0], [0], [1], [0, 0, 1, 1], [], []>} : vector<16x16xf32>, vector<16x64xf32>, vector<16x64xf32> -> vector<16x64xf32>
    %361 = arith.addf %323, %360 : vector<16x64xf32>
    %c1_321 = arith.constant 1 : index
    %c1_322 = arith.constant 1 : index
    %c0_323 = arith.constant 0 : index
    %c0_324 = arith.constant 0 : index
    %362 = vector.load %arg7[%c1_321, %c1_322, %c0_323, %c0_324] : memref<2x4x64x16xf32, #tpu.memory_space<vmem>>, vector<1x1x64x16xf32>
    %363 = vector.shape_cast %362 : vector<1x1x64x16xf32> to vector<64x16xf32>
    %cst_325 = arith.constant dense<0.000000e+00> : vector<16x16xf32>
    %364 = tpu.matmul %322, %363, %cst_325 {dimension_numbers = #tpu.dot_dimension_numbers<[1], [0], [0], [1], [0, 0, 1, 1], [], []>} : vector<16x64xf32>, vector<64x16xf32>, vector<16x16xf32> -> vector<16x16xf32>
    %c1_326 = arith.constant 1 : index
    %c1_327 = arith.constant 1 : index
    %c0_328 = arith.constant 0 : index
    %c0_329 = arith.constant 0 : index
    %365 = vector.load %arg10[%c1_326, %c1_327, %c0_328, %c0_329] : memref<2x4x1x16xf32, #tpu.memory_space<vmem>>, vector<1x1x1x16xf32>
    %366 = vector.shape_cast %365 : vector<1x1x1x16xf32> to vector<1x16xf32>
    %367 = vector.broadcast %366 : vector<1x16xf32> to vector<16x16xf32>
    %368 = arith.addf %364, %367 : vector<16x16xf32>
    %c1_330 = arith.constant 1 : index
    %c1_331 = arith.constant 1 : index
    %c0_332 = arith.constant 0 : index
    %c0_333 = arith.constant 0 : index
    %369 = vector.load %arg8[%c1_330, %c1_331, %c0_332, %c0_333] : memref<2x4x64x16xf32, #tpu.memory_space<vmem>>, vector<1x1x64x16xf32>
    %370 = vector.shape_cast %369 : vector<1x1x64x16xf32> to vector<64x16xf32>
    %cst_334 = arith.constant dense<0.000000e+00> : vector<16x16xf32>
    %371 = tpu.matmul %322, %370, %cst_334 {dimension_numbers = #tpu.dot_dimension_numbers<[1], [0], [0], [1], [0, 0, 1, 1], [], []>} : vector<16x64xf32>, vector<64x16xf32>, vector<16x16xf32> -> vector<16x16xf32>
    %c1_335 = arith.constant 1 : index
    %c1_336 = arith.constant 1 : index
    %c0_337 = arith.constant 0 : index
    %c0_338 = arith.constant 0 : index
    %372 = vector.load %arg11[%c1_335, %c1_336, %c0_337, %c0_338] : memref<2x4x1x16xf32, #tpu.memory_space<vmem>>, vector<1x1x1x16xf32>
    %373 = vector.shape_cast %372 : vector<1x1x1x16xf32> to vector<1x16xf32>
    %374 = vector.broadcast %373 : vector<1x16xf32> to vector<16x16xf32>
    %375 = arith.addf %371, %374 : vector<16x16xf32>
    %c1_339 = arith.constant 1 : index
    %c1_340 = arith.constant 1 : index
    %c0_341 = arith.constant 0 : index
    %c0_342 = arith.constant 0 : index
    %376 = vector.load %arg9[%c1_339, %c1_340, %c0_341, %c0_342] : memref<2x4x64x16xf32, #tpu.memory_space<vmem>>, vector<1x1x64x16xf32>
    %377 = vector.shape_cast %376 : vector<1x1x64x16xf32> to vector<64x16xf32>
    %cst_343 = arith.constant dense<0.000000e+00> : vector<16x16xf32>
    %378 = tpu.matmul %322, %377, %cst_343 {dimension_numbers = #tpu.dot_dimension_numbers<[1], [0], [0], [1], [0, 0, 1, 1], [], []>} : vector<16x64xf32>, vector<64x16xf32>, vector<16x16xf32> -> vector<16x16xf32>
    %c1_344 = arith.constant 1 : index
    %c1_345 = arith.constant 1 : index
    %c0_346 = arith.constant 0 : index
    %c0_347 = arith.constant 0 : index
    %379 = vector.load %arg12[%c1_344, %c1_345, %c0_346, %c0_347] : memref<2x4x1x16xf32, #tpu.memory_space<vmem>>, vector<1x1x1x16xf32>
    %380 = vector.shape_cast %379 : vector<1x1x1x16xf32> to vector<1x16xf32>
    %381 = vector.broadcast %380 : vector<1x16xf32> to vector<16x16xf32>
    %382 = arith.addf %378, %381 : vector<16x16xf32>
    %cst_348 = arith.constant dense<0.000000e+00> : vector<16x16xf32>
    %383 = tpu.matmul %368, %375, %cst_348 {dimension_numbers = #tpu.dot_dimension_numbers<[1], [1], [0], [0], [0, 0, 1, 0], [], []>} : vector<16x16xf32>, vector<16x16xf32>, vector<16x16xf32> -> vector<16x16xf32>
    %cst_349 = arith.constant 2.500000e-01 : f32
    %384 = vector.broadcast %cst_349 : f32 to vector<16x16xf32>
    %385 = arith.mulf %383, %384 : vector<16x16xf32>
    %cst_350 = arith.constant dense<0xFF800000> : vector<16xf32>
    %386 = vector.multi_reduction <maximumf>, %385, %cst_350 [1] : vector<16x16xf32> to vector<16xf32>
    %387 = vector.shape_cast %386 : vector<16xf32> to vector<16x1xf32>
    %388 = vector.broadcast %387 : vector<16x1xf32> to vector<16x16xf32>
    %389 = arith.subf %385, %388 : vector<16x16xf32>
    %390 = math.exp %389 : vector<16x16xf32>
    %cst_351 = arith.constant dense<0.000000e+00> : vector<16xf32>
    %391 = vector.multi_reduction <add>, %390, %cst_351 [1] : vector<16x16xf32> to vector<16xf32>
    %392 = vector.shape_cast %391 : vector<16xf32> to vector<16x1xf32>
    %393 = vector.broadcast %392 : vector<16x1xf32> to vector<16x16xf32>
    %394 = arith.divf %390, %393 : vector<16x16xf32>
    %cst_352 = arith.constant dense<0.000000e+00> : vector<16x16xf32>
    %395 = tpu.matmul %394, %382, %cst_352 {dimension_numbers = #tpu.dot_dimension_numbers<[1], [0], [0], [1], [0, 0, 1, 1], [], []>} : vector<16x16xf32>, vector<16x16xf32>, vector<16x16xf32> -> vector<16x16xf32>
    %c1_353 = arith.constant 1 : index
    %c1_354 = arith.constant 1 : index
    %c0_355 = arith.constant 0 : index
    %c0_356 = arith.constant 0 : index
    %396 = vector.load %arg13[%c1_353, %c1_354, %c0_355, %c0_356] : memref<2x4x16x64xf32, #tpu.memory_space<vmem>>, vector<1x1x16x64xf32>
    %397 = vector.shape_cast %396 : vector<1x1x16x64xf32> to vector<16x64xf32>
    %cst_357 = arith.constant dense<0.000000e+00> : vector<16x64xf32>
    %398 = tpu.matmul %395, %397, %cst_357 {dimension_numbers = #tpu.dot_dimension_numbers<[1], [0], [0], [1], [0, 0, 1, 1], [], []>} : vector<16x16xf32>, vector<16x64xf32>, vector<16x64xf32> -> vector<16x64xf32>
    %399 = arith.addf %361, %398 : vector<16x64xf32>
    %c1_358 = arith.constant 1 : index
    %c2_359 = arith.constant 2 : index
    %c0_360 = arith.constant 0 : index
    %c0_361 = arith.constant 0 : index
    %400 = vector.load %arg7[%c1_358, %c2_359, %c0_360, %c0_361] : memref<2x4x64x16xf32, #tpu.memory_space<vmem>>, vector<1x1x64x16xf32>
    %401 = vector.shape_cast %400 : vector<1x1x64x16xf32> to vector<64x16xf32>
    %cst_362 = arith.constant dense<0.000000e+00> : vector<16x16xf32>
    %402 = tpu.matmul %322, %401, %cst_362 {dimension_numbers = #tpu.dot_dimension_numbers<[1], [0], [0], [1], [0, 0, 1, 1], [], []>} : vector<16x64xf32>, vector<64x16xf32>, vector<16x16xf32> -> vector<16x16xf32>
    %c1_363 = arith.constant 1 : index
    %c2_364 = arith.constant 2 : index
    %c0_365 = arith.constant 0 : index
    %c0_366 = arith.constant 0 : index
    %403 = vector.load %arg10[%c1_363, %c2_364, %c0_365, %c0_366] : memref<2x4x1x16xf32, #tpu.memory_space<vmem>>, vector<1x1x1x16xf32>
    %404 = vector.shape_cast %403 : vector<1x1x1x16xf32> to vector<1x16xf32>
    %405 = vector.broadcast %404 : vector<1x16xf32> to vector<16x16xf32>
    %406 = arith.addf %402, %405 : vector<16x16xf32>
    %c1_367 = arith.constant 1 : index
    %c2_368 = arith.constant 2 : index
    %c0_369 = arith.constant 0 : index
    %c0_370 = arith.constant 0 : index
    %407 = vector.load %arg8[%c1_367, %c2_368, %c0_369, %c0_370] : memref<2x4x64x16xf32, #tpu.memory_space<vmem>>, vector<1x1x64x16xf32>
    %408 = vector.shape_cast %407 : vector<1x1x64x16xf32> to vector<64x16xf32>
    %cst_371 = arith.constant dense<0.000000e+00> : vector<16x16xf32>
    %409 = tpu.matmul %322, %408, %cst_371 {dimension_numbers = #tpu.dot_dimension_numbers<[1], [0], [0], [1], [0, 0, 1, 1], [], []>} : vector<16x64xf32>, vector<64x16xf32>, vector<16x16xf32> -> vector<16x16xf32>
    %c1_372 = arith.constant 1 : index
    %c2_373 = arith.constant 2 : index
    %c0_374 = arith.constant 0 : index
    %c0_375 = arith.constant 0 : index
    %410 = vector.load %arg11[%c1_372, %c2_373, %c0_374, %c0_375] : memref<2x4x1x16xf32, #tpu.memory_space<vmem>>, vector<1x1x1x16xf32>
    %411 = vector.shape_cast %410 : vector<1x1x1x16xf32> to vector<1x16xf32>
    %412 = vector.broadcast %411 : vector<1x16xf32> to vector<16x16xf32>
    %413 = arith.addf %409, %412 : vector<16x16xf32>
    %c1_376 = arith.constant 1 : index
    %c2_377 = arith.constant 2 : index
    %c0_378 = arith.constant 0 : index
    %c0_379 = arith.constant 0 : index
    %414 = vector.load %arg9[%c1_376, %c2_377, %c0_378, %c0_379] : memref<2x4x64x16xf32, #tpu.memory_space<vmem>>, vector<1x1x64x16xf32>
    %415 = vector.shape_cast %414 : vector<1x1x64x16xf32> to vector<64x16xf32>
    %cst_380 = arith.constant dense<0.000000e+00> : vector<16x16xf32>
    %416 = tpu.matmul %322, %415, %cst_380 {dimension_numbers = #tpu.dot_dimension_numbers<[1], [0], [0], [1], [0, 0, 1, 1], [], []>} : vector<16x64xf32>, vector<64x16xf32>, vector<16x16xf32> -> vector<16x16xf32>
    %c1_381 = arith.constant 1 : index
    %c2_382 = arith.constant 2 : index
    %c0_383 = arith.constant 0 : index
    %c0_384 = arith.constant 0 : index
    %417 = vector.load %arg12[%c1_381, %c2_382, %c0_383, %c0_384] : memref<2x4x1x16xf32, #tpu.memory_space<vmem>>, vector<1x1x1x16xf32>
    %418 = vector.shape_cast %417 : vector<1x1x1x16xf32> to vector<1x16xf32>
    %419 = vector.broadcast %418 : vector<1x16xf32> to vector<16x16xf32>
    %420 = arith.addf %416, %419 : vector<16x16xf32>
    %cst_385 = arith.constant dense<0.000000e+00> : vector<16x16xf32>
    %421 = tpu.matmul %406, %413, %cst_385 {dimension_numbers = #tpu.dot_dimension_numbers<[1], [1], [0], [0], [0, 0, 1, 0], [], []>} : vector<16x16xf32>, vector<16x16xf32>, vector<16x16xf32> -> vector<16x16xf32>
    %cst_386 = arith.constant 2.500000e-01 : f32
    %422 = vector.broadcast %cst_386 : f32 to vector<16x16xf32>
    %423 = arith.mulf %421, %422 : vector<16x16xf32>
    %cst_387 = arith.constant dense<0xFF800000> : vector<16xf32>
    %424 = vector.multi_reduction <maximumf>, %423, %cst_387 [1] : vector<16x16xf32> to vector<16xf32>
    %425 = vector.shape_cast %424 : vector<16xf32> to vector<16x1xf32>
    %426 = vector.broadcast %425 : vector<16x1xf32> to vector<16x16xf32>
    %427 = arith.subf %423, %426 : vector<16x16xf32>
    %428 = math.exp %427 : vector<16x16xf32>
    %cst_388 = arith.constant dense<0.000000e+00> : vector<16xf32>
    %429 = vector.multi_reduction <add>, %428, %cst_388 [1] : vector<16x16xf32> to vector<16xf32>
    %430 = vector.shape_cast %429 : vector<16xf32> to vector<16x1xf32>
    %431 = vector.broadcast %430 : vector<16x1xf32> to vector<16x16xf32>
    %432 = arith.divf %428, %431 : vector<16x16xf32>
    %cst_389 = arith.constant dense<0.000000e+00> : vector<16x16xf32>
    %433 = tpu.matmul %432, %420, %cst_389 {dimension_numbers = #tpu.dot_dimension_numbers<[1], [0], [0], [1], [0, 0, 1, 1], [], []>} : vector<16x16xf32>, vector<16x16xf32>, vector<16x16xf32> -> vector<16x16xf32>
    %c1_390 = arith.constant 1 : index
    %c2_391 = arith.constant 2 : index
    %c0_392 = arith.constant 0 : index
    %c0_393 = arith.constant 0 : index
    %434 = vector.load %arg13[%c1_390, %c2_391, %c0_392, %c0_393] : memref<2x4x16x64xf32, #tpu.memory_space<vmem>>, vector<1x1x16x64xf32>
    %435 = vector.shape_cast %434 : vector<1x1x16x64xf32> to vector<16x64xf32>
    %cst_394 = arith.constant dense<0.000000e+00> : vector<16x64xf32>
    %436 = tpu.matmul %433, %435, %cst_394 {dimension_numbers = #tpu.dot_dimension_numbers<[1], [0], [0], [1], [0, 0, 1, 1], [], []>} : vector<16x16xf32>, vector<16x64xf32>, vector<16x64xf32> -> vector<16x64xf32>
    %437 = arith.addf %399, %436 : vector<16x64xf32>
    %c1_395 = arith.constant 1 : index
    %c3_396 = arith.constant 3 : index
    %c0_397 = arith.constant 0 : index
    %c0_398 = arith.constant 0 : index
    %438 = vector.load %arg7[%c1_395, %c3_396, %c0_397, %c0_398] : memref<2x4x64x16xf32, #tpu.memory_space<vmem>>, vector<1x1x64x16xf32>
    %439 = vector.shape_cast %438 : vector<1x1x64x16xf32> to vector<64x16xf32>
    %cst_399 = arith.constant dense<0.000000e+00> : vector<16x16xf32>
    %440 = tpu.matmul %322, %439, %cst_399 {dimension_numbers = #tpu.dot_dimension_numbers<[1], [0], [0], [1], [0, 0, 1, 1], [], []>} : vector<16x64xf32>, vector<64x16xf32>, vector<16x16xf32> -> vector<16x16xf32>
    %c1_400 = arith.constant 1 : index
    %c3_401 = arith.constant 3 : index
    %c0_402 = arith.constant 0 : index
    %c0_403 = arith.constant 0 : index
    %441 = vector.load %arg10[%c1_400, %c3_401, %c0_402, %c0_403] : memref<2x4x1x16xf32, #tpu.memory_space<vmem>>, vector<1x1x1x16xf32>
    %442 = vector.shape_cast %441 : vector<1x1x1x16xf32> to vector<1x16xf32>
    %443 = vector.broadcast %442 : vector<1x16xf32> to vector<16x16xf32>
    %444 = arith.addf %440, %443 : vector<16x16xf32>
    %c1_404 = arith.constant 1 : index
    %c3_405 = arith.constant 3 : index
    %c0_406 = arith.constant 0 : index
    %c0_407 = arith.constant 0 : index
    %445 = vector.load %arg8[%c1_404, %c3_405, %c0_406, %c0_407] : memref<2x4x64x16xf32, #tpu.memory_space<vmem>>, vector<1x1x64x16xf32>
    %446 = vector.shape_cast %445 : vector<1x1x64x16xf32> to vector<64x16xf32>
    %cst_408 = arith.constant dense<0.000000e+00> : vector<16x16xf32>
    %447 = tpu.matmul %322, %446, %cst_408 {dimension_numbers = #tpu.dot_dimension_numbers<[1], [0], [0], [1], [0, 0, 1, 1], [], []>} : vector<16x64xf32>, vector<64x16xf32>, vector<16x16xf32> -> vector<16x16xf32>
    %c1_409 = arith.constant 1 : index
    %c3_410 = arith.constant 3 : index
    %c0_411 = arith.constant 0 : index
    %c0_412 = arith.constant 0 : index
    %448 = vector.load %arg11[%c1_409, %c3_410, %c0_411, %c0_412] : memref<2x4x1x16xf32, #tpu.memory_space<vmem>>, vector<1x1x1x16xf32>
    %449 = vector.shape_cast %448 : vector<1x1x1x16xf32> to vector<1x16xf32>
    %450 = vector.broadcast %449 : vector<1x16xf32> to vector<16x16xf32>
    %451 = arith.addf %447, %450 : vector<16x16xf32>
    %c1_413 = arith.constant 1 : index
    %c3_414 = arith.constant 3 : index
    %c0_415 = arith.constant 0 : index
    %c0_416 = arith.constant 0 : index
    %452 = vector.load %arg9[%c1_413, %c3_414, %c0_415, %c0_416] : memref<2x4x64x16xf32, #tpu.memory_space<vmem>>, vector<1x1x64x16xf32>
    %453 = vector.shape_cast %452 : vector<1x1x64x16xf32> to vector<64x16xf32>
    %cst_417 = arith.constant dense<0.000000e+00> : vector<16x16xf32>
    %454 = tpu.matmul %322, %453, %cst_417 {dimension_numbers = #tpu.dot_dimension_numbers<[1], [0], [0], [1], [0, 0, 1, 1], [], []>} : vector<16x64xf32>, vector<64x16xf32>, vector<16x16xf32> -> vector<16x16xf32>
    %c1_418 = arith.constant 1 : index
    %c3_419 = arith.constant 3 : index
    %c0_420 = arith.constant 0 : index
    %c0_421 = arith.constant 0 : index
    %455 = vector.load %arg12[%c1_418, %c3_419, %c0_420, %c0_421] : memref<2x4x1x16xf32, #tpu.memory_space<vmem>>, vector<1x1x1x16xf32>
    %456 = vector.shape_cast %455 : vector<1x1x1x16xf32> to vector<1x16xf32>
    %457 = vector.broadcast %456 : vector<1x16xf32> to vector<16x16xf32>
    %458 = arith.addf %454, %457 : vector<16x16xf32>
    %cst_422 = arith.constant dense<0.000000e+00> : vector<16x16xf32>
    %459 = tpu.matmul %444, %451, %cst_422 {dimension_numbers = #tpu.dot_dimension_numbers<[1], [1], [0], [0], [0, 0, 1, 0], [], []>} : vector<16x16xf32>, vector<16x16xf32>, vector<16x16xf32> -> vector<16x16xf32>
    %cst_423 = arith.constant 2.500000e-01 : f32
    %460 = vector.broadcast %cst_423 : f32 to vector<16x16xf32>
    %461 = arith.mulf %459, %460 : vector<16x16xf32>
    %cst_424 = arith.constant dense<0xFF800000> : vector<16xf32>
    %462 = vector.multi_reduction <maximumf>, %461, %cst_424 [1] : vector<16x16xf32> to vector<16xf32>
    %463 = vector.shape_cast %462 : vector<16xf32> to vector<16x1xf32>
    %464 = vector.broadcast %463 : vector<16x1xf32> to vector<16x16xf32>
    %465 = arith.subf %461, %464 : vector<16x16xf32>
    %466 = math.exp %465 : vector<16x16xf32>
    %cst_425 = arith.constant dense<0.000000e+00> : vector<16xf32>
    %467 = vector.multi_reduction <add>, %466, %cst_425 [1] : vector<16x16xf32> to vector<16xf32>
    %468 = vector.shape_cast %467 : vector<16xf32> to vector<16x1xf32>
    %469 = vector.broadcast %468 : vector<16x1xf32> to vector<16x16xf32>
    %470 = arith.divf %466, %469 : vector<16x16xf32>
    %cst_426 = arith.constant dense<0.000000e+00> : vector<16x16xf32>
    %471 = tpu.matmul %470, %458, %cst_426 {dimension_numbers = #tpu.dot_dimension_numbers<[1], [0], [0], [1], [0, 0, 1, 1], [], []>} : vector<16x16xf32>, vector<16x16xf32>, vector<16x16xf32> -> vector<16x16xf32>
    %c1_427 = arith.constant 1 : index
    %c3_428 = arith.constant 3 : index
    %c0_429 = arith.constant 0 : index
    %c0_430 = arith.constant 0 : index
    %472 = vector.load %arg13[%c1_427, %c3_428, %c0_429, %c0_430] : memref<2x4x16x64xf32, #tpu.memory_space<vmem>>, vector<1x1x16x64xf32>
    %473 = vector.shape_cast %472 : vector<1x1x16x64xf32> to vector<16x64xf32>
    %cst_431 = arith.constant dense<0.000000e+00> : vector<16x64xf32>
    %474 = tpu.matmul %471, %473, %cst_431 {dimension_numbers = #tpu.dot_dimension_numbers<[1], [0], [0], [1], [0, 0, 1, 1], [], []>} : vector<16x16xf32>, vector<16x64xf32>, vector<16x64xf32> -> vector<16x64xf32>
    %475 = arith.addf %437, %474 : vector<16x64xf32>
    %c1_432 = arith.constant 1 : index
    %c0_433 = arith.constant 0 : index
    %c0_434 = arith.constant 0 : index
    %476 = vector.load %arg14[%c1_432, %c0_433, %c0_434] : memref<2x1x64xf32, #tpu.memory_space<vmem>>, vector<1x1x64xf32>
    %477 = vector.shape_cast %476 : vector<1x1x64xf32> to vector<1x64xf32>
    %478 = vector.broadcast %477 : vector<1x64xf32> to vector<16x64xf32>
    %479 = arith.addf %475, %478 : vector<16x64xf32>
    %480 = arith.addf %322, %479 : vector<16x64xf32>
    %c1_435 = arith.constant 1 : index
    %c0_436 = arith.constant 0 : index
    %c0_437 = arith.constant 0 : index
    %481 = vector.load %arg15[%c1_435, %c0_436, %c0_437] : memref<2x1x64xf32, #tpu.memory_space<vmem>>, vector<1x1x64xf32>
    %482 = vector.shape_cast %481 : vector<1x1x64xf32> to vector<1x64xf32>
    %c1_438 = arith.constant 1 : index
    %c0_439 = arith.constant 0 : index
    %c0_440 = arith.constant 0 : index
    %483 = vector.load %arg16[%c1_438, %c0_439, %c0_440] : memref<2x1x64xf32, #tpu.memory_space<vmem>>, vector<1x1x64xf32>
    %484 = vector.shape_cast %483 : vector<1x1x64xf32> to vector<1x64xf32>
    %cst_441 = arith.constant dense<0.000000e+00> : vector<16xf32>
    %485 = vector.multi_reduction <add>, %480, %cst_441 [1] : vector<16x64xf32> to vector<16xf32>
    %486 = vector.shape_cast %485 : vector<16xf32> to vector<16x1xf32>
    %cst_442 = arith.constant 6.400000e+01 : f32
    %487 = vector.broadcast %cst_442 : f32 to vector<16x1xf32>
    %488 = arith.divf %486, %487 : vector<16x1xf32>
    %489 = vector.broadcast %488 : vector<16x1xf32> to vector<16x64xf32>
    %490 = arith.subf %480, %489 : vector<16x64xf32>
    %491 = arith.mulf %490, %490 : vector<16x64xf32>
    %cst_443 = arith.constant dense<0.000000e+00> : vector<16xf32>
    %492 = vector.multi_reduction <add>, %491, %cst_443 [1] : vector<16x64xf32> to vector<16xf32>
    %493 = vector.shape_cast %492 : vector<16xf32> to vector<16x1xf32>
    %cst_444 = arith.constant 6.400000e+01 : f32
    %494 = vector.broadcast %cst_444 : f32 to vector<16x1xf32>
    %495 = arith.divf %493, %494 : vector<16x1xf32>
    %cst_445 = arith.constant 9.99999974E-6 : f32
    %496 = vector.broadcast %cst_445 : f32 to vector<16x1xf32>
    %497 = arith.addf %495, %496 : vector<16x1xf32>
    %498 = math.rsqrt %497 : vector<16x1xf32>
    %499 = vector.broadcast %498 : vector<16x1xf32> to vector<16x64xf32>
    %500 = arith.mulf %490, %499 : vector<16x64xf32>
    %501 = vector.broadcast %482 : vector<1x64xf32> to vector<16x64xf32>
    %502 = arith.mulf %500, %501 : vector<16x64xf32>
    %503 = vector.broadcast %484 : vector<1x64xf32> to vector<16x64xf32>
    %504 = arith.addf %502, %503 : vector<16x64xf32>
    %c1_446 = arith.constant 1 : index
    %c0_447 = arith.constant 0 : index
    %c0_448 = arith.constant 0 : index
    %505 = vector.load %arg17[%c1_446, %c0_447, %c0_448] : memref<2x64x256xf32, #tpu.memory_space<vmem>>, vector<1x64x256xf32>
    %506 = vector.shape_cast %505 : vector<1x64x256xf32> to vector<64x256xf32>
    %cst_449 = arith.constant dense<0.000000e+00> : vector<16x256xf32>
    %507 = tpu.matmul %504, %506, %cst_449 {dimension_numbers = #tpu.dot_dimension_numbers<[1], [0], [0], [1], [0, 0, 1, 1], [], []>} : vector<16x64xf32>, vector<64x256xf32>, vector<16x256xf32> -> vector<16x256xf32>
    %c1_450 = arith.constant 1 : index
    %c0_451 = arith.constant 0 : index
    %c0_452 = arith.constant 0 : index
    %508 = vector.load %arg18[%c1_450, %c0_451, %c0_452] : memref<2x1x256xf32, #tpu.memory_space<vmem>>, vector<1x1x256xf32>
    %509 = vector.shape_cast %508 : vector<1x1x256xf32> to vector<1x256xf32>
    %510 = vector.broadcast %509 : vector<1x256xf32> to vector<16x256xf32>
    %511 = arith.addf %507, %510 : vector<16x256xf32>
    %cst_453 = arith.constant 0.000000e+00 : f32
    %512 = vector.broadcast %cst_453 : f32 to vector<16x256xf32>
    %513 = arith.maximumf %511, %512 : vector<16x256xf32>
    %c1_454 = arith.constant 1 : index
    %c0_455 = arith.constant 0 : index
    %c0_456 = arith.constant 0 : index
    %514 = vector.load %arg19[%c1_454, %c0_455, %c0_456] : memref<2x256x64xf32, #tpu.memory_space<vmem>>, vector<1x256x64xf32>
    %515 = vector.shape_cast %514 : vector<1x256x64xf32> to vector<256x64xf32>
    %cst_457 = arith.constant dense<0.000000e+00> : vector<16x64xf32>
    %516 = tpu.matmul %513, %515, %cst_457 {dimension_numbers = #tpu.dot_dimension_numbers<[1], [0], [0], [1], [0, 0, 1, 1], [], []>} : vector<16x256xf32>, vector<256x64xf32>, vector<16x64xf32> -> vector<16x64xf32>
    %c1_458 = arith.constant 1 : index
    %c0_459 = arith.constant 0 : index
    %c0_460 = arith.constant 0 : index
    %517 = vector.load %arg20[%c1_458, %c0_459, %c0_460] : memref<2x1x64xf32, #tpu.memory_space<vmem>>, vector<1x1x64xf32>
    %518 = vector.shape_cast %517 : vector<1x1x64xf32> to vector<1x64xf32>
    %519 = vector.broadcast %518 : vector<1x64xf32> to vector<16x64xf32>
    %520 = arith.addf %516, %519 : vector<16x64xf32>
    %521 = arith.addf %504, %520 : vector<16x64xf32>
    %c1_461 = arith.constant 1 : index
    %c0_462 = arith.constant 0 : index
    %c0_463 = arith.constant 0 : index
    %522 = vector.load %arg21[%c1_461, %c0_462, %c0_463] : memref<2x1x64xf32, #tpu.memory_space<vmem>>, vector<1x1x64xf32>
    %523 = vector.shape_cast %522 : vector<1x1x64xf32> to vector<1x64xf32>
    %c1_464 = arith.constant 1 : index
    %c0_465 = arith.constant 0 : index
    %c0_466 = arith.constant 0 : index
    %524 = vector.load %arg22[%c1_464, %c0_465, %c0_466] : memref<2x1x64xf32, #tpu.memory_space<vmem>>, vector<1x1x64xf32>
    %525 = vector.shape_cast %524 : vector<1x1x64xf32> to vector<1x64xf32>
    %cst_467 = arith.constant dense<0.000000e+00> : vector<16xf32>
    %526 = vector.multi_reduction <add>, %521, %cst_467 [1] : vector<16x64xf32> to vector<16xf32>
    %527 = vector.shape_cast %526 : vector<16xf32> to vector<16x1xf32>
    %cst_468 = arith.constant 6.400000e+01 : f32
    %528 = vector.broadcast %cst_468 : f32 to vector<16x1xf32>
    %529 = arith.divf %527, %528 : vector<16x1xf32>
    %530 = vector.broadcast %529 : vector<16x1xf32> to vector<16x64xf32>
    %531 = arith.subf %521, %530 : vector<16x64xf32>
    %532 = arith.mulf %531, %531 : vector<16x64xf32>
    %cst_469 = arith.constant dense<0.000000e+00> : vector<16xf32>
    %533 = vector.multi_reduction <add>, %532, %cst_469 [1] : vector<16x64xf32> to vector<16xf32>
    %534 = vector.shape_cast %533 : vector<16xf32> to vector<16x1xf32>
    %cst_470 = arith.constant 6.400000e+01 : f32
    %535 = vector.broadcast %cst_470 : f32 to vector<16x1xf32>
    %536 = arith.divf %534, %535 : vector<16x1xf32>
    %cst_471 = arith.constant 9.99999974E-6 : f32
    %537 = vector.broadcast %cst_471 : f32 to vector<16x1xf32>
    %538 = arith.addf %536, %537 : vector<16x1xf32>
    %539 = math.rsqrt %538 : vector<16x1xf32>
    %540 = vector.broadcast %539 : vector<16x1xf32> to vector<16x64xf32>
    %541 = arith.mulf %531, %540 : vector<16x64xf32>
    %542 = vector.broadcast %523 : vector<1x64xf32> to vector<16x64xf32>
    %543 = arith.mulf %541, %542 : vector<16x64xf32>
    %544 = vector.broadcast %525 : vector<1x64xf32> to vector<16x64xf32>
    %545 = arith.addf %543, %544 : vector<16x64xf32>
    %c0_472 = arith.constant 0 : index
    %c0_473 = arith.constant 0 : index
    %c0_474 = arith.constant 0 : index
    %546 = vector.load %arg36[%c0_472, %c0_473, %c0_474] : memref<1x16x64xf32, #tpu.memory_space<vmem>>, vector<1x16x64xf32>
    %547 = vector.shape_cast %546 : vector<1x16x64xf32> to vector<16x64xf32>
    %548 = vector.shape_cast %545 : vector<16x64xf32> to vector<1x16x64xf32>
    tpu.vector_store %arg36[%c0_472, %c0_473, %c0_474], %548 {strides = array<i32>} : memref<1x16x64xf32, #tpu.memory_space<vmem>>, vector<1x16x64xf32>,
    %cst_475 = arith.constant 6.250000e-02 : f32
    %549 = vector.broadcast %cst_475 : f32 to vector<1x16xf32>
    %cst_476 = arith.constant dense<0.000000e+00> : vector<1x64xf32>
    %550 = tpu.matmul %549, %545, %cst_476 {dimension_numbers = #tpu.dot_dimension_numbers<[1], [0], [0], [1], [0, 0, 1, 1], [], []>} : vector<1x16xf32>, vector<16x64xf32>, vector<1x64xf32> -> vector<1x64xf32>
    %cst_477 = arith.constant dense<0.000000e+00> : vector<1x64xf32>
    %551 = tpu.matmul %549, %97, %cst_477 {dimension_numbers = #tpu.dot_dimension_numbers<[1], [0], [0], [1], [0, 0, 1, 1], [], []>} : vector<1x16xf32>, vector<16x64xf32>, vector<1x64xf32> -> vector<1x64xf32>
    %c0_478 = arith.constant 0 : index
    %c0_479 = arith.constant 0 : index
    %552 = vector.load %arg23[%c0_478, %c0_479] : memref<32x64xf32, #tpu.memory_space<vmem>>, vector<32x64xf32>
    %553 = arith.mulf %551, %551 : vector<1x64xf32>
    %cst_480 = arith.constant dense<0.000000e+00> : vector<1xf32>
    %554 = vector.multi_reduction <add>, %553, %cst_480 [1] : vector<1x64xf32> to vector<1xf32>
    %555 = vector.shape_cast %554 : vector<1xf32> to vector<1x1xf32>
    %cst_481 = arith.constant 9.99999993E-9 : f32
    %556 = vector.broadcast %cst_481 : f32 to vector<1x1xf32>
    %557 = arith.addf %555, %556 : vector<1x1xf32>
    %558 = math.rsqrt %557 : vector<1x1xf32>
    %559 = vector.broadcast %558 : vector<1x1xf32> to vector<1x64xf32>
    %560 = arith.mulf %551, %559 : vector<1x64xf32>
    %561 = arith.mulf %552, %552 : vector<32x64xf32>
    %cst_482 = arith.constant dense<0.000000e+00> : vector<32xf32>
    %562 = vector.multi_reduction <add>, %561, %cst_482 [1] : vector<32x64xf32> to vector<32xf32>
    %563 = vector.shape_cast %562 : vector<32xf32> to vector<32x1xf32>
    %cst_483 = arith.constant 9.99999993E-9 : f32
    %564 = vector.broadcast %cst_483 : f32 to vector<32x1xf32>
    %565 = arith.addf %563, %564 : vector<32x1xf32>
    %566 = math.rsqrt %565 : vector<32x1xf32>
    %567 = vector.broadcast %566 : vector<32x1xf32> to vector<32x64xf32>
    %568 = arith.mulf %552, %567 : vector<32x64xf32>
    %cst_484 = arith.constant dense<0.000000e+00> : vector<1x32xf32>
    %569 = tpu.matmul %560, %568, %cst_484 {dimension_numbers = #tpu.dot_dimension_numbers<[1], [1], [0], [0], [0, 0, 1, 0], [], []>} : vector<1x64xf32>, vector<32x64xf32>, vector<1x32xf32> -> vector<1x32xf32>
    %c0_485 = arith.constant 0 : index
    %c0_486 = arith.constant 0 : index
    %c0_487 = arith.constant 0 : index
    %570 = vector.load %arg35[%c0_485, %c0_486, %c0_487] : memref<1x1x32xf32, #tpu.memory_space<vmem>>, vector<1x1x32xf32>
    %571 = vector.shape_cast %570 : vector<1x1x32xf32> to vector<1x32xf32>
    %572 = vector.shape_cast %569 : vector<1x32xf32> to vector<1x1x32xf32>
    tpu.vector_store %arg35[%c0_485, %c0_486, %c0_487], %572 {strides = array<i32>} : memref<1x1x32xf32, #tpu.memory_space<vmem>>, vector<1x1x32xf32>,
    %c0_488 = arith.constant 0 : index
    %c0_489 = arith.constant 0 : index
    %573 = vector.load %arg24[%c0_488, %c0_489] : memref<64x128xf32, #tpu.memory_space<vmem>>, vector<64x128xf32>
    %cst_490 = arith.constant dense<0.000000e+00> : vector<1x128xf32>
    %574 = tpu.matmul %550, %573, %cst_490 {dimension_numbers = #tpu.dot_dimension_numbers<[1], [0], [0], [1], [0, 0, 1, 1], [], []>} : vector<1x64xf32>, vector<64x128xf32>, vector<1x128xf32> -> vector<1x128xf32>
    %c0_491 = arith.constant 0 : index
    %c0_492 = arith.constant 0 : index
    %575 = vector.load %arg25[%c0_491, %c0_492] : memref<32x128xf32, #tpu.memory_space<vmem>>, vector<32x128xf32>
    %cst_493 = arith.constant dense<0.000000e+00> : vector<1x128xf32>
    %576 = tpu.matmul %569, %575, %cst_493 {dimension_numbers = #tpu.dot_dimension_numbers<[1], [0], [0], [1], [0, 0, 1, 1], [], []>} : vector<1x32xf32>, vector<32x128xf32>, vector<1x128xf32> -> vector<1x128xf32>
    %577 = arith.addf %574, %576 : vector<1x128xf32>
    %c0_494 = arith.constant 0 : index
    %c0_495 = arith.constant 0 : index
    %578 = vector.load %arg26[%c0_494, %c0_495] : memref<1x128xf32, #tpu.memory_space<vmem>>, vector<1x128xf32>
    %579 = arith.addf %577, %578 : vector<1x128xf32>
    %cst_496 = arith.constant 0.000000e+00 : f32
    %580 = vector.broadcast %cst_496 : f32 to vector<1x128xf32>
    %581 = arith.maximumf %579, %580 : vector<1x128xf32>
    %c0_497 = arith.constant 0 : index
    %c0_498 = arith.constant 0 : index
    %582 = vector.load %arg27[%c0_497, %c0_498] : memref<128x10xf32, #tpu.memory_space<vmem>>, vector<128x10xf32>
    %cst_499 = arith.constant dense<0.000000e+00> : vector<1x10xf32>
    %583 = tpu.matmul %581, %582, %cst_499 {dimension_numbers = #tpu.dot_dimension_numbers<[1], [0], [0], [1], [0, 0, 1, 1], [], []>} : vector<1x128xf32>, vector<128x10xf32>, vector<1x10xf32> -> vector<1x10xf32>
    %c0_500 = arith.constant 0 : index
    %c0_501 = arith.constant 0 : index
    %584 = vector.load %arg28[%c0_500, %c0_501] : memref<1x10xf32, #tpu.memory_space<vmem>>, vector<1x10xf32>
    %585 = arith.addf %583, %584 : vector<1x10xf32>
    %cst_502 = arith.constant 0.000000e+00 : f32
    %586 = vector.broadcast %cst_502 : f32 to vector<1x10xf32>
    %587 = arith.subf %586, %585 : vector<1x10xf32>
    %588 = math.exp %587 : vector<1x10xf32>
    %cst_503 = arith.constant 1.000000e+00 : f32
    %589 = vector.broadcast %cst_503 : f32 to vector<1x10xf32>
    %590 = arith.addf %589, %588 : vector<1x10xf32>
    %cst_504 = arith.constant 1.000000e+00 : f32
    %591 = vector.broadcast %cst_504 : f32 to vector<1x10xf32>
    %592 = arith.divf %591, %590 : vector<1x10xf32>
    %c0_505 = arith.constant 0 : index
    %c0_506 = arith.constant 0 : index
    %c0_507 = arith.constant 0 : index
    %593 = vector.load %arg34[%c0_505, %c0_506, %c0_507] : memref<1x1x10xf32, #tpu.memory_space<vmem>>, vector<1x1x10xf32>
    %594 = vector.shape_cast %593 : vector<1x1x10xf32> to vector<1x10xf32>
    %595 = vector.shape_cast %592 : vector<1x10xf32> to vector<1x1x10xf32>
    tpu.vector_store %arg34[%c0_505, %c0_506, %c0_507], %595 {strides = array<i32>} : memref<1x1x10xf32, #tpu.memory_space<vmem>>, vector<1x1x10xf32>,
    %c0_508 = arith.constant 0 : index
    %c0_509 = arith.constant 0 : index
    %596 = vector.load %arg29[%c0_508, %c0_509] : memref<10x128xf32, #tpu.memory_space<vmem>>, vector<10x128xf32>
    %cst_510 = arith.constant dense<0.000000e+00> : vector<1x128xf32>
    %597 = tpu.matmul %592, %596, %cst_510 {dimension_numbers = #tpu.dot_dimension_numbers<[1], [0], [0], [1], [0, 0, 1, 1], [], []>} : vector<1x10xf32>, vector<10x128xf32>, vector<1x128xf32> -> vector<1x128xf32>
    %c0_511 = arith.constant 0 : index
    %c0_512 = arith.constant 0 : index
    %598 = vector.load %arg30[%c0_511, %c0_512] : memref<1x128xf32, #tpu.memory_space<vmem>>, vector<1x128xf32>
    %599 = arith.addf %597, %598 : vector<1x128xf32>
    %cst_513 = arith.constant 0.000000e+00 : f32
    %600 = vector.broadcast %cst_513 : f32 to vector<1x128xf32>
    %601 = arith.maximumf %599, %600 : vector<1x128xf32>
    %c0_514 = arith.constant 0 : index
    %c0_515 = arith.constant 0 : index
    %602 = vector.load %arg31[%c0_514, %c0_515] : memref<128x5xf32, #tpu.memory_space<vmem>>, vector<128x5xf32>
    %cst_516 = arith.constant dense<0.000000e+00> : vector<1x5xf32>
    %603 = tpu.matmul %601, %602, %cst_516 {dimension_numbers = #tpu.dot_dimension_numbers<[1], [0], [0], [1], [0, 0, 1, 1], [], []>} : vector<1x128xf32>, vector<128x5xf32>, vector<1x5xf32> -> vector<1x5xf32>
    %c0_517 = arith.constant 0 : index
    %c0_518 = arith.constant 0 : index
    %604 = vector.load %arg32[%c0_517, %c0_518] : memref<1x5xf32, #tpu.memory_space<vmem>>, vector<1x5xf32>
    %605 = arith.addf %603, %604 : vector<1x5xf32>
    %c0_519 = arith.constant 0 : index
    %c0_520 = arith.constant 0 : index
    %c0_521 = arith.constant 0 : index
    %606 = vector.load %arg33[%c0_519, %c0_520, %c0_521] : memref<1x1x5xf32, #tpu.memory_space<vmem>>, vector<1x1x5xf32>
    %607 = vector.shape_cast %606 : vector<1x1x5xf32> to vector<1x5xf32>
    %608 = vector.shape_cast %605 : vector<1x5xf32> to vector<1x1x5xf32>
    tpu.vector_store %arg33[%c0_519, %c0_520, %c0_521], %608 {strides = array<i32>} : memref<1x1x5xf32, #tpu.memory_space<vmem>>, vector<1x1x5xf32>,
    return
  }
  func.func @transform_0(%arg0: i32) -> (i32, i32, i32) {
    %c0_i32 = arith.constant 0 : i32
    %c0_i32_0 = arith.constant 0 : i32
    %c0_i32_1 = arith.constant 0 : i32
    return %arg0, %c0_i32, %c0_i32_0 : i32, i32, i32
  }
  func.func @transform_1(%arg0: i32) -> (i32, i32, i32) {
    %c0_i32 = arith.constant 0 : i32
    %c0_i32_0 = arith.constant 0 : i32
    %c0_i32_1 = arith.constant 0 : i32
    %c0_i32_2 = arith.constant 0 : i32
    return %c0_i32, %c0_i32_0, %c0_i32_1 : i32, i32, i32
  }
  func.func @transform_2(%arg0: i32) -> (i32, i32) {
    %c0_i32 = arith.constant 0 : i32
    %c0_i32_0 = arith.constant 0 : i32
    %c0_i32_1 = arith.constant 0 : i32
    return %c0_i32, %c0_i32_0 : i32, i32
  }
  func.func @transform_3(%arg0: i32) -> (i32, i32, i32) {
    %c0_i32 = arith.constant 0 : i32
    %c0_i32_0 = arith.constant 0 : i32
    %c0_i32_1 = arith.constant 0 : i32
    %c0_i32_2 = arith.constant 0 : i32
    return %c0_i32, %c0_i32_0, %c0_i32_1 : i32, i32, i32
  }
  func.func @transform_4(%arg0: i32) -> (i32, i32) {
    %c0_i32 = arith.constant 0 : i32
    %c0_i32_0 = arith.constant 0 : i32
    %c0_i32_1 = arith.constant 0 : i32
    return %c0_i32, %c0_i32_0 : i32, i32
  }
  func.func @transform_5(%arg0: i32) -> (i32, i32) {
    %c0_i32 = arith.constant 0 : i32
    %c0_i32_0 = arith.constant 0 : i32
    %c0_i32_1 = arith.constant 0 : i32
    return %c0_i32, %c0_i32_0 : i32, i32
  }
  func.func @transform_6(%arg0: i32) -> (i32, i32, i32, i32) {
    %c0_i32 = arith.constant 0 : i32
    %c0_i32_0 = arith.constant 0 : i32
    %c0_i32_1 = arith.constant 0 : i32
    %c0_i32_2 = arith.constant 0 : i32
    %c0_i32_3 = arith.constant 0 : i32
    return %c0_i32, %c0_i32_0, %c0_i32_1, %c0_i32_2 : i32, i32, i32, i32
  }
  func.func @transform_7(%arg0: i32) -> (i32, i32, i32, i32) {
    %c0_i32 = arith.constant 0 : i32
    %c0_i32_0 = arith.constant 0 : i32
    %c0_i32_1 = arith.constant 0 : i32
    %c0_i32_2 = arith.constant 0 : i32
    %c0_i32_3 = arith.constant 0 : i32
    return %c0_i32, %c0_i32_0, %c0_i32_1, %c0_i32_2 : i32, i32, i32, i32
  }
  func.func @transform_8(%arg0: i32) -> (i32, i32, i32, i32) {
    %c0_i32 = arith.constant 0 : i32
    %c0_i32_0 = arith.constant 0 : i32
    %c0_i32_1 = arith.constant 0 : i32
    %c0_i32_2 = arith.constant 0 : i32
    %c0_i32_3 = arith.constant 0 : i32
    return %c0_i32, %c0_i32_0, %c0_i32_1, %c0_i32_2 : i32, i32, i32, i32
  }
  func.func @transform_9(%arg0: i32) -> (i32, i32, i32, i32) {
    %c0_i32 = arith.constant 0 : i32
    %c0_i32_0 = arith.constant 0 : i32
    %c0_i32_1 = arith.constant 0 : i32
    %c0_i32_2 = arith.constant 0 : i32
    %c0_i32_3 = arith.constant 0 : i32
    return %c0_i32, %c0_i32_0, %c0_i32_1, %c0_i32_2 : i32, i32, i32, i32
  }
  func.func @transform_10(%arg0: i32) -> (i32, i32, i32, i32) {
    %c0_i32 = arith.constant 0 : i32
    %c0_i32_0 = arith.constant 0 : i32
    %c0_i32_1 = arith.constant 0 : i32
    %c0_i32_2 = arith.constant 0 : i32
    %c0_i32_3 = arith.constant 0 : i32
    return %c0_i32, %c0_i32_0, %c0_i32_1, %c0_i32_2 : i32, i32, i32, i32
  }
  func.func @transform_11(%arg0: i32) -> (i32, i32, i32, i32) {
    %c0_i32 = arith.constant 0 : i32
    %c0_i32_0 = arith.constant 0 : i32
    %c0_i32_1 = arith.constant 0 : i32
    %c0_i32_2 = arith.constant 0 : i32
    %c0_i32_3 = arith.constant 0 : i32
    return %c0_i32, %c0_i32_0, %c0_i32_1, %c0_i32_2 : i32, i32, i32, i32
  }
  func.func @transform_12(%arg0: i32) -> (i32, i32, i32, i32) {
    %c0_i32 = arith.constant 0 : i32
    %c0_i32_0 = arith.constant 0 : i32
    %c0_i32_1 = arith.constant 0 : i32
    %c0_i32_2 = arith.constant 0 : i32
    %c0_i32_3 = arith.constant 0 : i32
    return %c0_i32, %c0_i32_0, %c0_i32_1, %c0_i32_2 : i32, i32, i32, i32
  }
  func.func @transform_13(%arg0: i32) -> (i32, i32, i32) {
    %c0_i32 = arith.constant 0 : i32
    %c0_i32_0 = arith.constant 0 : i32
    %c0_i32_1 = arith.constant 0 : i32
    %c0_i32_2 = arith.constant 0 : i32
    return %c0_i32, %c0_i32_0, %c0_i32_1 : i32, i32, i32
  }
  func.func @transform_14(%arg0: i32) -> (i32, i32, i32) {
    %c0_i32 = arith.constant 0 : i32
    %c0_i32_0 = arith.constant 0 : i32
    %c0_i32_1 = arith.constant 0 : i32
    %c0_i32_2 = arith.constant 0 : i32
    return %c0_i32, %c0_i32_0, %c0_i32_1 : i32, i32, i32
  }
  func.func @transform_15(%arg0: i32) -> (i32, i32, i32) {
    %c0_i32 = arith.constant 0 : i32
    %c0_i32_0 = arith.constant 0 : i32
    %c0_i32_1 = arith.constant 0 : i32
    %c0_i32_2 = arith.constant 0 : i32
    return %c0_i32, %c0_i32_0, %c0_i32_1 : i32, i32, i32
  }
  func.func @transform_16(%arg0: i32) -> (i32, i32, i32) {
    %c0_i32 = arith.constant 0 : i32
    %c0_i32_0 = arith.constant 0 : i32
    %c0_i32_1 = arith.constant 0 : i32
    %c0_i32_2 = arith.constant 0 : i32
    return %c0_i32, %c0_i32_0, %c0_i32_1 : i32, i32, i32
  }
  func.func @transform_17(%arg0: i32) -> (i32, i32, i32) {
    %c0_i32 = arith.constant 0 : i32
    %c0_i32_0 = arith.constant 0 : i32
    %c0_i32_1 = arith.constant 0 : i32
    %c0_i32_2 = arith.constant 0 : i32
    return %c0_i32, %c0_i32_0, %c0_i32_1 : i32, i32, i32
  }
  func.func @transform_18(%arg0: i32) -> (i32, i32, i32) {
    %c0_i32 = arith.constant 0 : i32
    %c0_i32_0 = arith.constant 0 : i32
    %c0_i32_1 = arith.constant 0 : i32
    %c0_i32_2 = arith.constant 0 : i32
    return %c0_i32, %c0_i32_0, %c0_i32_1 : i32, i32, i32
  }
  func.func @transform_19(%arg0: i32) -> (i32, i32, i32) {
    %c0_i32 = arith.constant 0 : i32
    %c0_i32_0 = arith.constant 0 : i32
    %c0_i32_1 = arith.constant 0 : i32
    %c0_i32_2 = arith.constant 0 : i32
    return %c0_i32, %c0_i32_0, %c0_i32_1 : i32, i32, i32
  }
  func.func @transform_20(%arg0: i32) -> (i32, i32, i32) {
    %c0_i32 = arith.constant 0 : i32
    %c0_i32_0 = arith.constant 0 : i32
    %c0_i32_1 = arith.constant 0 : i32
    %c0_i32_2 = arith.constant 0 : i32
    return %c0_i32, %c0_i32_0, %c0_i32_1 : i32, i32, i32
  }
  func.func @transform_21(%arg0: i32) -> (i32, i32, i32) {
    %c0_i32 = arith.constant 0 : i32
    %c0_i32_0 = arith.constant 0 : i32
    %c0_i32_1 = arith.constant 0 : i32
    %c0_i32_2 = arith.constant 0 : i32
    return %c0_i32, %c0_i32_0, %c0_i32_1 : i32, i32, i32
  }
  func.func @transform_22(%arg0: i32) -> (i32, i32) {
    %c0_i32 = arith.constant 0 : i32
    %c0_i32_0 = arith.constant 0 : i32
    %c0_i32_1 = arith.constant 0 : i32
    return %c0_i32, %c0_i32_0 : i32, i32
  }
  func.func @transform_23(%arg0: i32) -> (i32, i32) {
    %c0_i32 = arith.constant 0 : i32
    %c0_i32_0 = arith.constant 0 : i32
    %c0_i32_1 = arith.constant 0 : i32
    return %c0_i32, %c0_i32_0 : i32, i32
  }
  func.func @transform_24(%arg0: i32) -> (i32, i32) {
    %c0_i32 = arith.constant 0 : i32
    %c0_i32_0 = arith.constant 0 : i32
    %c0_i32_1 = arith.constant 0 : i32
    return %c0_i32, %c0_i32_0 : i32, i32
  }
  func.func @transform_25(%arg0: i32) -> (i32, i32) {
    %c0_i32 = arith.constant 0 : i32
    %c0_i32_0 = arith.constant 0 : i32
    %c0_i32_1 = arith.constant 0 : i32
    return %c0_i32, %c0_i32_0 : i32, i32
  }
  func.func @transform_26(%arg0: i32) -> (i32, i32) {
    %c0_i32 = arith.constant 0 : i32
    %c0_i32_0 = arith.constant 0 : i32
    %c0_i32_1 = arith.constant 0 : i32
    return %c0_i32, %c0_i32_0 : i32, i32
  }
  func.func @transform_27(%arg0: i32) -> (i32, i32) {
    %c0_i32 = arith.constant 0 : i32
    %c0_i32_0 = arith.constant 0 : i32
    %c0_i32_1 = arith.constant 0 : i32
    return %c0_i32, %c0_i32_0 : i32, i32
  }
  func.func @transform_28(%arg0: i32) -> (i32, i32) {
    %c0_i32 = arith.constant 0 : i32
    %c0_i32_0 = arith.constant 0 : i32
    %c0_i32_1 = arith.constant 0 : i32
    return %c0_i32, %c0_i32_0 : i32, i32
  }
  func.func @transform_29(%arg0: i32) -> (i32, i32) {
    %c0_i32 = arith.constant 0 : i32
    %c0_i32_0 = arith.constant 0 : i32
    %c0_i32_1 = arith.constant 0 : i32
    return %c0_i32, %c0_i32_0 : i32, i32
  }
  func.func @transform_30(%arg0: i32) -> (i32, i32) {
    %c0_i32 = arith.constant 0 : i32
    %c0_i32_0 = arith.constant 0 : i32
    %c0_i32_1 = arith.constant 0 : i32
    return %c0_i32, %c0_i32_0 : i32, i32
  }
  func.func @transform_31(%arg0: i32) -> (i32, i32) {
    %c0_i32 = arith.constant 0 : i32
    %c0_i32_0 = arith.constant 0 : i32
    %c0_i32_1 = arith.constant 0 : i32
    return %c0_i32, %c0_i32_0 : i32, i32
  }
  func.func @transform_32(%arg0: i32) -> (i32, i32, i32) {
    %c0_i32 = arith.constant 0 : i32
    %c0_i32_0 = arith.constant 0 : i32
    %c0_i32_1 = arith.constant 0 : i32
    return %arg0, %c0_i32, %c0_i32_0 : i32, i32, i32
  }
  func.func @transform_33(%arg0: i32) -> (i32, i32, i32) {
    %c0_i32 = arith.constant 0 : i32
    %c0_i32_0 = arith.constant 0 : i32
    %c0_i32_1 = arith.constant 0 : i32
    return %arg0, %c0_i32, %c0_i32_0 : i32, i32, i32
  }
  func.func @transform_34(%arg0: i32) -> (i32, i32, i32) {
    %c0_i32 = arith.constant 0 : i32
    %c0_i32_0 = arith.constant 0 : i32
    %c0_i32_1 = arith.constant 0 : i32
    return %arg0, %c0_i32, %c0_i32_0 : i32, i32, i32
  }
  func.func @transform_35(%arg0: i32) -> (i32, i32, i32) {
    %c0_i32 = arith.constant 0 : i32
    %c0_i32_0 = arith.constant 0 : i32
    %c0_i32_1 = arith.constant 0 : i32
    return %arg0, %c0_i32, %c0_i32_0 : i32, i32, i32
  }
}

</mosaic_0001>

<bundles_post_ra>
// kernel: hybrid_forward.1
= control target key start
LH: loop header
LB: loop body
LE: loop exit
PB: predicated region body
PF: predicated region fallthrough
CT: control target
= control target key end

     0   :  { %s12482_s6 = smov 1   ;;  %s12483_s10 = smov 2   ;;  %s13987_s0 = inlined_call_operand.smem [shape: u32[36], index: -1, kind: input, shape index: {}] }
   0x1   :  { %s12536_s5 = sld [smem:[%s13987_s0]]   ;;  %s12484_s14 = smov 3  }
   0x2   :  { %s12541_s9 = sld [smem:[%s13987_s0 + %s12482_s6]]   ;;  %s12485_s18 = smov 4  }
   0x3   :  { %s12546_s13 = sld [smem:[%s13987_s0 + %s12483_s10]]   ;;  %s12486_s22 = smov 5  }
   0x4   :  { %s12551_s17 = sld [smem:[%s13987_s0 + %s12484_s14]]   ;;  %s12487_s26 = smov 6  }
   0x5   :  { %s12556_s21 = sld [smem:[%s13987_s0 + %s12485_s18]]   ;;  %s12488_s30 = smov 7  }
   0x6   :  { %s12561_s25 = sld [smem:[%s13987_s0 + %s12486_s22]]   ;;  %s12489_s4 = smov 8  }
   0x7   :  { %14027 = sst [smem:[#allocation14_spill]] %s12536_s5  ;;  %s12490_s10 = smov 9  }
   0x8   :  { %14028 = sst [smem:[#allocation15_spill]] %s12541_s9  ;;  %s12491_s15 = smov 10  }
   0x9   :  { %14029 = sst [smem:[#allocation16_spill]] %s12546_s13  ;;  %s12492_s20 = smov 11  }
   0xa   :  { %14030 = sst [smem:[#allocation17_spill]] %s12551_s17  ;;  %s12494_s1 = smov 13  }
   0xb   :  { %s12566_s29 = sld [smem:[%s13987_s0 + %s12487_s26]]   ;;  %s12493_s26 = smov 12  }
   0xc   :  { %s12571_s3 = sld [smem:[%s13987_s0 + %s12488_s30]]   ;;  %s12495_s7 = smov 14  }
   0xd   :  { %s12576_s8 = sld [smem:[%s13987_s0 + %s12489_s4]]   ;;  %s12497_s22 = smov 16  }
   0xe   :  { %s12581_s14 = sld [smem:[%s13987_s0 + %s12490_s10]]   ;;  %s12498_s28 = smov 17  }
   0xf   :  { %s12586_s19 = sld [smem:[%s13987_s0 + %s12491_s15]]   ;;  %s12496_s15 = smov 15  }
  0x10   :  { %s12591_s24 = sld [smem:[%s13987_s0 + %s12492_s20]]  }
  0x11   :  { %s12596_s30 = sld [smem:[%s13987_s0 + %s12493_s26]]  }
  0x12   :  { %14031 = sst [smem:[#allocation18_spill]] %s12571_s3 }
  0x13   :  { %14032 = sst [smem:[#allocation19_spill]] %s12576_s8 }
  0x14   :  { %14033 = sst [smem:[#allocation20_spill]] %s12581_s14 }
  0x15   :  { %14034 = sst [smem:[#allocation21_spill]] %s12586_s19 }
  0x16   :  { %s12601_s6 = sld [smem:[%s13987_s0 + %s12494_s1]]  }
  0x17   :  { %s12606_s12 = sld [smem:[%s13987_s0 + %s12495_s7]]   ;;  %s12499_s7 = smov 18  }
  0x18   :  { %s12611_s20 = sld [smem:[%s13987_s0 + %s12496_s15]]   ;;  %s12500_s15 = smov 19  }
  0x19   :  { %s12616_s27 = sld [smem:[%s13987_s0 + %s12497_s22]]   ;;  %s12501_s22 = smov 20  }
  0x1a   :  { %s12621_s4 = sld [smem:[%s13987_s0 + %s12498_s28]]   ;;  %s12502_s28 = smov 21  }
  0x1c   :  { %14035 = sst [smem:[#allocation22_spill]] %s12601_s6 }
  0x1d   :  { %14036 = sst [smem:[#allocation23_spill]] %s12606_s12 }
  0x1e   :  { %14037 = sst [smem:[#allocation24_spill]] %s12611_s20 }
  0x1f   :  { %14038 = sst [smem:[#allocation25_spill]] %s12616_s27 }
  0x20   :  { %14039 = sst [smem:[#allocation26_spill]] %s12621_s4 }
  0x21   :  { %s12626_s12 = sld [smem:[%s13987_s0 + %s12499_s7]]   ;;  %s12503_s7 = smov 22  }
  0x22   :  { %s12631_s20 = sld [smem:[%s13987_s0 + %s12500_s15]]   ;;  %s12504_s15 = smov 23  }
  0x23   :  { %s12636_s27 = sld [smem:[%s13987_s0 + %s12501_s22]]   ;;  %s12505_s22 = smov 24  }
  0x24   :  { %s12641_s4 = sld [smem:[%s13987_s0 + %s12502_s28]]   ;;  %s12506_s28 = smov 25  }
  0x27   :  { %14040 = sst [smem:[#allocation27_spill]] %s12626_s12 }
  0x28   :  { %14041 = sst [smem:[#allocation28_spill]] %s12631_s20 }
  0x29   :  { %14042 = sst [smem:[#allocation29_spill]] %s12636_s27 }
  0x2a   :  { %14043 = sst [smem:[#allocation30_spill]] %s12641_s4 }
  0x2b   :  { %s12646_s12 = sld [smem:[%s13987_s0 + %s12503_s7]]   ;;  %s12507_s7 = smov 26  }
  0x2c   :  { %s12651_s20 = sld [smem:[%s13987_s0 + %s12504_s15]]   ;;  %s12508_s15 = smov 27  }
  0x2d   :  { %s12656_s27 = sld [smem:[%s13987_s0 + %s12505_s22]]   ;;  %s12509_s22 = smov 28  }
  0x2e   :  { %s12661_s4 = sld [smem:[%s13987_s0 + %s12506_s28]]   ;;  %s12510_s28 = smov 29  }
  0x31   :  { %14044 = sst [smem:[#allocation31_spill]] %s12646_s12 }
  0x32   :  { %14045 = sst [smem:[#allocation32_spill]] %s12651_s20 }
  0x33   :  { %14046 = sst [smem:[#allocation33_spill]] %s12656_s27 }
  0x34   :  { %14047 = sst [smem:[#allocation34_spill]] %s12661_s4 }
  0x35   :  { %s12666_s12 = sld [smem:[%s13987_s0 + %s12507_s7]]   ;;  %s12511_s7 = smov 30  }
  0x36   :  { %s12671_s20 = sld [smem:[%s13987_s0 + %s12508_s15]]   ;;  %s12512_s15 = smov 31  }
  0x37   :  { %s12676_s27 = sld [smem:[%s13987_s0 + %s12509_s22]]   ;;  %s12513_s22 = smov 32  }
  0x38   :  { %s12681_s4 = sld [smem:[%s13987_s0 + %s12510_s28]]   ;;  %s12514_s28 = smov 33  }
  0x3b   :  { %14048 = sst [smem:[#allocation35_spill]] %s12666_s12 }
  0x3c   :  { %14049 = sst [smem:[#allocation36_spill]] %s12671_s20 }
  0x3d   :  { %14050 = sst [smem:[#allocation37_spill]] %s12676_s27 }
  0x3e   :  { %14051 = sst [smem:[#allocation38_spill]] %s12681_s4 }
  0x3f   :  { %s12686_s12 = sld [smem:[%s13987_s0 + %s12511_s7]]   ;;  %s12515_s7 = smov 34  }
  0x40   :  { %s12691_s20 = sld [smem:[%s13987_s0 + %s12512_s15]]   ;;  %s12516_s15 = smov 35  }
  0x41   :  { %s12696_s27 = sld [smem:[%s13987_s0 + %s12513_s22]]  }
  0x42   :  { %s12701_s4 = sld [smem:[%s13987_s0 + %s12514_s28]]  }
  0x45   :  { %14052 = sst [smem:[#allocation39_spill]] %s12686_s12 }
  0x46   :  { %14053 = sst [smem:[#allocation40_spill]] %s12691_s20 }
  0x47   :  { %s12706_s12 = sld [smem:[%s13987_s0 + %s12515_s7]]  }
  0x48   :  { %14054 = sst [smem:[#allocation41_spill]] %s12701_s4 }
  0x49   :  { %s12711_s20 = sld [smem:[%s13987_s0 + %s12516_s15]]  }
  0x4a   :  { %77 = vsyncpa [#allocation5], 0 }
  0x4b   :  { %79 = vsyncpa [#allocation5 + $0x1], 0 }
  0x4c   :  { %80 = vsyncpa [#allocation7], 0 }
  0x4d   :  { %82 = vsyncpa [#allocation7 + $0x1], 0 }
  0x4e   :  { %83 = vsyncpa [#allocation10], 0 }
  0x4f   :  { %85 = vsyncpa [#allocation10 + $0x1], 0  ;;  %s12713_s22 = smov 0   ;;  %s12715_s23 = smov 0  }
  0x50   :  { %s12717_s26 = smov 0   ;;  %s12719_s28 = smov 0  }
  0x51 LB: > { %s14055_s4 = sld [smem:[#allocation41_spill]]  ;;  %s14056_s19 = sld [smem:[#allocation21_spill]]  ;;  %s12480_s28 = sphi %s12719_s28, %s14098_s28   ;;  %s12476_s26 = sphi %s12717_s26, %s14097_s26   ;;  %s12472_s23 = sphi %s12715_s23, %s14096_s23   ;;  %s12468_s22 = sphi %s12713_s22, %s14095_s22  }
  0x52   : > { %s14057_s14 = sld [smem:[#allocation20_spill]]  ;;  %s14058_s8 = sld [smem:[#allocation19_spill]] }
  0x53   : > { %s14059_s6 = sld [smem:[#allocation22_spill]]  ;;  %s14060_s3 = sld [smem:[#allocation18_spill]] }
  0x54   : > { %s14061_s17 = sld [smem:[#allocation17_spill]]  ;;  %s14062_s9 = sld [smem:[#allocation15_spill]] }
  0x55   : > { %s12734_s0 = sadd.s32 4294967295, %s12480_s28   ;;  %s14002_s1 = sadd.s32 4294967294, %s12480_s28  }
  0x56   : > { %s12738_s2 = sadd.s32 1, %s12480_s28   ;;  %s775_s7 = sadd.s32 1, %s12476_s26 }
  0x57   : > { %s772_s10 = ssub.s32 %s12480_s28, %s12738_s2  ;;  %p785_p0 = scmp.ne.s32.totalorder %s12476_s26, %s12472_s23 }
  0x58   : > { %p773_p1 = scmp.eq.s32.totalorder %s772_s10, 0  ;;  %p786_p2 = scmp.eq.s32.totalorder %s12734_s0, 1 }
  0x59   : > { %p791_p3 = scmp.ne.s32.totalorder %s12472_s23, %s12468_s22  ;;  %p792_p4 = scmp.eq.s32.totalorder %s14002_s1, 1 }
  0x5a   : > { %s12751_s11 = scalar_select %p773_p1, %s12476_s26, %s775_s7  }
  0x5b   : > { %p12753_p5 = por %p786_p2, %p785_p0  ;;  %p12757_p6 = por %p792_p4, %p791_p3 }
  0x5c   : > { %p9023_p7 = scmp.ge.s32.totalorder %s12480_s28, 1  ;;  %p989_p8 = scmp.lt.s32.totalorder %s12480_s28, 3 }
  0x5d   : > { %s14064_s16 = scalar_select %p12757_p6, 1, 0 }
  0x5e   : > { %p990_p9 = pnand %p9023_p7, %p989_p8 }
  0x5f   : > { %vm1162_vm0 = vcmask (!%p990_p9), 1043456   ;;  %v9037_v0 = vld [vmem:[%s14062_s9 + $0x10] sm:$0xff] (!%p990_p9)  ;;  %v9038_v1 = vld [vmem:[%s14062_s9 + $0x18] sm:$0xf] (!%p990_p9)  ;;  %p1089_p10 = scmp.lt.s32.totalorder (!%p990_p9), %s12734_s0, 1  ;;  %vm12517_vm1 = vmmov (!%p990_p9), 1  }
  0x60   : > { %993 = sbr.rel (%p990_p9) target bundleno = 12681 (0x3189), region = 148  ;;  %vm12767_vm2 = vmpackc.low (!%p990_p9), %vm1162_vm0, %vm12517_vm1  ;;  %v11232_v3 = vpack.c.bf16 (!%p990_p9), %v9038_v1, %v9037_v0  ;;  %vm1102_vm3 = vcmask (!%p990_p9), 97280   ;;  %v9048_v4 = vld [vmem:[%s14062_s9 + $0x20] sm:$0xff] (!%p990_p9)  ;;  %v9049_v5 = vld [vmem:[%s14062_s9 + $0x28] sm:$0xf] (!%p990_p9)  ;;  %s14067_s5 = sld [smem:[#allocation14_spill]] (!%p990_p9) }
  0x61   : > { %v12518_v6 = vmov (!%p990_p9), 0.0   ;;  %v11238_v7 = vpack.c.bf16 (!%p990_p9), %v9049_v5, %v9048_v4  ;;  %v1136_v8 = vld [vmem:[%s14062_s9] sm:$0xff] (!%p990_p9)  ;;  %v1137_v9 = vld [vmem:[%s14062_s9 + $0x8] sm:$0xf] (!%p990_p9)  ;;  %v9059_v19 = vld [vmem:[%s14062_s9 + $0x30] sm:$0xff] (!%p990_p9)  ;;  %vm2204_vm5 = vcmask (!%p990_p9), 523264  }
  0x62   : > { %1103 = vst.msk [vmem:[#allocation2] sm:$0xff] (!%p990_p9), %vm1102_vm3, %v12518_v6  ;;  %1104 = vst.msk [vmem:[#allocation2 + $0x8] sm:$0xff] (!%p990_p9), %vm1102_vm3, %v12518_v6  ;;  %11234 = vmatprep.subr.msk.bf16.mxu0 (!%p990_p9), %vm12767_vm2, %v11232_v3  ;;  %v11226_v13 = vpack.c.bf16 (!%p990_p9), %v1137_v9, %v1136_v8  ;;  %v9060_v20 = vld [vmem:[%s14062_s9 + $0x38] sm:$0xf] (!%p990_p9)  ;;  %v9070_v31 = vld [vmem:[%s14062_s9 + $0x40] sm:$0xff] (!%p990_p9)  ;;  %s14068_s13 = sld [smem:[#allocation16_spill]] (!%p990_p9) }
  0x63   : > { %1105 = vst.msk [vmem:[#allocation2 + $0x10] sm:$0xff] (!%p990_p9), %vm1102_vm3, %v12518_v6  ;;  %1106 = vst.msk [vmem:[#allocation2 + $0x18] sm:$0xff] (!%p990_p9), %vm1102_vm3, %v12518_v6  ;;  %11237 = vmatpush3.bf16.msk.msra.mxu0 (!%p990_p9), %vm12767_vm2, %v11232_v3  ;;  %v11244_v24 = vpack.c.bf16 (!%p990_p9), %v9060_v20, %v9059_v19  ;;  %v9071_v32 = vld [vmem:[%s14062_s9 + $0x48] sm:$0xf] (!%p990_p9)  ;;  %v9081_v50 = vld [vmem:[%s14062_s9 + $0x50] sm:$0xff] (!%p990_p9)  ;;  %vm2892_vm9 = vcmask (!%p990_p9), 261120  }
  0x64   : > { %1107 = vst.msk [vmem:[#allocation2 + $0x20] sm:$0xff] (!%p990_p9), %vm1102_vm3, %v12518_v6  ;;  %1108 = vst.msk [vmem:[#allocation2 + $0x28] sm:$0xff] (!%p990_p9), %vm1102_vm3, %v12518_v6  ;;  %11240 = vmatprep.subr.msk.bf16.mxu0 (!%p990_p9), %vm12767_vm2, %v11238_v7  ;;  %11228 = vmatprep.subr.msk.bf16.mxu1 (!%p990_p9), %vm12767_vm2, %v11226_v13  ;;  %v11250_v38 = vpack.c.bf16 (!%p990_p9), %v9071_v32, %v9070_v31  ;;  %v9082_v51 = vld [vmem:[%s14062_s9 + $0x58] sm:$0xf] (!%p990_p9)  ;;  %v9092_v61 = vld [vmem:[%s14062_s9 + $0x60] sm:$0xff] (!%p990_p9)  ;;  %vm3254_vm10 = vcmask (!%p990_p9), 130048  }
  0x65   : > { %1109 = vst.msk [vmem:[#allocation2 + $0x30] sm:$0xff] (!%p990_p9), %vm1102_vm3, %v12518_v6  ;;  %1110 = vst.msk [vmem:[#allocation2 + $0x38] sm:$0xff] (!%p990_p9), %vm1102_vm3, %v12518_v6  ;;  %11231 = vmatpush3.bf16.msk.msra.mxu1 (!%p990_p9), %vm12767_vm2, %v11226_v13  ;;  %v11256_v54 = vpack.c.bf16 (!%p990_p9), %v9082_v51, %v9081_v50  ;;  %v9093_v62 = vld [vmem:[%s14062_s9 + $0x68] sm:$0xf] (!%p990_p9)  ;;  %s14074_s1 = sld [smem:[#allocation24_spill]] (!%p990_p9)  ;;  %s14076_s9 = sld [smem:[#allocation28_spill]] (!%p990_p9) }
  0x66   : > { %1111 = vst.msk [vmem:[#allocation2 + $0x40] sm:$0xff] (!%p990_p9), %vm1102_vm3, %v12518_v6  ;;  %v11262_v1 = vpack.c.bf16 (!%p990_p9), %v9093_v62, %v9092_v61  ;;  %vm13122_vm11 = vmpackc.low (!%p990_p9), %vm3254_vm10, %vm3254_vm10  ;;  %vm12520_vm12 = vmmov (!%p990_p9), 0   ;;  %vm8228_vm14 = vcmask (!%p990_p9), 516096   ;;  %vm8348_vm15 = vcmask (!%p990_p9), 253952  }
  0x67   : > { %s1090_s18 = scalar_select %p1089_p10, %s12734_s0, 1  ;;  %2306 = vst.msk [vmem:[#allocation3] sm:$0xff] %vm2204_vm5, %v12518_v6  ;;  %2307 = vst.msk [vmem:[#allocation3 + $0x8] sm:$0xff] %vm2204_vm5, %v12518_v6  ;;  %vm8613_vm0 = vcmask 1041408  }
  0x68   : > { %2308 = vst.msk [vmem:[#allocation3 + $0x10] sm:$0xff] %vm2204_vm5, %v12518_v6  ;;  %2309 = vst.msk [vmem:[#allocation3 + $0x18] sm:$0xff] %vm2204_vm5, %v12518_v6 }
  0x69   : > { %s9591_s7 = sshll.u32 %s1090_s18, 6  ;;  %2310 = vst.msk [vmem:[#allocation3 + $0x20] sm:$0xff] %vm2204_vm5, %v12518_v6  ;;  %s14071_s18 = sld [smem:[#allocation25_spill]]  ;;  %vm13770_vm13 = vmpackc.low %vm2204_vm5, %vm2204_vm5 }
  0x6a   : > { %s1093_s10 = scalar_lea.vmem %s14067_s5, %s9591_s7  ;;  %s14072_s7 = sld [smem:[#allocation27_spill]] }
  0x6b   : > { %v1094_v10 = vld [vmem:[%s1093_s10] sm:$0xff]  ;;  %v1095_v11 = vld [vmem:[%s1093_s10 + $0x8] sm:$0xff]  ;;  %v1096_v12 = vld [vmem:[%s1093_s10 + $0x10] sm:$0xff]  ;;  %s14075_s5 = sld [smem:[#allocation26_spill]] }
  0x6c   : > { %1112 = vst.msk [vmem:[#allocation2 + $0x3] sm:$0xff] %vm1102_vm3, %v1094_v10  ;;  %1113 = vst.msk [vmem:[#allocation2 + $0xb] sm:$0xff] %vm1102_vm3, %v1095_v11  ;;  %v1097_v14 = vld [vmem:[%s1093_s10 + $0x18] sm:$0xff]  ;;  %v1098_v15 = vld [vmem:[%s1093_s10 + $0x20] sm:$0xff] }
  0x6d   : > { %1114 = vst.msk [vmem:[#allocation2 + $0x13] sm:$0xff] %vm1102_vm3, %v1096_v12  ;;  %v1099_v16 = vld [vmem:[%s1093_s10 + $0x28] sm:$0xff]  ;;  %1115 = vst.msk [vmem:[#allocation2 + $0x1b] sm:$0xff] %vm1102_vm3, %v1097_v14  ;;  %v1100_v17 = vld [vmem:[%s1093_s10 + $0x30] sm:$0xff] }
  0x6e   : > { %1116 = vst.msk [vmem:[#allocation2 + $0x23] sm:$0xff] %vm1102_vm3, %v1098_v15  ;;  %1117 = vst.msk [vmem:[#allocation2 + $0x2b] sm:$0xff] %vm1102_vm3, %v1099_v16  ;;  %v1101_v18 = vld [vmem:[%s1093_s10 + $0x38] sm:$0xff]  ;;  %s14073_s10 = sld [smem:[#allocation23_spill]] }
  0x6f   : > { %1118 = vst.msk [vmem:[#allocation2 + $0x33] sm:$0xff] %vm1102_vm3, %v1100_v17  ;;  %1119 = vst.msk [vmem:[#allocation2 + $0x3b] sm:$0xff] %vm1102_vm3, %v1101_v18 }
  0x73   : > { %v1279_v21 = vld [vmem:[#allocation2 + $0x1] sm:$0xff]  ;;  %v1280_v22 = vld [vmem:[#allocation2 + $0x9] sm:$0xff] }
  0x74   : > { %v1281_v23 = vld [vmem:[#allocation2 + $0x11] sm:$0xff]  ;;  %10235 = vmatprep.mubr.msk.f32.mxu0 %vm1102_vm3, %v1279_v21  ;;  %v1282_v25 = vld [vmem:[#allocation2 + $0x19] sm:$0xff]  ;;  %v1430_v30 = vld [vmem:[#allocation2 + $0x2] sm:$0xff] }
  0x75   : > { %10236 = vmatmul.mubr.msk.f32.vlgmr.msra.gmra.mrb[0].mxu0 %vm1102_vm3, %v1280_v22  ;;  %v1283_v26 = vld [vmem:[#allocation2 + $0x21] sm:$0xff]  ;;  %v1284_v27 = vld [vmem:[#allocation2 + $0x29] sm:$0xff]  ;;  %v1432_v37 = vld [vmem:[#allocation2 + $0x12] sm:$0xff] }
  0x76   : > { %10238 = vmatprep.mubr.msk.f32.mxu0 %vm1102_vm3, %v1281_v23  ;;  %11243 = vmatpush3.bf16.msk.msra.mxu0 %vm12767_vm2, %v11238_v7  ;;  %v1285_v28 = vld [vmem:[#allocation2 + $0x31] sm:$0xff]  ;;  %v1286_v29 = vld [vmem:[#allocation2 + $0x39] sm:$0xff]  ;;  %v1129_v34 = vld [vmem:[#allocation2 + $0x8] sm:$0xff] }
  0x77   : > { %11246 = vmatprep.subr.msk.bf16.mxu0 %vm12767_vm2, %v11244_v24  ;;  %v1128_v33 = vld [vmem:[#allocation2] sm:$0xff]  ;;  %v1130_v35 = vld [vmem:[#allocation2 + $0x10] sm:$0xff]  ;;  %v1131_v39 = vld [vmem:[#allocation2 + $0x18] sm:$0xff] }
  0x78   : > { %10219 = vmatprep.mubr.msk.f32.mxu1 %vm1102_vm3, %v1128_v33  ;;  %v1431_v36 = vld [vmem:[#allocation2 + $0xa] sm:$0xff]  ;;  %v1132_v40 = vld [vmem:[#allocation2 + $0x20] sm:$0xff]  ;;  %v1436_v46 = vld [vmem:[#allocation2 + $0x32] sm:$0xff] }
  0x79   : > { %10239 = vmatmul.mubr.msk.f32.gmra.mrb[2].mxu0 %vm1102_vm3, %v1282_v25  ;;  %10220 = vmatmul.mubr.msk.f32.vlgmr.msra.gmra.mrb[0].mxu1 %vm1102_vm3, %v1129_v34  ;;  %v1433_v41 = vld [vmem:[#allocation2 + $0x1a] sm:$0xff]  ;;  %v1434_v42 = vld [vmem:[#allocation2 + $0x22] sm:$0xff]  ;;  %v1134_v44 = vld [vmem:[#allocation2 + $0x30] sm:$0xff] }
  0x7a   : > { %10241 = vmatprep.mubr.msk.f32.mxu0 %vm1102_vm3, %v1283_v26  ;;  %10222 = vmatprep.mubr.msk.f32.mxu1 %vm1102_vm3, %v1130_v35  ;;  %v1133_v43 = vld [vmem:[#allocation2 + $0x28] sm:$0xff]  ;;  %v1135_v47 = vld [vmem:[#allocation2 + $0x38] sm:$0xff] }
  0x7b   : > { %v1435_v45 = vld [vmem:[#allocation2 + $0x2a] sm:$0xff]  ;;  %v1437_v48 = vld [vmem:[#allocation2 + $0x3a] sm:$0xff] }
  0x7c   : > { %v1581_v49 = vld [vmem:[#allocation2 + $0x3] sm:$0xff]  ;;  %v1582_v52 = vld [vmem:[#allocation2 + $0xb] sm:$0xff]  ;;  %v1583_v53 = vld [vmem:[#allocation2 + $0x13] sm:$0xff] }
  0x7d   : > { %10242 = vmatmul.mubr.msk.f32.gmra.mrb[4].mxu0 %vm1102_vm3, %v1284_v27  ;;  %10223 = vmatmul.mubr.msk.f32.gmra.mrb[2].mxu1 %vm1102_vm3, %v1131_v39  ;;  %v1584_v55 = vld [vmem:[#allocation2 + $0x1b] sm:$0xff]  ;;  %v1585_v56 = vld [vmem:[#allocation2 + $0x23] sm:$0xff]  ;;  %v1586_v57 = vld [vmem:[#allocation2 + $0x2b] sm:$0xff] }
  0x7e   : > { %10244 = vmatprep.mubr.msk.f32.mxu0 %vm1102_vm3, %v1285_v28  ;;  %10225 = vmatprep.mubr.msk.f32.mxu1 %vm1102_vm3, %v1132_v40  ;;  %v1587_v58 = vld [vmem:[#allocation2 + $0x33] sm:$0xff]  ;;  %v1588_v59 = vld [vmem:[#allocation2 + $0x3b] sm:$0xff]  ;;  %v1732_v60 = vld [vmem:[#allocation2 + $0x4] sm:$0xff] }
  0x7f   : > { %v1733_v63 = vld [vmem:[#allocation2 + $0xc] sm:$0xff]  ;;  %v1734_v0 = vld [vmem:[#allocation2 + $0x14] sm:$0xff]  ;;  %v1735_v3 = vld [vmem:[#allocation2 + $0x1c] sm:$0xff] }
  0x80   : > { %v1736_v4 = vld [vmem:[#allocation2 + $0x24] sm:$0xff]  ;;  %v1737_v5 = vld [vmem:[#allocation2 + $0x2c] sm:$0xff]  ;;  %v1738_v7 = vld [vmem:[#allocation2 + $0x34] sm:$0xff] }
  0x81   : > { %10245 = vmatmul.mubr.msk.f32.gmra.mrb[6].mxu0 %vm1102_vm3, %v1286_v29  ;;  %10226 = vmatmul.mubr.msk.f32.gmra.mrb[4].mxu1 %vm1102_vm3, %v1133_v43  ;;  %v1739_v8 = vld [vmem:[#allocation2 + $0x3c] sm:$0xff]  ;;  %v1883_v9 = vld [vmem:[#allocation2 + $0x5] sm:$0xff]  ;;  %v1884_v10 = vld [vmem:[#allocation2 + $0xd] sm:$0xff] }
  0x82   : > { %10251 = vmatprep.mubr.msk.f32.mxu0 %vm1102_vm3, %v1430_v30  ;;  %10228 = vmatprep.mubr.msk.f32.mxu1 %vm1102_vm3, %v1134_v44  ;;  %v1885_v11 = vld [vmem:[#allocation2 + $0x15] sm:$0xff]  ;;  %v1886_v12 = vld [vmem:[#allocation2 + $0x1d] sm:$0xff]  ;;  %v1887_v13 = vld [vmem:[#allocation2 + $0x25] sm:$0xff] }
  0x83   : > { %v1888_v14 = vld [vmem:[#allocation2 + $0x2d] sm:$0xff]  ;;  %v1889_v15 = vld [vmem:[#allocation2 + $0x35] sm:$0xff]  ;;  %v1890_v16 = vld [vmem:[#allocation2 + $0x3d] sm:$0xff] }
  0x84   : > { %v2034_v17 = vld [vmem:[#allocation2 + $0x6] sm:$0xff]  ;;  %v2035_v18 = vld [vmem:[#allocation2 + $0xe] sm:$0xff]  ;;  %v2036_v2 = vld [vmem:[#allocation2 + $0x16] sm:$0xff] }
  0x85   : > { %10252 = vmatmul.mubr.msk.f32.vlgmr.msra.gmra.mrb[0].mxu0 %vm1102_vm3, %v1431_v36  ;;  %10229 = vmatmul.mubr.msk.f32.gmra.mrb[6].mxu1 %vm1102_vm3, %v1135_v47  ;;  %v2037_v19 = vld [vmem:[#allocation2 + $0x1e] sm:$0xff]  ;;  %v2038_v20 = vld [vmem:[#allocation2 + $0x26] sm:$0xff]  ;;  %v2039_v21 = vld [vmem:[#allocation2 + $0x2e] sm:$0xff] }
  0x86   : > { %10254 = vmatprep.mubr.msk.f32.mxu0 %vm1102_vm3, %v1432_v37  ;;  %11249 = vmatpush3.bf16.msk.msra.mxu0 %vm12767_vm2, %v11244_v24  ;;  %v2040_v22 = vld [vmem:[#allocation2 + $0x36] sm:$0xff]  ;;  %v2041_v23 = vld [vmem:[#allocation2 + $0x3e] sm:$0xff]  ;;  %v2185_v24 = vlaneseq }
  0x87   : > { %11252 = vmatprep.subr.msk.bf16.mxu0 %vm12767_vm2, %v11250_v38  ;;  %v9027_v37 = vld [vmem:[%s14068_s13] ss:$0 sm:$0xff]  ;;  %s14077_s13 = sld [smem:[#allocation29_spill]] }
  0x88   : > { %v12895_v25 = vshrl.u32 %v2185_v24, 7  ;;  %v12897_v26 = vand.u32 127, %v2185_v24  ;;  %v9112_v24 = vld [vmem:[%s14061_s17 + $0x40] sm:$0xff] }
  0x89   : > { %10255 = vmatmul.mubr.msk.f32.gmra.mrb[2].mxu0 %vm1102_vm3, %v1433_v41 }
  0x8a   : > { %10257 = vmatprep.mubr.msk.f32.mxu0 %vm1102_vm3, %v1434_v42  ;;  %v2192_v27 = vmul.u32 2, %v12895_v25 }
  0x8c   : > { %vm2196_vm4 = vcmp.eq.s32.totalorder %v12897_v26, %v2192_v27 }
  0x8d   : > { %10258 = vmatmul.mubr.msk.f32.gmra.mrb[4].mxu0 %vm1102_vm3, %v1435_v45  ;;  %v12902_v28 = vsel %vm2196_vm4, 1.0, %v12518_v6 }
  0x8e   : > { %10260 = vmatprep.mubr.msk.f32.mxu0 %vm1102_vm3, %v1436_v46  ;;  %10343 = vmatprep.mubr.msk.f32.mxu1 %vm2204_vm5, %v12902_v28 }
  0x91   : > { %10261 = vmatmul.mubr.msk.f32.gmra.mrb[6].mxu0 %vm1102_vm3, %v1437_v48 }
  0x92   : > { %10267 = vmatprep.mubr.msk.f32.mxu0 %vm1102_vm3, %v1581_v49 }
  0x95   : > { %10268 = vmatmul.mubr.msk.f32.vlgmr.msra.gmra.mrb[0].mxu0 %vm1102_vm3, %v1582_v52 }
  0x96   : > { %10270 = vmatprep.mubr.msk.f32.mxu0 %vm1102_vm3, %v1583_v53  ;;  %11255 = vmatpush3.bf16.msk.msra.mxu0 %vm12767_vm2, %v11250_v38 }
  0x97   : > { %11258 = vmatprep.subr.msk.bf16.mxu0 %vm12767_vm2, %v11256_v54 }
  0x99   : > { %10271 = vmatmul.mubr.msk.f32.gmra.mrb[2].mxu0 %vm1102_vm3, %v1584_v55  ;;  %v2187_v55 = vadd.s32 8, %v12895_v25 }
  0x9a   : > { %10273 = vmatprep.mubr.msk.f32.mxu0 %vm1102_vm3, %v1585_v56 }
  0x9d   : > { %10274 = vmatmul.mubr.msk.f32.gmra.mrb[4].mxu0 %vm1102_vm3, %v1586_v57 }
  0x9e   : > { %10276 = vmatprep.mubr.msk.f32.mxu0 %vm1102_vm3, %v1587_v58 }
  0xa1   : > { %10277 = vmatmul.mubr.msk.f32.gmra.mrb[6].mxu0 %vm1102_vm3, %v1588_v59  ;;  %v2188_v59 = vadd.s32 16, %v12895_v25 }
  0xa2   : > { %10283 = vmatprep.mubr.msk.f32.mxu0 %vm1102_vm3, %v1732_v60 }
  0xa5   : > { %10284 = vmatmul.mubr.msk.f32.vlgmr.msra.gmra.mrb[0].mxu0 %vm1102_vm3, %v1733_v63 }
  0xa6   : > { %10286 = vmatprep.mubr.msk.f32.mxu0 %vm1102_vm3, %v1734_v0  ;;  %11261 = vmatpush3.bf16.msk.msra.mxu0 %vm12767_vm2, %v11256_v54  ;;  %v2193_v0 = vmul.u32 2, %v2187_v55  ;;  %v9127_v55 = vld [vmem:[%s14061_s17 + $0x98] sm:$0xff] }
  0xa7   : > { %11264 = vmatprep.subr.msk.bf16.mxu0 %vm12767_vm2, %v11262_v1 }
  0xa8   : > { %vm2197_vm6 = vcmp.eq.s32.totalorder %v12897_v26, %v2193_v0  ;;  %v9131_v0 = vld [vmem:[%s14061_s17 + $0xb8] sm:$0xff] }
  0xa9   : > { %10287 = vmatmul.mubr.msk.f32.gmra.mrb[2].mxu0 %vm1102_vm3, %v1735_v3 }
  0xaa   : > { %10289 = vmatprep.mubr.msk.f32.mxu0 %vm1102_vm3, %v1736_v4 }
  0xad   : > { %10290 = vmatmul.mubr.msk.f32.gmra.mrb[4].mxu0 %vm1102_vm3, %v1737_v5  ;;  %v2194_v5 = vmul.u32 2, %v2188_v59  ;;  %v9129_v59 = vld [vmem:[%s14061_s17 + $0xa8] sm:$0xff] }
  0xae   : > { %10292 = vmatprep.mubr.msk.f32.mxu0 %vm1102_vm3, %v1738_v7  ;;  %v2327_v7 = vld [vmem:[%s14061_s17] sm:$0xff] }
  0xaf   : > { %vm2198_vm7 = vcmp.eq.s32.totalorder %v12897_v26, %v2194_v5  ;;  %v9137_v5 = vld [vmem:[%s14061_s17 + $0xc8] sm:$0xff] }
  0xb1   : > { %10293 = vmatmul.mubr.msk.f32.gmra.mrb[6].mxu0 %vm1102_vm3, %v1739_v8  ;;  %v2328_v8 = vld [vmem:[%s14061_s17 + $0x8] sm:$0xff] }
  0xb2   : > { %10299 = vmatprep.mubr.msk.f32.mxu0 %vm1102_vm3, %v1883_v9 }
  0xb5   : > { %10300 = vmatmul.mubr.msk.f32.vlgmr.msra.gmra.mrb[0].mxu0 %vm1102_vm3, %v1884_v10 }
  0xb6   : > { %10302 = vmatprep.mubr.msk.f32.mxu0 %vm1102_vm3, %v1885_v11  ;;  %11267 = vmatpush3.bf16.msk.msra.mxu0 %vm12767_vm2, %v11262_v1  ;;  %v2189_v1 = vadd.s32 24, %v12895_v25  ;;  %vm12022_vm2 = vmpackc.low %vm8613_vm0, %vm12517_vm1  ;;  %vm8609_vm1 = vcmask 80896  }
  0xb8   : > { %v2195_v11 = vmul.u32 2, %v2189_v1 }
  0xb9   : > { %10303 = vmatmul.mubr.msk.f32.gmra.mrb[2].mxu0 %vm1102_vm3, %v1886_v12  ;;  %v11284_v12 = vpack.c.bf16 %v2328_v8, %v2327_v7  ;;  %v9138_v8 = vld [vmem:[%s14061_s17 + $0xd0] sm:$0xff] }
  0xba   : > { %10305 = vmatprep.mubr.msk.f32.mxu0 %vm1102_vm3, %v1887_v13  ;;  %v12925_v13 = vsel %vm2197_vm6, 1.0, %v12518_v6  ;;  %vm2199_vm8 = vcmp.eq.s32.totalorder %v12897_v26, %v2195_v11  ;;  %v9113_v26 = vld [vmem:[%s14061_s17 + $0x48] sm:$0xff] }
  0xbb   : > { %v11300_v27 = vpack.c.bf16 %v9113_v26, %v9112_v24  ;;  %v9150_v24 = vld [vmem:[%s14061_s17 + $0x110] sm:$0xff]  ;;  %v9151_v26 = vld [vmem:[%s14061_s17 + $0x118] sm:$0xff] }
  0xbd   : > { %10306 = vmatmul.mubr.msk.f32.gmra.mrb[4].mxu0 %vm1102_vm3, %v1888_v14  ;;  %v2202_v14 = vsel %vm2198_vm7, 1.0, %v12518_v6 }
  0xbe   : > { %10308 = vmatprep.mubr.msk.f32.mxu0 %vm1102_vm3, %v1889_v15  ;;  %v2203_v15 = vsel %vm2199_vm8, 1.0, %v12518_v6 }
  0xc1   : > { %10309 = vmatmul.mubr.msk.f32.gmra.mrb[6].mxu0 %vm1102_vm3, %v1890_v16  ;;  %v2329_v16 = vld [vmem:[%s14061_s17 + $0x10] sm:$0xff] }
  0xc2   : > { %10315 = vmatprep.mubr.msk.f32.mxu0 %vm1102_vm3, %v2034_v17  ;;  %v2330_v17 = vld [vmem:[%s14061_s17 + $0x18] sm:$0xff] }
  0xc5   : > { %10316 = vmatmul.mubr.msk.f32.vlgmr.msra.gmra.mrb[0].mxu0 %vm1102_vm3, %v2035_v18  ;;  %v11288_v18 = vpack.c.bf16 %v2330_v17, %v2329_v16 }
  0xc6   : > { %10318 = vmatprep.mubr.msk.f32.mxu0 %vm1102_vm3, %v2036_v2  ;;  %v2331_v2 = vld [vmem:[%s14061_s17 + $0x20] sm:$0xff] }
  0xc9   : > { %10319 = vmatmul.mubr.msk.f32.gmra.mrb[2].mxu0 %vm1102_vm3, %v2037_v19  ;;  %v2332_v19 = vld [vmem:[%s14061_s17 + $0x28] sm:$0xff] }
  0xca   : > { %10321 = vmatprep.mubr.msk.f32.mxu0 %vm1102_vm3, %v2038_v20  ;;  %v11292_v20 = vpack.c.bf16 %v2332_v19, %v2331_v2  ;;  %v9143_v2 = vld [vmem:[%s14061_s17 + $0xf8] sm:$0xff] }
  0xcd   : > { %10322 = vmatmul.mubr.msk.f32.gmra.mrb[4].mxu0 %vm1102_vm3, %v2039_v21  ;;  %v2333_v21 = vld [vmem:[%s14061_s17 + $0x30] sm:$0xff] }
  0xce   : > { %10324 = vmatprep.mubr.msk.f32.mxu0 %vm1102_vm3, %v2040_v22  ;;  %v2334_v22 = vld [vmem:[%s14061_s17 + $0x38] sm:$0xff] }
  0xd1   : > { %10325 = vmatmul.mubr.msk.f32.gmra.mrb[6].mxu0 %vm1102_vm3, %v2041_v23  ;;  %v11296_v23 = vpack.c.bf16 %v2334_v22, %v2333_v21  ;;  %v9148_v21 = vld [vmem:[%s14061_s17 + $0x100] sm:$0xff]  ;;  %v9149_v22 = vld [vmem:[%s14061_s17 + $0x108] sm:$0xff]  ;;  %vm8604_vm3 = vcmask 73728  }
 0x14c   : > { %v10221_v29 = vpop.f32.mrb[0].mxu1 }
 0x14d   : > { %v1232_v30 = vpop.f32.mrb[1].mxu1  ;;  %v1272_v38 = vadd.f32 %v10221_v29, %v9027_v37 }
 0x14e   : > { %v1271_v39 = vadd.f32 %v9027_v37, %v1232_v30 }
 0x150   : > { %v10224_v31 = vpop.f32.mrb[2].mxu1 }
 0x151   : > { %v1242_v32 = vpop.f32.mrb[3].mxu1  ;;  %v1274_v42 = vadd.f32 %v10224_v31, %v9027_v37 }
 0x152   : > { %v1273_v45 = vadd.f32 %v9027_v37, %v1242_v32 }
 0x154   : > { %v10227_v33 = vpop.f32.mrb[4].mxu1 }
 0x155   : > { %v1252_v34 = vpop.f32.mrb[5].mxu1  ;;  %v1276_v49 = vadd.f32 %v10227_v33, %v9027_v37 }
 0x156   : > { %v1275_v52 = vadd.f32 %v9027_v37, %v1252_v34 }
 0x158   : > { %v10230_v35 = vpop.f32.mrb[6].mxu1 }
 0x159   : > { %v1262_v36 = vpop.f32.mrb[7].mxu1  ;;  %v1278_v57 = vadd.f32 %v10230_v35, %v9027_v37 }
 0x15a   : > { %v1277_v61 = vadd.f32 %v9027_v37, %v1262_v36  ;;  %v9114_v37 = vld [vmem:[%s14061_s17 + $0x50] sm:$0xff] }
 0x198   : > { %v10317_v40 = vpop.f32.mrb[0].mxu0 }
 0x199   : > { %v12049_v41 = vadd.f32 %v10317_v40, %v1272_v38  ;;  %v2138_v43 = vpop.f32.mrb[1].mxu0  ;;  %v9115_v38 = vld [vmem:[%s14061_s17 + $0x58] sm:$0xff] }
 0x19a   : > { %v12051_v44 = vadd.f32 %v2138_v43, %v1271_v39  ;;  %v9117_v43 = vld [vmem:[%s14061_s17 + $0x68] sm:$0xff] }
 0x19c   : > { %v11268_v46 = vpack.c.bf16 %v12049_v41, %v12051_v44  ;;  %v10320_v47 = vpop.f32.mrb[2].mxu0  ;;  %v11304_v41 = vpack.c.bf16 %v9115_v38, %v9114_v37 }
 0x19d   : > { %v12053_v48 = vadd.f32 %v10320_v47, %v1274_v42  ;;  %v2148_v50 = vpop.f32.mrb[3].mxu0  ;;  %v9116_v42 = vld [vmem:[%s14061_s17 + $0x60] sm:$0xff]  ;;  %v9118_v47 = vld [vmem:[%s14061_s17 + $0x70] sm:$0xff] }
 0x19e   : > { %v12055_v51 = vadd.f32 %v2148_v50, %v1273_v45  ;;  %11269 = vmatprep.subr.bf16.mxu1 %v11268_v46 }
 0x19f   : > { %11271 = vmatpush3.bf16.msra.mxu1 %v11268_v46  ;;  %v11308_v46 = vpack.c.bf16 %v9117_v43, %v9116_v42  ;;  %v2978_v42 = vld [vmem:[%s12566_s29] sm:$0xff]  ;;  %v2979_v43 = vld [vmem:[%s12566_s29 + $0x8] sm:$0xff] }
 0x1a0   : > { %v11272_v53 = vpack.c.bf16 %v12053_v48, %v12055_v51  ;;  %v10323_v54 = vpop.f32.mrb[4].mxu0  ;;  %v9119_v48 = vld [vmem:[%s14061_s17 + $0x78] sm:$0xff]  ;;  %v9124_v51 = vld [vmem:[%s14061_s17 + $0x80] sm:$0xff] }
 0x1a1   : > { %v12057_v56 = vadd.f32 %v10323_v54, %v1276_v49  ;;  %v2158_v58 = vpop.f32.mrb[5].mxu0  ;;  %v11312_v50 = vpack.c.bf16 %v9119_v48, %v9118_v47  ;;  %v9126_v54 = vld [vmem:[%s14061_s17 + $0x90] sm:$0xff]  ;;  %v2982_v48 = vld [vmem:[%s12566_s29 + $0x20] sm:$0xff] }
 0x1a2   : > { %v12059_v60 = vadd.f32 %v2158_v58, %v1275_v52  ;;  %11273 = vmatprep.subr.bf16.mxu1 %v11272_v53  ;;  %v9125_v52 = vld [vmem:[%s14061_s17 + $0x88] sm:$0xff]  ;;  %v9128_v58 = vld [vmem:[%s14061_s17 + $0xa0] sm:$0xff] }
 0x1a3   : > { %11275 = vmatpush3.bf16.msra.mxu1 %v11272_v53  ;;  %v11316_v53 = vpack.c.bf16 %v9125_v52, %v9124_v51  ;;  %v9107_v51 = vld [vmem:[%s12556_s21] ss:$0 sm:$0xff] }
 0x1a4   : > { %v11276_v62 = vpack.c.bf16 %v12057_v56, %v12059_v60  ;;  %v10326_v63 = vpop.f32.mrb[6].mxu0  ;;  %v11320_v56 = vpack.c.bf16 %v9127_v55, %v9126_v54 }
 0x1a5   : > { %v12061_v3 = vadd.f32 %v10326_v63, %v1278_v57  ;;  %v2168_v4 = vpop.f32.mrb[7].mxu0  ;;  %v9130_v63 = vld [vmem:[%s14061_s17 + $0xb0] sm:$0xff] }
 0x1a6   : > { %v12063_v9 = vadd.f32 %v2168_v4, %v1277_v61  ;;  %11277 = vmatprep.subr.bf16.mxu1 %v11276_v62  ;;  %v11324_v61 = vpack.c.bf16 %v9129_v59, %v9128_v58  ;;  %v9136_v4 = vld [vmem:[%s14061_s17 + $0xc0] sm:$0xff] }
 0x1a7   : > { %11279 = vmatpush3.bf16.msra.mxu1 %v11276_v62  ;;  %v11332_v7 = vpack.c.bf16 %v9137_v5, %v9136_v4  ;;  %v3074_v59 = vld [vmem:[%s14060_s3] sm:$0xff]  ;;  %v3079_v5 = vld [vmem:[%s14060_s3 + $0x28] sm:$0xff] }
 0x1a8   : > { %v11280_v10 = vpack.c.bf16 %v12061_v3, %v12063_v9  ;;  %v11328_v3 = vpack.c.bf16 %v9131_v0, %v9130_v63  ;;  %v9139_v9 = vld [vmem:[%s14061_s17 + $0xd8] sm:$0xff]  ;;  %v3076_v0 = vld [vmem:[%s14060_s3 + $0x10] sm:$0xff]  ;;  %v3078_v4 = vld [vmem:[%s14060_s3 + $0x20] sm:$0xff] }
 0x1aa   : > { %11281 = vmatprep.subr.bf16.mxu1 %v11280_v10 }
 0x1ab   : > { %11283 = vmatpush3.bf16.msra.mxu1 %v11280_v10  ;;  %v11336_v10 = vpack.c.bf16 %v9139_v9, %v9138_v8  ;;  %v2984_v8 = vld [vmem:[%s12566_s29 + $0x30] sm:$0xff]  ;;  %v2985_v9 = vld [vmem:[%s12566_s29 + $0x38] sm:$0xff] }
 0x1ac   : > { %11285 = vmatprep.subr.bf16.mxu1 %v11284_v12 }
 0x1ae   : > { %10344 = vmatmul.mubr.msk.f32.vlgmr.msra.gmra.mrb[8].mxu1 %vm2204_vm5, %v12925_v13 }
 0x1af   : > { %10346 = vmatprep.mubr.msk.f32.mxu1 %vm2204_vm5, %v2202_v14  ;;  %11287 = vmatpush3.bf16.msra.mxu1 %v11284_v12  ;;  %v9140_v12 = vld [vmem:[%s14061_s17 + $0xe0] sm:$0xff]  ;;  %v9141_v14 = vld [vmem:[%s14061_s17 + $0xe8] sm:$0xff] }
 0x1b0   : > { %11289 = vmatprep.subr.bf16.mxu1 %v11288_v18  ;;  %v11340_v16 = vpack.c.bf16 %v9141_v14, %v9140_v12  ;;  %v3081_v12 = vld [vmem:[%s14060_s3 + $0x38] sm:$0xff] }
 0x1b2   : > { %10347 = vmatmul.mubr.msk.f32.gmra.mrb[10].mxu1 %vm2204_vm5, %v2203_v15 }
 0x1b3   : > { %11291 = vmatpush3.bf16.msra.mxu1 %v11288_v18  ;;  %v9142_v18 = vld [vmem:[%s14061_s17 + $0xf0] sm:$0xff] }
 0x1b4   : > { %11293 = vmatprep.subr.bf16.mxu1 %v11292_v20 }
 0x1b7   : > { %11295 = vmatpush3.bf16.msra.mxu1 %v11292_v20  ;;  %v11344_v20 = vpack.c.bf16 %v9143_v2, %v9142_v18 }
 0x1b8   : > { %11297 = vmatprep.subr.bf16.mxu1 %v11296_v23 }
 0x1bb   : > { %11299 = vmatpush3.bf16.msra.mxu1 %v11296_v23  ;;  %v11348_v23 = vpack.c.bf16 %v9149_v22, %v9148_v21  ;;  %v3166_v22 = vld [vmem:[%s14058_s8 + $0x10] sm:$0xff] }
 0x1bc   : > { %11301 = vmatprep.subr.bf16.mxu1 %v11300_v27 }
 0x281   : > { %v10345_v29 = vpop.f32.mrb[8].mxu1 }
 0x282   : > { %v2303_v30 = vmax.f32 %v10345_v29, 0.0  ;;  %v2283_v31 = vpop.f32.mrb[9].mxu1 }
 0x283   : > { %v2302_v32 = vmax.f32 %v2283_v31, 0.0  ;;  %v9153_v31 = vld [vmem:[%s14061_s17 + $0x128] sm:$0xff] }
 0x284   : > { %2312 = vst.msk [vmem:[#allocation3 + $0xa] sm:$0xff] %vm2204_vm5, %v2303_v30  ;;  %v9152_v30 = vld [vmem:[%s14061_s17 + $0x120] sm:$0xff] }
 0x285   : > { %2311 = vst.msk [vmem:[#allocation3 + $0x2] sm:$0xff] %vm2204_vm5, %v2302_v32  ;;  %v10348_v33 = vpop.f32.mrb[10].mxu1 }
 0x286   : > { %v2305_v34 = vmax.f32 %v10348_v33, 0.0  ;;  %v2293_v35 = vpop.f32.mrb[11].mxu1  ;;  %v11356_v33 = vpack.c.bf16 %v9153_v31, %v9152_v30  ;;  %v3168_v30 = vld [vmem:[%s14058_s8 + $0x20] sm:$0xff]  ;;  %v3169_v31 = vld [vmem:[%s14058_s8 + $0x28] sm:$0xff] }
 0x287   : > { %v2304_v36 = vmax.f32 %v2293_v35, 0.0  ;;  %v9154_v35 = vld [vmem:[%s14061_s17 + $0x130] sm:$0xff] }
 0x288   : > { %2314 = vst.msk [vmem:[#allocation3 + $0x1a] sm:$0xff] %vm2204_vm5, %v2305_v34 }
 0x289   : > { %2313 = vst.msk [vmem:[#allocation3 + $0x12] sm:$0xff] %vm2204_vm5, %v2304_v36  ;;  %v9155_v36 = vld [vmem:[%s14061_s17 + $0x138] sm:$0xff]  ;;  %s14078_s17 = sld [smem:[#allocation30_spill]] }
 0x28a   : > { %v11360_v38 = vpack.c.bf16 %v9155_v36, %v9154_v35  ;;  %v9177_v36 = vld [vmem:[%s12566_s29 + $0x40] sm:$0xff] }
 0x28b   : > { %v2551_v11 = vld [vmem:[#allocation3 + $0xa] sm:$0xff] }
 0x28c   : > { %v2323_v39 = vld [vmem:[#allocation3] sm:$0xff]  ;;  %v2324_v40 = vld [vmem:[#allocation3 + $0x8] sm:$0xff] }
 0x28d   : > { %10365 = vmatprep.mubr.msk.f32.mxu1 %vm2204_vm5, %v2323_v39  ;;  %v2436_v49 = vld [vmem:[#allocation3 + $0x1] sm:$0xff]  ;;  %v2437_v57 = vld [vmem:[#allocation3 + $0x9] sm:$0xff] }
 0x28e   : > { %10366 = vmatmul.mubr.msk.f32.vlgmr.msra.gmra.mrb[12].mxu1 %vm2204_vm5, %v2324_v40  ;;  %v2550_v1 = vld [vmem:[#allocation3 + $0x2] sm:$0xff] }
 0x28f   : > { %11303 = vmatpush3.bf16.msra.mxu1 %v11300_v27  ;;  %v2553_v17 = vld [vmem:[#allocation3 + $0x1a] sm:$0xff]  ;;  %v2664_v19 = vld [vmem:[#allocation3 + $0x3] sm:$0xff]  ;;  %v11352_v27 = vpack.c.bf16 %v9151_v26, %v9150_v24 }
 0x290   : > { %v2325_v44 = vld [vmem:[#allocation3 + $0x10] sm:$0xff]  ;;  %11305 = vmatprep.subr.bf16.mxu1 %v11304_v41  ;;  %v2326_v45 = vld [vmem:[#allocation3 + $0x18] sm:$0xff]  ;;  %v2778_v37 = vld [vmem:[#allocation3 + $0x4] sm:$0xff] }
 0x291   : > { %10368 = vmatprep.mubr.msk.f32.mxu1 %vm2204_vm5, %v2325_v44  ;;  %v2438_v60 = vld [vmem:[#allocation3 + $0x11] sm:$0xff]  ;;  %v2439_v62 = vld [vmem:[#allocation3 + $0x19] sm:$0xff]  ;;  %v11372_v44 = vpack.c.bf16 %v2979_v43, %v2978_v42 }
 0x292   : > { %10369 = vmatmul.mubr.msk.f32.gmra.mrb[14].mxu1 %vm2204_vm5, %v2326_v45  ;;  %v2552_v15 = vld [vmem:[#allocation3 + $0x12] sm:$0xff]  ;;  %v2667_v34 = vld [vmem:[#allocation3 + $0x1b] sm:$0xff]  ;;  %v2980_v45 = vld [vmem:[%s12566_s29 + $0x10] sm:$0xff] }
 0x293   : > { %11307 = vmatpush3.bf16.msra.mxu1 %v11304_v41  ;;  %10387 = vmatprep.mubr.msk.f32.mxu1 %vm2204_vm5, %v2436_v49  ;;  %v2665_v29 = vld [vmem:[#allocation3 + $0xb] sm:$0xff]  ;;  %v2666_v32 = vld [vmem:[#allocation3 + $0x13] sm:$0xff]  ;;  %v2781_v41 = vld [vmem:[#allocation3 + $0x1c] sm:$0xff] }
 0x294   : > { %11309 = vmatprep.subr.bf16.mxu1 %v11308_v46  ;;  %v2779_v39 = vld [vmem:[#allocation3 + $0xc] sm:$0xff]  ;;  %v2780_v40 = vld [vmem:[#allocation3 + $0x14] sm:$0xff]  ;;  %11373 = vmatprep.subr.bf16.mxu0 %v11372_v44  ;;  %v2983_v49 = vld [vmem:[%s12566_s29 + $0x28] sm:$0xff] }
 0x295   : > { %11375 = vmatpush3.bf16.msra.mxu0 %v11372_v44  ;;  %v9181_v42 = vld [vmem:[%s12566_s29 + $0x60] sm:$0xff]  ;;  %v9182_v43 = vld [vmem:[%s12566_s29 + $0x68] sm:$0xff] }
 0x296   : > { %v11438_v44 = vpack.c.bf16 %v9182_v43, %v9181_v42  ;;  %v9299_v43 = vld [vmem:[%s14058_s8 + $0xe0] sm:$0xff] }
 0x297   : > { %11311 = vmatpush3.bf16.msra.mxu1 %v11308_v46  ;;  %v2981_v46 = vld [vmem:[%s12566_s29 + $0x18] sm:$0xff] }
 0x298   : > { %11313 = vmatprep.subr.bf16.mxu1 %v11312_v50  ;;  %v11376_v47 = vpack.c.bf16 %v2981_v46, %v2980_v45  ;;  %v9183_v45 = vld [vmem:[%s12566_s29 + $0x70] sm:$0xff]  ;;  %v9184_v46 = vld [vmem:[%s12566_s29 + $0x78] sm:$0xff] }
 0x29a   : > { %11377 = vmatprep.subr.bf16.mxu0 %v11376_v47 }
 0x29b   : > { %11315 = vmatpush3.bf16.msra.mxu1 %v11312_v50  ;;  %v11380_v50 = vpack.c.bf16 %v2983_v49, %v2982_v48  ;;  %11379 = vmatpush3.bf16.msra.mxu0 %v11376_v47  ;;  %v11442_v47 = vpack.c.bf16 %v9184_v46, %v9183_v45  ;;  %v9201_v48 = vld [vmem:[%s14058_s8 + $0x40] sm:$0xff]  ;;  %v9202_v49 = vld [vmem:[%s14058_s8 + $0x48] sm:$0xff]  ;;  %v9301_v46 = vld [vmem:[%s14058_s8 + $0xf0] sm:$0xff] }
 0x29c   : > { %11317 = vmatprep.subr.bf16.mxu1 %v11316_v53 }
 0x29d   : > { %11381 = vmatprep.subr.bf16.mxu0 %v11380_v50 }
 0x29e   : > { %10388 = vmatmul.mubr.msk.f32.vlgmr.msra.gmra.mrb[12].mxu1 %vm2204_vm5, %v2437_v57 }
 0x29f   : > { %10390 = vmatprep.mubr.msk.f32.mxu1 %vm2204_vm5, %v2438_v60  ;;  %11319 = vmatpush3.bf16.msra.mxu1 %v11316_v53  ;;  %v3075_v60 = vld [vmem:[%s14060_s3 + $0x8] sm:$0xff] }
 0x2a0   : > { %11321 = vmatprep.subr.bf16.mxu1 %v11320_v56  ;;  %11383 = vmatpush3.bf16.msra.mxu0 %v11380_v50  ;;  %v11388_v63 = vpack.c.bf16 %v3075_v60, %v3074_v59  ;;  %v11462_v50 = vpack.c.bf16 %v9202_v49, %v9201_v48  ;;  %v9225_v59 = vld [vmem:[%s12566_s29 + $0x80] sm:$0xff]  ;;  %v9226_v60 = vld [vmem:[%s12566_s29 + $0x88] sm:$0xff] }
 0x2a1   : > { %v9165_v49 = vld [vmem:[%s14056_s19] ss:$0 sm:$0xff] }
 0x2a2   : > { %10391 = vmatmul.mubr.msk.f32.gmra.mrb[14].mxu1 %vm2204_vm5, %v2439_v62 }
 0x2a3   : > { %11323 = vmatpush3.bf16.msra.mxu1 %v11320_v56  ;;  %10409 = vmatprep.mubr.msk.f32.mxu1 %vm2204_vm5, %v2550_v1  ;;  %v3077_v1 = vld [vmem:[%s14060_s3 + $0x18] sm:$0xff] }
 0x2a4   : > { %11325 = vmatprep.subr.bf16.mxu1 %v11324_v61 }
 0x2a7   : > { %11327 = vmatpush3.bf16.msra.mxu1 %v11324_v61 }
 0x2a8   : > { %11329 = vmatprep.subr.bf16.mxu1 %v11328_v3 }
 0x2ab   : > { %11331 = vmatpush3.bf16.msra.mxu1 %v11328_v3  ;;  %v11392_v3 = vpack.c.bf16 %v3077_v1, %v3076_v0  ;;  %v9229_v1 = vld [vmem:[%s12566_s29 + $0xa0] sm:$0xff] }
 0x2ac   : > { %11333 = vmatprep.subr.bf16.mxu1 %v11332_v7 }
 0x2ae   : > { %10410 = vmatmul.mubr.msk.f32.vlgmr.msra.gmra.mrb[12].mxu1 %vm2204_vm5, %v2551_v11  ;;  %v3080_v11 = vld [vmem:[%s14060_s3 + $0x30] sm:$0xff] }
 0x2af   : > { %10412 = vmatprep.mubr.msk.f32.mxu1 %vm2204_vm5, %v2552_v15  ;;  %11335 = vmatpush3.bf16.msra.mxu1 %v11332_v7  ;;  %v11396_v7 = vpack.c.bf16 %v3079_v5, %v3078_v4  ;;  %v11400_v14 = vpack.c.bf16 %v3081_v12, %v3080_v11  ;;  %v3165_v15 = vld [vmem:[%s14058_s8 + $0x8] sm:$0xff]  ;;  %v9231_v5 = vld [vmem:[%s12566_s29 + $0xb0] sm:$0xff] }
 0x2b0   : > { %11337 = vmatprep.subr.bf16.mxu1 %v11336_v10  ;;  %v9251_v12 = vld [vmem:[%s14058_s8 + $0x90] sm:$0xff] }
 0x2b2   : > { %10413 = vmatmul.mubr.msk.f32.gmra.mrb[14].mxu1 %vm2204_vm5, %v2553_v17 }
 0x2b3   : > { %11339 = vmatpush3.bf16.msra.mxu1 %v11336_v10  ;;  %10431 = vmatprep.mubr.msk.f32.mxu1 %vm2204_vm5, %v2664_v19  ;;  %v11384_v10 = vpack.c.bf16 %v2985_v9, %v2984_v8  ;;  %v2974_v19 = vld [vmem:[%s12561_s25] sm:$0xff] }
 0x2b4   : > { %11341 = vmatprep.subr.bf16.mxu1 %v11340_v16  ;;  %v9249_v9 = vld [vmem:[%s14058_s8 + $0x80] sm:$0xff] }
 0x2b5   : > { %11385 = vmatprep.subr.bf16.mxu0 %v11384_v10 }
 0x2b6   : > { %11387 = vmatpush3.bf16.msra.mxu0 %v11384_v10  ;;  %v9250_v10 = vld [vmem:[%s14058_s8 + $0x88] sm:$0xff] }
 0x2b7   : > { %11343 = vmatpush3.bf16.msra.mxu1 %v11340_v16  ;;  %v11528_v11 = vpack.c.bf16 %v9250_v10, %v9249_v9 }
 0x2b8   : > { %11345 = vmatprep.subr.bf16.mxu1 %v11344_v20 }
 0x2bb   : > { %11347 = vmatpush3.bf16.msra.mxu1 %v11344_v20  ;;  %v2975_v20 = vld [vmem:[%s12561_s25 + $0x8] sm:$0xff] }
 0x2bc   : > { %11349 = vmatprep.subr.bf16.mxu1 %v11348_v23 }
 0x2be   : > { %10432 = vmatmul.mubr.msk.f32.vlgmr.msra.gmra.mrb[12].mxu1 %vm2204_vm5, %v2665_v29 }
 0x2bf   : > { %10434 = vmatprep.mubr.msk.f32.mxu1 %vm2204_vm5, %v2666_v32  ;;  %11351 = vmatpush3.bf16.msra.mxu1 %v11348_v23  ;;  %v3167_v23 = vld [vmem:[%s14058_s8 + $0x18] sm:$0xff]  ;;  %v11412_v32 = vpack.c.bf16 %v3169_v31, %v3168_v30  ;;  %v9275_v31 = vld [vmem:[%s12566_s29 + $0xe0] sm:$0xff] }
 0x2c0   : > { %11353 = vmatprep.subr.bf16.mxu1 %v11352_v27  ;;  %v11408_v29 = vpack.c.bf16 %v3167_v23, %v3166_v22  ;;  %v9273_v23 = vld [vmem:[%s12566_s29 + $0xd0] sm:$0xff] }
 0x2c2   : > { %10435 = vmatmul.mubr.msk.f32.gmra.mrb[14].mxu1 %vm2204_vm5, %v2667_v34  ;;  %v3171_v34 = vld [vmem:[%s14058_s8 + $0x38] sm:$0xff] }
 0x2c3   : > { %11355 = vmatpush3.bf16.msra.mxu1 %v11352_v27  ;;  %10453 = vmatprep.mubr.msk.f32.mxu1 %vm2204_vm5, %v2778_v37  ;;  %v9178_v37 = vld [vmem:[%s12566_s29 + $0x48] sm:$0xff] }
 0x2c4   : > { %11357 = vmatprep.subr.bf16.mxu1 %v11356_v33 }
 0x2c7   : > { %11359 = vmatpush3.bf16.msra.mxu1 %v11356_v33  ;;  %v3170_v33 = vld [vmem:[%s14058_s8 + $0x30] sm:$0xff] }
 0x2c8   : > { %11361 = vmatprep.subr.bf16.mxu1 %v11360_v38  ;;  %v11416_v35 = vpack.c.bf16 %v3171_v34, %v3170_v33  ;;  %v9277_v34 = vld [vmem:[%s12566_s29 + $0xf0] sm:$0xff] }
 0x2cb   : > { %11363 = vmatpush3.bf16.msra.mxu1 %v11360_v38  ;;  %v11430_v38 = vpack.c.bf16 %v9178_v37, %v9177_v36  ;;  %v9295_v37 = vld [vmem:[%s14058_s8 + $0xc0] sm:$0xff] }
 0x2ce   : > { %10454 = vmatmul.mubr.msk.f32.vlgmr.msra.gmra.mrb[12].mxu1 %vm2204_vm5, %v2779_v39  ;;  %v9179_v39 = vld [vmem:[%s12566_s29 + $0x50] sm:$0xff] }
 0x2cf   : > { %10456 = vmatprep.mubr.msk.f32.mxu1 %vm2204_vm5, %v2780_v40  ;;  %v9180_v40 = vld [vmem:[%s12566_s29 + $0x58] sm:$0xff] }
 0x2d2   : > { %10457 = vmatmul.mubr.msk.f32.gmra.mrb[14].mxu1 %vm2204_vm5, %v2781_v41  ;;  %v11434_v41 = vpack.c.bf16 %v9180_v40, %v9179_v39  ;;  %v9297_v40 = vld [vmem:[%s14058_s8 + $0xd0] sm:$0xff] }
 0x2d3   : > { %10467 = vmatprep.mubr.msk.f32.mxu1 %vm2892_vm9, %v12902_v28 }
 0x3a1   : > { %v10455_v28 = vpop.f32.mrb[12].mxu1 }
 0x3a2   : > { %v12064_v52 = vadd.f32 %v10455_v28, %v9107_v51  ;;  %v2869_v53 = vpop.f32.mrb[13].mxu1  ;;  %v9204_v28 = vld [vmem:[%s14058_s8 + $0x58] sm:$0xff] }
 0x3a3   : > { %v12065_v54 = vadd.f32 %v9107_v51, %v2869_v53  ;;  %v9205_v53 = vld [vmem:[%s14058_s8 + $0x60] sm:$0xff] }
 0x3a5   : > { %v11364_v55 = vpack.c.bf16 %v12064_v52, %v12065_v54  ;;  %v10458_v56 = vpop.f32.mrb[14].mxu1  ;;  %v9206_v54 = vld [vmem:[%s14058_s8 + $0x68] sm:$0xff] }
 0x3a6   : > { %v12066_v57 = vadd.f32 %v10458_v56, %v9107_v51  ;;  %v2879_v58 = vpop.f32.mrb[15].mxu1  ;;  %v9207_v56 = vld [vmem:[%s14058_s8 + $0x70] sm:$0xff] }
 0x3a7   : > { %v12067_v61 = vadd.f32 %v9107_v51, %v2879_v58  ;;  %11365 = vmatprep.subr.bf16.mxu1 %v11364_v55  ;;  %v9203_v51 = vld [vmem:[%s14058_s8 + $0x50] sm:$0xff] }
 0x3a8   : > { %11367 = vmatpush3.bf16.msra.mxu1 %v11364_v55  ;;  %v11466_v52 = vpack.c.bf16 %v9204_v28, %v9203_v51  ;;  %v11470_v55 = vpack.c.bf16 %v9206_v54, %v9205_v53 }
 0x3a9   : > { %v11368_v62 = vpack.c.bf16 %v12066_v57, %v12067_v61  ;;  %v9208_v57 = vld [vmem:[%s14058_s8 + $0x78] sm:$0xff]  ;;  %v11496_v61 = vpack.c.bf16 %v9226_v60, %v9225_v59  ;;  %v9168_v60 = vld [vmem:[%s12591_s24] ss:$0 sm:$0xff] }
 0x3aa   : > { %v11474_v58 = vpack.c.bf16 %v9208_v57, %v9207_v56 }
 0x3ab   : > { %11369 = vmatprep.subr.bf16.mxu1 %v11368_v62 }
 0x3ac   : > { %11371 = vmatpush3.bf16.msra.mxu1 %v11368_v62  ;;  %v9227_v62 = vld [vmem:[%s12566_s29 + $0x90] sm:$0xff] }
 0x3ad   : > { %11389 = vmatprep.subr.bf16.mxu1 %v11388_v63 }
 0x3af   : > { %10468 = vmatmul.mubr.msk.f32.vlgmr.msra.gmra.mrb[16].mxu1 %vm2892_vm9, %v12925_v13  ;;  %v3164_v13 = vld [vmem:[%s14058_s8] sm:$0xff] }
 0x3b0   : > { %11391 = vmatpush3.bf16.msra.mxu1 %v11388_v63  ;;  %v11404_v16 = vpack.c.bf16 %v3165_v15, %v3164_v13  ;;  %v9228_v63 = vld [vmem:[%s12566_s29 + $0x98] sm:$0xff]  ;;  %v9253_v15 = vld [vmem:[%s14058_s8 + $0xa0] sm:$0xff] }
 0x3b1   : > { %11393 = vmatprep.subr.bf16.mxu1 %v11392_v3  ;;  %v11500_v0 = vpack.c.bf16 %v9228_v63, %v9227_v62 }
 0x3b2   : > { %11405 = vmatprep.subr.bf16.mxu0 %v11404_v16 }
 0x3b4   : > { %11395 = vmatpush3.bf16.msra.mxu1 %v11392_v3  ;;  %v9230_v3 = vld [vmem:[%s12566_s29 + $0xa8] sm:$0xff] }
 0x3b5   : > { %11397 = vmatprep.subr.bf16.mxu1 %v11396_v7  ;;  %v11504_v4 = vpack.c.bf16 %v9230_v3, %v9229_v1  ;;  %v13134_v3 = vld [vmem:[%s14057_s14 + $0x1] ss:$0 sm:$0xff] }
 0x3b8   : > { %11399 = vmatpush3.bf16.msra.mxu1 %v11396_v7  ;;  %v9232_v7 = vld [vmem:[%s12566_s29 + $0xb8] sm:$0xff] }
 0x3b9   : > { %11401 = vmatprep.subr.bf16.mxu1 %v11400_v14  ;;  %v11508_v8 = vpack.c.bf16 %v9232_v7, %v9231_v5 }
 0x3bc   : > { %11403 = vmatpush3.bf16.msra.mxu1 %v11400_v14  ;;  %v9252_v14 = vld [vmem:[%s14058_s8 + $0x98] sm:$0xff] }
 0x3bd   : > { %v11532_v13 = vpack.c.bf16 %v9252_v14, %v9251_v12 }
 0x482   : > { %v10469_v17 = vpop.f32.mrb[16].mxu1 }
 0x483   : > { %v2973_v18 = vmax.f32 %v10469_v17, 0.0  ;;  %v2963_v2 = vpop.f32.mrb[17].mxu1 }
 0x484   : > { %v2972_v21 = vmax.f32 %v2963_v2, 0.0  ;;  %v9256_v2 = vld [vmem:[%s14058_s8 + $0xb8] sm:$0xff] }
 0x485   : > { %v13027_v27 = vadd.f32 %v2975_v20, %v2973_v18  ;;  %v9271_v20 = vld [vmem:[%s12566_s29 + $0xc0] sm:$0xff] }
 0x486   : > { %v13023_v24 = vadd.f32 %v2974_v19, %v2972_v21  ;;  %v13025_v26 = vpack.c.bf16 %v2973_v18, %v2972_v21  ;;  %v9255_v18 = vld [vmem:[%s14058_s8 + $0xb0] sm:$0xff]  ;;  %v9272_v21 = vld [vmem:[%s12566_s29 + $0xc8] sm:$0xff] }
 0x487   : > { %v11540_v19 = vpack.c.bf16 %v9256_v2, %v9255_v18  ;;  %v11558_v22 = vpack.c.bf16 %v9272_v21, %v9271_v20  ;;  %v9258_v18 = vld [vmem:[%s12591_s24 + $0x2] ss:$0 sm:$0xff] }
 0x488   : > { %10486 = vmatprep.mubr.msk.f32.mxu0 %vm2204_vm5, %v13023_v24  ;;  %10505 = vmatprep.mubr.msk.f32.mxu1 %vm2204_vm5, %v13023_v24 }
 0x489   : > { %10487 = vmatmul.mubr.msk.f32.vlgmr.msra.gmra.mrb[8].mxu0 %vm2204_vm5, %v13027_v27  ;;  %10506 = vmatmul.mubr.msk.f32.vlgmr.msra.gmra.mrb[18].mxu1 %vm2204_vm5, %v13027_v27 }
 0x48a   : > { %11407 = vmatpush3.bf16.msra.mxu0 %v11404_v16  ;;  %10524 = vmatprep.mubr.msk.f32.mxu0 %vm2204_vm5, %v13023_v24  ;;  %v9254_v16 = vld [vmem:[%s14058_s8 + $0xa8] sm:$0xff] }
 0x48b   : > { %11409 = vmatprep.subr.bf16.mxu0 %v11408_v29  ;;  %v11536_v17 = vpack.c.bf16 %v9254_v16, %v9253_v15 }
 0x48e   : > { %11411 = vmatpush3.bf16.msra.mxu0 %v11408_v29  ;;  %v9274_v29 = vld [vmem:[%s12566_s29 + $0xd8] sm:$0xff] }
 0x48f   : > { %11413 = vmatprep.subr.bf16.mxu0 %v11412_v32  ;;  %v11562_v30 = vpack.c.bf16 %v9274_v29, %v9273_v23  ;;  %v13156_v23 = vld [vmem:[%s14057_s14 + $0x3] ss:$0 sm:$0xff] }
 0x492   : > { %11415 = vmatpush3.bf16.msra.mxu0 %v11412_v32  ;;  %v9276_v32 = vld [vmem:[%s12566_s29 + $0xe8] sm:$0xff] }
 0x493   : > { %11417 = vmatprep.subr.bf16.mxu0 %v11416_v35  ;;  %v11566_v33 = vpack.c.bf16 %v9276_v32, %v9275_v31  ;;  %v9304_v32 = vld [vmem:[%s12591_s24 + $0x3] ss:$0 sm:$0xff] }
 0x496   : > { %11419 = vmatpush3.bf16.msra.mxu0 %v11416_v35  ;;  %v9278_v35 = vld [vmem:[%s12566_s29 + $0xf8] sm:$0xff] }
 0x497   : > { %11431 = vmatprep.subr.bf16.mxu0 %v11430_v38  ;;  %v11570_v36 = vpack.c.bf16 %v9278_v35, %v9277_v34 }
 0x499   : > { %10525 = vmatmul.mubr.msk.f32.vlgmr.msra.gmra.mrb[10].mxu0 %vm2204_vm5, %v13027_v27 }
 0x49a   : > { %11433 = vmatpush3.bf16.msra.mxu0 %v11430_v38  ;;  %10557 = vmatprep.mubr.msk.f32.mxu0 %vm2204_vm5, %v13023_v24  ;;  %v9296_v38 = vld [vmem:[%s14058_s8 + $0xc8] sm:$0xff] }
 0x49b   : > { %11435 = vmatprep.subr.bf16.mxu0 %v11434_v41  ;;  %v11590_v39 = vpack.c.bf16 %v9296_v38, %v9295_v37 }
 0x49e   : > { %11437 = vmatpush3.bf16.msra.mxu0 %v11434_v41  ;;  %v9298_v41 = vld [vmem:[%s14058_s8 + $0xd8] sm:$0xff] }
 0x49f   : > { %11439 = vmatprep.subr.bf16.mxu0 %v11438_v44  ;;  %v11594_v42 = vpack.c.bf16 %v9298_v41, %v9297_v40 }
 0x4a2   : > { %11441 = vmatpush3.bf16.msra.mxu0 %v11438_v44  ;;  %v9300_v44 = vld [vmem:[%s14058_s8 + $0xe8] sm:$0xff] }
 0x4a3   : > { %11443 = vmatprep.subr.bf16.mxu0 %v11442_v47  ;;  %v11598_v45 = vpack.c.bf16 %v9300_v44, %v9299_v43 }
 0x4a6   : > { %11445 = vmatpush3.bf16.msra.mxu0 %v11442_v47  ;;  %v9302_v47 = vld [vmem:[%s14058_s8 + $0xf8] sm:$0xff] }
 0x4a7   : > { %11463 = vmatprep.subr.bf16.mxu0 %v11462_v50  ;;  %v11602_v48 = vpack.c.bf16 %v9302_v47, %v9301_v46 }
 0x4a9   : > { %10558 = vmatmul.mubr.msk.f32.vlgmr.msra.gmra.mrb[12].mxu0 %vm2204_vm5, %v13027_v27 }
 0x4aa   : > { %11465 = vmatpush3.bf16.msra.mxu0 %v11462_v50  ;;  %10595 = vmatprep.mubr.msk.f32.mxu0 %vm2204_vm5, %v13023_v24  ;;  %v9162_v50 = vld [vmem:[%s14057_s14] ss:$0 sm:$0xff] }
 0x4ab   : > { %11467 = vmatprep.subr.bf16.mxu0 %v11466_v52 }
 0x4ae   : > { %11469 = vmatpush3.bf16.msra.mxu0 %v11466_v52 }
 0x4af   : > { %11471 = vmatprep.subr.bf16.mxu0 %v11470_v55 }
 0x4b2   : > { %11473 = vmatpush3.bf16.msra.mxu0 %v11470_v55 }
 0x4b3   : > { %11475 = vmatprep.subr.bf16.mxu0 %v11474_v58 }
 0x4b6   : > { %11477 = vmatpush3.bf16.msra.mxu0 %v11474_v58 }
 0x4b7   : > { %11497 = vmatprep.subr.bf16.mxu0 %v11496_v61 }
 0x4b9   : > { %10596 = vmatmul.mubr.msk.f32.vlgmr.msra.gmra.mrb[14].mxu0 %vm2204_vm5, %v13027_v27 }
 0x4ba   : > { %11499 = vmatpush3.bf16.msra.mxu0 %v11496_v61  ;;  %10642 = vmatprep.mubr.msk.f32.mxu0 %vm2204_vm5, %v13023_v24 }
 0x4bb   : > { %11501 = vmatprep.subr.bf16.mxu0 %v11500_v0 }
 0x4be   : > { %11503 = vmatpush3.bf16.msra.mxu0 %v11500_v0 }
 0x4bf   : > { %11505 = vmatprep.subr.bf16.mxu0 %v11504_v4 }
 0x4c2   : > { %11507 = vmatpush3.bf16.msra.mxu0 %v11504_v4 }
 0x4c3   : > { %11509 = vmatprep.subr.bf16.mxu0 %v11508_v8 }
 0x4c6   : > { %11511 = vmatpush3.bf16.msra.mxu0 %v11508_v8  ;;  %v9210_v8 = vld [vmem:[%s12591_s24 + $0x1] ss:$0 sm:$0xff] }
 0x4c7   : > { %11529 = vmatprep.subr.bf16.mxu0 %v11528_v11 }
 0x4c9   : > { %10643 = vmatmul.mubr.msk.f32.vlgmr.msra.gmra.mrb[16].mxu0 %vm2204_vm5, %v13027_v27 }
 0x4ca   : > { %11531 = vmatpush3.bf16.msra.mxu0 %v11528_v11  ;;  %10680 = vmatprep.mubr.msk.f32.mxu0 %vm2204_vm5, %v13023_v24 }
 0x4cb   : > { %11533 = vmatprep.subr.bf16.mxu0 %v11532_v13 }
 0x4ce   : > { %11535 = vmatpush3.bf16.msra.mxu0 %v11532_v13  ;;  %v13145_v13 = vld [vmem:[%s14057_s14 + $0x2] ss:$0 sm:$0xff] }
 0x4cf   : > { %11537 = vmatprep.subr.bf16.mxu0 %v11536_v17 }
 0x4d2   : > { %11539 = vmatpush3.bf16.msra.mxu0 %v11536_v17 }
 0x4d3   : > { %11541 = vmatprep.subr.bf16.mxu0 %v11540_v19 }
 0x4d6   : > { %11543 = vmatpush3.bf16.msra.mxu0 %v11540_v19 }
 0x4d7   : > { %11559 = vmatprep.subr.bf16.mxu0 %v11558_v22 }
 0x4d9   : > { %10681 = vmatmul.mubr.msk.f32.vlgmr.msra.gmra.mrb[18].mxu0 %vm2204_vm5, %v13027_v27 }
 0x4da   : > { %11561 = vmatpush3.bf16.msra.mxu0 %v11558_v22  ;;  %10720 = vmatprep.mubr.msk.f32.mxu0 %vm2204_vm5, %v13023_v24 }
 0x4db   : > { %11563 = vmatprep.subr.bf16.mxu0 %v11562_v30 }
 0x4de   : > { %11565 = vmatpush3.bf16.msra.mxu0 %v11562_v30 }
 0x4df   : > { %11567 = vmatprep.subr.bf16.mxu0 %v11566_v33 }
 0x4e2   : > { %11569 = vmatpush3.bf16.msra.mxu0 %v11566_v33 }
 0x4e3   : > { %11571 = vmatprep.subr.bf16.mxu0 %v11570_v36 }
 0x4e6   : > { %11573 = vmatpush3.bf16.msra.mxu0 %v11570_v36 }
 0x4e7   : > { %11591 = vmatprep.subr.bf16.mxu0 %v11590_v39 }
 0x4e9   : > { %10721 = vmatmul.mubr.msk.f32.vlgmr.msra.gmra.mrb[20].mxu0 %vm2204_vm5, %v13027_v27 }
 0x4ea   : > { %11593 = vmatpush3.bf16.msra.mxu0 %v11590_v39  ;;  %10758 = vmatprep.mubr.msk.f32.mxu0 %vm2204_vm5, %v13023_v24 }
 0x4eb   : > { %11595 = vmatprep.subr.bf16.mxu0 %v11594_v42 }
 0x4ee   : > { %11597 = vmatpush3.bf16.msra.mxu0 %v11594_v42 }
 0x4ef   : > { %11599 = vmatprep.subr.bf16.mxu0 %v11598_v45 }
 0x4f2   : > { %11601 = vmatpush3.bf16.msra.mxu0 %v11598_v45 }
 0x4f3   : > { %11603 = vmatprep.subr.bf16.mxu0 %v11602_v48 }
 0x4f6   : > { %11605 = vmatpush3.bf16.msra.mxu0 %v11602_v48 }
 0x4f9   : > { %10759 = vmatmul.mubr.msk.f32.vlgmr.msra.gmra.mrb[22].mxu0 %vm2204_vm5, %v13027_v27 }
 0x4fa   : > { %5344 = vmatprep.mubr.f32.mxu0 %v12518_v6 }
 0x55c   : > { %v10488_v51 = vpop.f32.mrb[8].mxu0  ;;  %v10507_v28 = vpop.f32.mrb[18].mxu1 }
 0x55d   : > { %v3161_v52 = vadd.f32 %v10507_v28, %v9165_v49  ;;  %v3065_v53 = vpop.f32.mrb[9].mxu0  ;;  %v3155_v54 = vpop.f32.mrb[19].mxu1  ;;  %v3071_v59 = vadd.f32 %v10488_v51, %v9162_v50 }
 0x55e   : > { %v3066_v55 = vadd.f32 %v9162_v50, %v3065_v53  ;;  %v3156_v56 = vadd.f32 %v9165_v49, %v3155_v54  ;;  %v9189_v53 = vld [vmem:[%s14060_s3 + $0x40] sm:$0xff]  ;;  %v9190_v54 = vld [vmem:[%s14060_s3 + $0x48] sm:$0xff] }
 0x560   : > { %v11420_v58 = vpack.c.bf16 %v3161_v52, %v3156_v56  ;;  %10531 = vmatprep.mubr.msk.f32.mxu1 %vm3254_vm10, %v3066_v55  ;;  %v11446_v55 = vpack.c.bf16 %v9190_v54, %v9189_v53 }
 0x562   : > { %11422 = vmatprep.subr.msk.bf16.mxu1 %vm13122_vm11, %v11420_v58 }
 0x563   : > { %11425 = vmatpush3.bf16.xpose.msk.msra.mxu1 %vm13122_vm11, %v11420_v58 }
 0x56a   : > { %10532 = vmatmul.mubr.msk.f32.vlgmr.msra.gmra.mrb[20].mxu1 %vm3254_vm10, %v3071_v59 }
 0x56c   : > { %v10526_v61 = vpop.f32.mrb[10].mxu0 }
 0x56d   : > { %v3251_v62 = vadd.f32 %v10526_v61, %v9168_v60  ;;  %v3245_v63 = vpop.f32.mrb[11].mxu0  ;;  %v9191_v61 = vld [vmem:[%s14060_s3 + $0x50] sm:$0xff] }
 0x56e   : > { %v3246_v0 = vadd.f32 %v9168_v60, %v3245_v63 }
 0x570   : > { %v11426_v1 = vpack.c.bf16 %v3251_v62, %v3246_v0  ;;  %v9192_v62 = vld [vmem:[%s14060_s3 + $0x58] sm:$0xff] }
 0x572   : > { %11427 = vmatprep.subr.bf16.mxu1 %v11426_v1 }
 0x573   : > { %11429 = vmatpush3.bf16.msra.mxu1 %v11426_v1  ;;  %v11450_v1 = vpack.c.bf16 %v9192_v62, %v9191_v61 }
 0x574   : > { %11447 = vmatprep.subr.bf16.mxu1 %v11446_v55 }
 0x57c   : > { %v10559_v4 = vpop.f32.mrb[12].mxu0 }
 0x57d   : > { %v13137_v5 = vadd.f32 %v10559_v4, %v13134_v3  ;;  %v13139_v7 = vpop.f32.mrb[13].mxu0  ;;  %v9193_v4 = vld [vmem:[%s14060_s3 + $0x60] sm:$0xff] }
 0x58c   : > { %v10597_v9 = vpop.f32.mrb[14].mxu0 }
 0x58d   : > { %v3722_v10 = vadd.f32 %v10597_v9, %v9210_v8  ;;  %v3716_v11 = vpop.f32.mrb[15].mxu0 }
 0x58e   : > { %v3717_v12 = vadd.f32 %v9210_v8, %v3716_v11  ;;  %v9194_v8 = vld [vmem:[%s14060_s3 + $0x68] sm:$0xff]  ;;  %v9196_v11 = vld [vmem:[%s14060_s3 + $0x78] sm:$0xff] }
 0x58f   : > { %v11454_v9 = vpack.c.bf16 %v9194_v8, %v9193_v4  ;;  %v9241_v8 = vld [vmem:[%s14060_s3 + $0xa0] sm:$0xff] }
 0x590   : > { %v13142_v14 = vpack.c.bf16 %v3722_v10, %v3717_v12  ;;  %v9195_v10 = vld [vmem:[%s14060_s3 + $0x70] sm:$0xff] }
 0x591   : > { %v11458_v12 = vpack.c.bf16 %v9196_v11, %v9195_v10  ;;  %v9243_v11 = vld [vmem:[%s14060_s3 + $0xb0] sm:$0xff] }
 0x59c   : > { %v10644_v15 = vpop.f32.mrb[16].mxu0 }
 0x59d   : > { %v13148_v16 = vadd.f32 %v10644_v15, %v13145_v13  ;;  %v13150_v17 = vpop.f32.mrb[17].mxu0  ;;  %v3533_v15 = vadd.f32 %v13134_v3, %v13139_v7 }
 0x5ac   : > { %v10682_v2 = vpop.f32.mrb[18].mxu0 }
 0x5ad   : > { %v4355_v19 = vadd.f32 %v10682_v2, %v9258_v18  ;;  %v4349_v20 = vpop.f32.mrb[19].mxu0 }
 0x5ae   : > { %v4350_v21 = vadd.f32 %v9258_v18, %v4349_v20 }
 0x5b0   : > { %v13153_v22 = vpack.c.bf16 %v4355_v19, %v4350_v21  ;;  %v9198_v19 = vld [vmem:[%s14056_s19 + $0x1] ss:$0 sm:$0xff] }
 0x5bc   : > { %v10722_v29 = vpop.f32.mrb[20].mxu0 }
 0x5bd   : > { %v13159_v30 = vadd.f32 %v10722_v29, %v13156_v23  ;;  %v13161_v31 = vpop.f32.mrb[21].mxu0 }
 0x5cc   : > { %v10760_v33 = vpop.f32.mrb[22].mxu0 }
 0x5cd   : > { %v4909_v34 = vadd.f32 %v10760_v33, %v9304_v32  ;;  %v4903_v35 = vpop.f32.mrb[23].mxu0 }
 0x5ce   : > { %v4904_v36 = vadd.f32 %v9304_v32, %v4903_v35 }
 0x5d0   : > { %v13164_v37 = vpack.c.bf16 %v4909_v34, %v4904_v36 }
 0x63d   : > { %v10533_v38 = vpop.f32.mrb[20].mxu1 }
 0x63e   : > { %v3333_v39 = vpop.f32.mrb[21].mxu1  ;;  %v3343_v41 = vmul.f32 0.25, %v10533_v38 }
 0x63f   : > { %v3342_v40 = vmul.f32 0.25, %v3333_v39 }
 0x640   : > { %v3347_v43 = vsel %vm3254_vm10, %v3343_v41, -inf }
 0x641   : > { %v3344_v42 = vsel %vm3254_vm10, %v3342_v40, -inf }
 0x642   : > { %3345 = vmax.xlane.f32.xlu0 %v3344_v42 }
 0x646   : > { %3348 = vmax.xlane.f32.xlu0 %v3347_v43 }
 0x6cf   : > { %v3346_v44 = vpop.xlane.xlu0 %3345 }
 0x6d0   : > { %v3350_v45 = vsub.f32 %v3342_v40, %v3346_v44 }
 0x6d2   : > { %v3352_v46 = vmul.f32 1.442695, %v3350_v45 }
 0x6d3   : > { %v3349_v47 = vpop.xlane.xlu0 %3348 }
 0x6d4   : > { %12232 = vpow2.f32 %v3352_v46  ;;  %v3351_v48 = vsub.f32 %v3343_v41, %v3349_v47  ;;  %v9219_v47 = vld [vmem:[%s12596_s30 + $0x10] sm:$0xff] }
 0x6d6   : > { %v3354_v49 = vmul.f32 1.442695, %v3351_v48  ;;  %v9220_v48 = vld [vmem:[%s12596_s30 + $0x18] sm:$0xff] }
 0x6d8   : > { %12234 = vpow2.f32 %v3354_v49  ;;  %v11488_v49 = vpack.c.bf16 %v9220_v48, %v9219_v47 }
 0x6de   : > { %v12233_v50 = vpop.eup %12232 }
 0x6df   : > { %v3356_v51 = vsel %vm3254_vm10, %v12233_v50, 0.0 }
 0x6e0   : > { %3357 = vadd.xlane.f32.xlu1 %v3356_v51 }
 0x6e2   : > { %v12235_v28 = vpop.eup %12234 }
 0x6e3   : > { %v3359_v52 = vsel %vm3254_vm10, %v12235_v28, 0.0 }
 0x6e4   : > { %3360 = vadd.xlane.f32.xlu1 %v3359_v52 }
 0x76d   : > { %v3358_v56 = vpop.xlane.xlu1 %3357 }
 0x76e   : > { %12236 = vrcp.f32 %v3358_v56  ;;  %v3448_v56 = vld [vmem:[%s12596_s30 + $0x8] sm:$0xff] }
 0x771   : > { %v3361_v58 = vpop.xlane.xlu1 %3360 }
 0x772   : > { %12238 = vrcp.f32 %v3361_v58 }
 0x778   : > { %v12237_v59 = vpop.eup %12236 }
 0x779   : > { %v3363_v60 = vmul.f32 %v12237_v59, %v12233_v50  ;;  %v9237_v59 = vld [vmem:[%s14060_s3 + $0x80] sm:$0xff] }
 0x77b   : > { %10538 = vmatprep.mubr.msk.f32.mxu1 %vm3254_vm10, %v3363_v60  ;;  %v9238_v60 = vld [vmem:[%s14060_s3 + $0x88] sm:$0xff] }
 0x77c   : > { %v12239_v63 = vpop.eup %12238 }
 0x77d   : > { %v3365_v0 = vmul.f32 %v12239_v63, %v12235_v28  ;;  %v11512_v63 = vpack.c.bf16 %v9238_v60, %v9237_v59  ;;  %v9287_v59 = vld [vmem:[%s14060_s3 + $0xe0] sm:$0xff]  ;;  %v9288_v60 = vld [vmem:[%s14060_s3 + $0xe8] sm:$0xff] }
 0x77f   : > { %10539 = vmatmul.mubr.msk.f32.vlgmr.msra.gmra.mrb[22].mxu1 %vm3254_vm10, %v3365_v0  ;;  %v9239_v0 = vld [vmem:[%s14060_s3 + $0x90] sm:$0xff] }
 0x780   : > { %11449 = vmatpush3.bf16.msra.mxu1 %v11446_v55  ;;  %10576 = vmatprep.mubr.msk.f32.mxu1 %vm2204_vm5, %v13023_v24  ;;  %v3447_v55 = vld [vmem:[%s12596_s30] sm:$0xff] }
 0x781   : > { %11451 = vmatprep.subr.bf16.mxu1 %v11450_v1  ;;  %v11492_v58 = vpack.c.bf16 %v3448_v56, %v3447_v55 }
 0x784   : > { %11453 = vmatpush3.bf16.msra.mxu1 %v11450_v1  ;;  %v9240_v1 = vld [vmem:[%s14060_s3 + $0x98] sm:$0xff] }
 0x785   : > { %11455 = vmatprep.subr.bf16.mxu1 %v11454_v9  ;;  %v11516_v4 = vpack.c.bf16 %v9240_v1, %v9239_v0  ;;  %v4720_v1 = vadd.f32 %v13156_v23, %v13161_v31 }
 0x788   : > { %11457 = vmatpush3.bf16.msra.mxu1 %v11454_v9  ;;  %v9242_v9 = vld [vmem:[%s14060_s3 + $0xa8] sm:$0xff] }
 0x789   : > { %11459 = vmatprep.subr.bf16.mxu1 %v11458_v12  ;;  %v11520_v10 = vpack.c.bf16 %v9242_v9, %v9241_v8 }
 0x78c   : > { %11461 = vmatpush3.bf16.msra.mxu1 %v11458_v12  ;;  %v9244_v12 = vld [vmem:[%s14060_s3 + $0xb8] sm:$0xff] }
 0x78f   : > { %10577 = vmatmul.mubr.msk.f32.vlgmr.msra.gmra.mrb[24].mxu1 %vm2204_vm5, %v13027_v27 }
 0x790   : > { %10602 = vmatprep.mubr.msk.f32.mxu1 %vm3254_vm10, %v3533_v15  ;;  %v11524_v15 = vpack.c.bf16 %v9244_v12, %v9243_v11 }
 0x852   : > { %v13187_v18 = vpop.f32.mrb[22].mxu1 }
 0x853   : > { %v3438_v2 = vpop.f32.mrb[23].mxu1 }
 0x862   : > { %v10578_v20 = vpop.f32.mrb[24].mxu1 }
 0x863   : > { %v3630_v21 = vadd.f32 %v10578_v20, %v9198_v19  ;;  %v3624_v29 = vpop.f32.mrb[25].mxu1 }
 0x864   : > { %v3625_v32 = vadd.f32 %v9198_v19, %v3624_v29 }
 0x866   : > { %v11478_v33 = vpack.c.bf16 %v3630_v21, %v3625_v32 }
 0x868   : > { %11480 = vmatprep.subr.msk.bf16.mxu1 %vm13122_vm11, %v11478_v33 }
 0x869   : > { %11483 = vmatpush3.bf16.xpose.msk.msra.mxu1 %vm13122_vm11, %v11478_v33 }
 0x86a   : > { %11485 = vmatprep.subr.bf16.mxu1 %v13142_v14 }
 0x870   : > { %10603 = vmatmul.mubr.msk.f32.vlgmr.msra.gmra.mrb[26].mxu1 %vm3254_vm10, %v13137_v5 }
 0x871   : > { %11487 = vmatpush3.bf16.msra.mxu1 %v13142_v14 }
 0x872   : > { %11489 = vmatprep.subr.bf16.mxu1 %v11488_v49 }
 0x943   : > { %v10604_v3 = vpop.f32.mrb[26].mxu1 }
 0x944   : > { %v3813_v7 = vmul.f32 0.25, %v10604_v3  ;;  %v3803_v34 = vpop.f32.mrb[27].mxu1 }
 0x945   : > { %v3812_v35 = vmul.f32 0.25, %v3803_v34 }
 0x946   : > { %v3817_v36 = vsel %vm3254_vm10, %v3813_v7, -inf }
 0x947   : > { %3818 = vmax.xlane.f32.xlu1 %v3817_v36  ;;  %v3814_v38 = vsel %vm3254_vm10, %v3812_v35, -inf }
 0x948   : > { %3815 = vmax.xlane.f32.xlu0 %v3814_v38 }
 0x9d4   : > { %v3819_v39 = vpop.xlane.xlu1 %3818 }
 0x9d5   : > { %v3821_v40 = vsub.f32 %v3813_v7, %v3819_v39  ;;  %v3816_v41 = vpop.xlane.xlu0 %3815 }
 0x9d6   : > { %v3820_v42 = vsub.f32 %v3812_v35, %v3816_v41 }
 0x9d7   : > { %v3824_v43 = vmul.f32 1.442695, %v3821_v40 }
 0x9d8   : > { %v3822_v5 = vmul.f32 1.442695, %v3820_v42 }
 0x9d9   : > { %12240 = vpow2.f32 %v3824_v43 }
 0x9da   : > { %12242 = vpow2.f32 %v3822_v5  ;;  %v9267_v5 = vld [vmem:[%s12596_s30 + $0x20] sm:$0xff] }
 0x9e3   : > { %v12241_v14 = vpop.eup %12240 }
 0x9e4   : > { %v12243_v44 = vpop.eup %12242  ;;  %v3829_v45 = vsel %vm3254_vm10, %v12241_v14, 0.0 }
 0x9e5   : > { %3830 = vadd.xlane.f32.xlu1 %v3829_v45  ;;  %v3826_v46 = vsel %vm3254_vm10, %v12243_v44, 0.0 }
 0x9e6   : > { %3827 = vadd.xlane.f32.xlu0 %v3826_v46 }
 0xa72   : > { %v3831_v50 = vpop.xlane.xlu1 %3830 }
 0xa73   : > { %12244 = vrcp.f32 %v3831_v50  ;;  %v3828_v51 = vpop.xlane.xlu0 %3827 }
 0xa74   : > { %12246 = vrcp.f32 %v3828_v51  ;;  %v9283_v51 = vld [vmem:[%s14060_s3 + $0xc0] sm:$0xff] }
 0xa7d   : > { %v12245_v28 = vpop.eup %12244 }
 0xa7e   : > { %v12247_v52 = vpop.eup %12246  ;;  %v3835_v54 = vmul.f32 %v12245_v28, %v12241_v14  ;;  %v9268_v14 = vld [vmem:[%s12596_s30 + $0x28] sm:$0xff] }
 0xa7f   : > { %v3833_v53 = vmul.f32 %v12247_v52, %v12243_v44  ;;  %v11554_v44 = vpack.c.bf16 %v9268_v14, %v9267_v5  ;;  %v9284_v28 = vld [vmem:[%s14060_s3 + $0xc8] sm:$0xff] }
 0xa80   : > { %v11574_v52 = vpack.c.bf16 %v9284_v28, %v9283_v51 }
 0xa81   : > { %10609 = vmatprep.mubr.msk.f32.mxu1 %vm3254_vm10, %v3833_v53  ;;  %v9285_v53 = vld [vmem:[%s14060_s3 + $0xd0] sm:$0xff] }
 0xa82   : > { %10610 = vmatmul.mubr.msk.f32.vlgmr.msra.gmra.mrb[28].mxu1 %vm3254_vm10, %v3835_v54  ;;  %v9286_v54 = vld [vmem:[%s14060_s3 + $0xd8] sm:$0xff] }
 0xa83   : > { %11491 = vmatpush3.bf16.msra.mxu1 %v11488_v49 }
 0xa84   : > { %11493 = vmatprep.subr.bf16.mxu1 %v11492_v58 }
 0xb55   : > { %v10611_v61 = vpop.f32.mrb[28].mxu1 }
 0xb56   : > { %v3908_v62 = vpop.f32.mrb[29].mxu1 }
 0xb57   : > { %10616 = vmatprep.mubr.msk.f32.mxu1 %vm3254_vm10, %v3908_v62  ;;  %v9289_v62 = vld [vmem:[%s14060_s3 + $0xf0] sm:$0xff] }
 0xb58   : > { %10617 = vmatmul.mubr.msk.f32.vlgmr.msra.gmra.mrb[30].mxu1 %vm3254_vm10, %v10611_v61  ;;  %v11582_v61 = vpack.c.bf16 %v9288_v60, %v9287_v59  ;;  %v5249_v59 = vld [vmem:[%s14071_s18 + $0x18] sm:$0xff] }
 0xb59   : > { %10623 = vmatprep.mubr.msk.f32.mxu1 %vm3254_vm10, %v3438_v2  ;;  %11495 = vmatpush3.bf16.msra.mxu1 %v11492_v58  ;;  %v4166_v2 = vadd.f32 %v13145_v13, %v13150_v17  ;;  %v11578_v58 = vpack.c.bf16 %v9286_v54, %v9285_v53 }
 0xb5a   : > { %11513 = vmatprep.subr.bf16.mxu1 %v11512_v63 }
 0xb60   : > { %10624 = vmatmul.mubr.msk.f32.vlgmr.msra.gmra.mrb[30].mxu1 %vm3254_vm10, %v13187_v18  ;;  %v9246_v18 = vld [vmem:[%s14056_s19 + $0x2] ss:$0 sm:$0xff] }
 0xb61   : > { %11515 = vmatpush3.bf16.msra.mxu1 %v11512_v63  ;;  %10661 = vmatprep.mubr.msk.f32.mxu1 %vm2204_vm5, %v13023_v24  ;;  %v9290_v63 = vld [vmem:[%s14060_s3 + $0xf8] sm:$0xff] }
 0xb62   : > { %11517 = vmatprep.subr.bf16.mxu1 %v11516_v4  ;;  %v11586_v0 = vpack.c.bf16 %v9290_v63, %v9289_v62  ;;  %v5248_v62 = vld [vmem:[%s14071_s18 + $0x10] sm:$0xff] }
 0xb65   : > { %11519 = vmatpush3.bf16.msra.mxu1 %v11516_v4  ;;  %v9292_v4 = vld [vmem:[%s14056_s19 + $0x3] ss:$0 sm:$0xff] }
 0xb66   : > { %11521 = vmatprep.subr.bf16.mxu1 %v11520_v10 }
 0xb69   : > { %11523 = vmatpush3.bf16.msra.mxu1 %v11520_v10 }
 0xb6a   : > { %11525 = vmatprep.subr.bf16.mxu1 %v11524_v15 }
 0xb6d   : > { %11527 = vmatpush3.bf16.msra.mxu1 %v11524_v15 }
 0xb70   : > { %10662 = vmatmul.mubr.msk.f32.vlgmr.msra.gmra.mrb[32].mxu1 %vm2204_vm5, %v13027_v27 }
 0xb71   : > { %10687 = vmatprep.mubr.msk.f32.mxu1 %vm3254_vm10, %v4166_v2 }
 0xc43   : > { %v10663_v19 = vpop.f32.mrb[32].mxu1 }
 0xc44   : > { %v4263_v20 = vadd.f32 %v10663_v19, %v9246_v18  ;;  %v4257_v21 = vpop.f32.mrb[33].mxu1 }
 0xc45   : > { %v4258_v29 = vadd.f32 %v9246_v18, %v4257_v21 }
 0xc47   : > { %v11544_v32 = vpack.c.bf16 %v4263_v20, %v4258_v29 }
 0xc49   : > { %11546 = vmatprep.subr.msk.bf16.mxu1 %vm13122_vm11, %v11544_v32 }
 0xc4a   : > { %11549 = vmatpush3.bf16.xpose.msk.msra.mxu1 %vm13122_vm11, %v11544_v32 }
 0xc4b   : > { %11551 = vmatprep.subr.bf16.mxu1 %v13153_v22 }
 0xc51   : > { %10688 = vmatmul.mubr.msk.f32.vlgmr.msra.gmra.mrb[34].mxu1 %vm3254_vm10, %v13148_v16 }
 0xc52   : > { %11553 = vmatpush3.bf16.msra.mxu1 %v13153_v22 }
 0xc53   : > { %11555 = vmatprep.subr.bf16.mxu1 %v11554_v44 }
 0xd24   : > { %v10689_v13 = vpop.f32.mrb[34].mxu1 }
 0xd25   : > { %v4446_v17 = vmul.f32 0.25, %v10689_v13  ;;  %v4436_v33 = vpop.f32.mrb[35].mxu1 }
 0xd26   : > { %v4445_v3 = vmul.f32 0.25, %v4436_v33 }
 0xd27   : > { %v4450_v7 = vsel %vm3254_vm10, %v4446_v17, -inf }
 0xd28   : > { %4451 = vmax.xlane.f32.xlu1 %v4450_v7  ;;  %v4447_v34 = vsel %vm3254_vm10, %v4445_v3, -inf  ;;  %v9313_v7 = vld [vmem:[%s12596_s30 + $0x30] sm:$0xff] }
 0xd29   : > { %4448 = vmax.xlane.f32.xlu0 %v4447_v34  ;;  %v9314_v34 = vld [vmem:[%s12596_s30 + $0x38] sm:$0xff] }
 0xdb5   : > { %v4452_v35 = vpop.xlane.xlu1 %4451 }
 0xdb6   : > { %v4454_v36 = vsub.f32 %v4446_v17, %v4452_v35  ;;  %v4449_v38 = vpop.xlane.xlu0 %4448  ;;  %v11616_v35 = vpack.c.bf16 %v9314_v34, %v9313_v7  ;;  %v5380_v7 = vld [vmem:[%s14072_s7 + $0x98] sm:$0xff] }
 0xdb7   : > { %v4453_v39 = vsub.f32 %v4445_v3, %v4449_v38 }
 0xdb8   : > { %v4457_v40 = vmul.f32 1.442695, %v4454_v36 }
 0xdb9   : > { %v4455_v16 = vmul.f32 1.442695, %v4453_v39 }
 0xdba   : > { %12248 = vpow2.f32 %v4457_v40 }
 0xdbb   : > { %12250 = vpow2.f32 %v4455_v16 }
 0xdc4   : > { %v12249_v22 = vpop.eup %12248 }
 0xdc5   : > { %v12251_v41 = vpop.eup %12250  ;;  %v4462_v42 = vsel %vm3254_vm10, %v12249_v22, 0.0 }
 0xdc6   : > { %4463 = vadd.xlane.f32.xlu1 %v4462_v42  ;;  %v4459_v43 = vsel %vm3254_vm10, %v12251_v41, 0.0 }
 0xdc7   : > { %4460 = vadd.xlane.f32.xlu0 %v4459_v43  ;;  %v9317_v43 = vld [vmem:[%s14059_s6] ss:$0 sm:$0xff] }
 0xe53   : > { %v4464_v45 = vpop.xlane.xlu1 %4463 }
 0xe54   : > { %12252 = vrcp.f32 %v4464_v45  ;;  %v4461_v46 = vpop.xlane.xlu0 %4460 }
 0xe55   : > { %12254 = vrcp.f32 %v4461_v46 }
 0xe5e   : > { %v12253_v47 = vpop.eup %12252 }
 0xe5f   : > { %v12255_v48 = vpop.eup %12254  ;;  %v4468_v50 = vmul.f32 %v12253_v47, %v12249_v22 }
 0xe60   : > { %v4466_v49 = vmul.f32 %v12255_v48, %v12251_v41 }
 0xe62   : > { %10694 = vmatprep.mubr.msk.f32.mxu1 %vm3254_vm10, %v4466_v49 }
 0xe63   : > { %10695 = vmatmul.mubr.msk.f32.vlgmr.msra.gmra.mrb[36].mxu1 %vm3254_vm10, %v4468_v50 }
 0xe64   : > { %11557 = vmatpush3.bf16.msra.mxu1 %v11554_v44 }
 0xe65   : > { %11575 = vmatprep.subr.bf16.mxu1 %v11574_v52 }
 0xf36   : > { %v10696_v55 = vpop.f32.mrb[36].mxu1 }
 0xf37   : > { %v4541_v56 = vpop.f32.mrb[37].mxu1 }
 0xf38   : > { %10701 = vmatprep.mubr.msk.f32.mxu1 %vm3254_vm10, %v4541_v56 }
 0xf39   : > { %10702 = vmatmul.mubr.msk.f32.vlgmr.msra.gmra.mrb[30].mxu1 %vm3254_vm10, %v10696_v55 }
 0xf3a   : > { %11577 = vmatpush3.bf16.msra.mxu1 %v11574_v52  ;;  %10739 = vmatprep.mubr.msk.f32.mxu1 %vm2204_vm5, %v13023_v24 }
 0xf3b   : > { %11579 = vmatprep.subr.bf16.mxu1 %v11578_v58 }
 0xf3e   : > { %11581 = vmatpush3.bf16.msra.mxu1 %v11578_v58  ;;  %v5247_v58 = vld [vmem:[%s14071_s18 + $0x8] sm:$0xff] }
 0xf3f   : > { %11583 = vmatprep.subr.bf16.mxu1 %v11582_v61  ;;  %v11620_v60 = vpack.c.bf16 %v5249_v59, %v5247_v58  ;;  %v5372_v58 = vld [vmem:[%s14072_s7 + $0x58] sm:$0xff]  ;;  %v5389_v59 = vld [vmem:[%s14072_s7 + $0xe0] sm:$0xff] }
 0xf41   : > { %11621 = vmatprep.subr.bf16.mxu0 %v11620_v60  ;;  %v5390_v60 = vld [vmem:[%s14072_s7 + $0xe8] sm:$0xff] }
 0xf42   : > { %11585 = vmatpush3.bf16.msra.mxu1 %v11582_v61  ;;  %v5246_v61 = vld [vmem:[%s14071_s18] sm:$0xff] }
 0xf43   : > { %11587 = vmatprep.subr.bf16.mxu1 %v11586_v0  ;;  %v11622_v63 = vpack.c.bf16 %v5248_v62, %v5246_v61  ;;  %v11660_v62 = vpack.c.bf16 %v5390_v60, %v5389_v59 }
 0xf45   : > { %11623 = vmatpush1.bf16.msra.mxu0 %v11622_v63 }
 0xf46   : > { %11589 = vmatpush3.bf16.msra.mxu1 %v11586_v0  ;;  %v5251_v0 = vld [vmem:[%s14071_s18 + $0x28] sm:$0xff] }
 0xf49   : > { %10740 = vmatmul.mubr.msk.f32.vlgmr.msra.gmra.mrb[38].mxu1 %vm2204_vm5, %v13027_v27 }
 0xf4a   : > { %10765 = vmatprep.mubr.msk.f32.mxu1 %vm3254_vm10, %v4720_v1  ;;  %v5253_v1 = vld [vmem:[%s14071_s18 + $0x38] sm:$0xff] }
0x101c   : > { %v10741_v8 = vpop.f32.mrb[38].mxu1 }
0x101d   : > { %v4817_v9 = vadd.f32 %v10741_v8, %v9292_v4  ;;  %v4811_v10 = vpop.f32.mrb[39].mxu1  ;;  %v5250_v8 = vld [vmem:[%s14071_s18 + $0x20] sm:$0xff] }
0x101e   : > { %v4812_v11 = vadd.f32 %v9292_v4, %v4811_v10  ;;  %v11624_v4 = vpack.c.bf16 %v5253_v1, %v5251_v0 }
0x1020   : > { %v11606_v12 = vpack.c.bf16 %v4817_v9, %v4812_v11  ;;  %v5252_v9 = vld [vmem:[%s14071_s18 + $0x30] sm:$0xff]  ;;  %11625 = vmatprep.subr.bf16.mxu0 %v11624_v4  ;;  %v5255_v11 = vld [vmem:[%s14071_s18 + $0x48] sm:$0xff] }
0x1021   : > { %v11626_v10 = vpack.c.bf16 %v5252_v9, %v5250_v8 }
0x1022   : > { %11608 = vmatprep.subr.msk.bf16.mxu1 %vm13122_vm11, %v11606_v12 }
0x1023   : > { %11611 = vmatpush3.bf16.xpose.msk.msra.mxu1 %vm13122_vm11, %v11606_v12  ;;  %11627 = vmatpush1.bf16.msra.mxu0 %v11626_v10  ;;  %v5257_v12 = vld [vmem:[%s14071_s18 + $0x58] sm:$0xff] }
0x1024   : > { %11613 = vmatprep.subr.bf16.mxu1 %v13164_v37 }
0x102a   : > { %10766 = vmatmul.mubr.msk.f32.vlgmr.msra.gmra.mrb[40].mxu1 %vm3254_vm10, %v13159_v30 }
0x102b   : > { %11615 = vmatpush3.bf16.msra.mxu1 %v13164_v37 }
0x102c   : > { %11617 = vmatprep.subr.bf16.mxu1 %v11616_v35 }
0x10fd   : > { %v10767_v23 = vpop.f32.mrb[40].mxu1 }
0x10fe   : > { %v5000_v31 = vmul.f32 0.25, %v10767_v23  ;;  %v4990_v15 = vpop.f32.mrb[41].mxu1  ;;  %v11628_v23 = vpack.c.bf16 %v5257_v12, %v5255_v11  ;;  %v9318_v12 = vld [vmem:[%s14073_s10] ss:$0 sm:$0xff] }
0x10ff   : > { %v4999_v2 = vmul.f32 0.25, %v4990_v15  ;;  %v5256_v15 = vld [vmem:[%s14071_s18 + $0x50] sm:$0xff] }
0x1100   : > { %v5004_v18 = vsel %vm3254_vm10, %v5000_v31, -inf  ;;  %11629 = vmatprep.subr.bf16.mxu0 %v11628_v23 }
0x1101   : > { %5005 = vmax.xlane.f32.xlu1 %v5004_v18  ;;  %v5001_v19 = vsel %vm3254_vm10, %v4999_v2, -inf  ;;  %v5259_v18 = vld [vmem:[%s14071_s18 + $0x68] sm:$0xff] }
0x1102   : > { %5002 = vmax.xlane.f32.xlu0 %v5001_v19  ;;  %v5261_v19 = vld [vmem:[%s14071_s18 + $0x78] sm:$0xff] }
0x118e   : > { %v5006_v20 = vpop.xlane.xlu1 %5005 }
0x118f   : > { %v5008_v21 = vsub.f32 %v5000_v31, %v5006_v20  ;;  %v5003_v29 = vpop.xlane.xlu0 %5002  ;;  %v5254_v31 = vld [vmem:[%s14071_s18 + $0x40] sm:$0xff]  ;;  %v11632_v20 = vpack.c.bf16 %v5261_v19, %v5259_v18 }
0x1190   : > { %v5007_v32 = vsub.f32 %v4999_v2, %v5003_v29  ;;  %v11630_v2 = vpack.c.bf16 %v5256_v15, %v5254_v31  ;;  %v5260_v29 = vld [vmem:[%s14071_s18 + $0x70] sm:$0xff]  ;;  %v9319_v15 = vld [vmem:[%s14074_s1] ss:$0 sm:$0xff] }
0x1191   : > { %v5011_v13 = vmul.f32 1.442695, %v5008_v21  ;;  %v5258_v21 = vld [vmem:[%s14071_s18 + $0x60] sm:$0xff] }
0x1192   : > { %v5009_v30 = vmul.f32 1.442695, %v5007_v32  ;;  %11631 = vmatpush1.bf16.msra.mxu0 %v11630_v2  ;;  %v11634_v32 = vpack.c.bf16 %v5260_v29, %v5258_v21  ;;  %v5373_v21 = vld [vmem:[%s14072_s7 + $0x60] sm:$0xff]  ;;  %v5374_v29 = vld [vmem:[%s14072_s7 + $0x68] sm:$0xff] }
0x1193   : > { %12256 = vpow2.f32 %v5011_v13  ;;  %11633 = vmatprep.subr.bf16.mxu0 %v11632_v20  ;;  %v5377_v13 = vld [vmem:[%s14072_s7 + $0x80] sm:$0xff] }
0x1194   : > { %12258 = vpow2.f32 %v5009_v30  ;;  %v5378_v30 = vld [vmem:[%s14072_s7 + $0x88] sm:$0xff] }
0x1196   : > { %11635 = vmatpush1.bf16.msra.mxu0 %v11634_v32  ;;  %v11662_v32 = vpack.c.bf16 %v5374_v29, %v5373_v21  ;;  %v9329_v29 = vld [vmem:[%s12566_s29 + $0x120] sm:$0xff] }
0x119d   : > { %v12257_v37 = vpop.eup %12256 }
0x119e   : > { %v12259_v17 = vpop.eup %12258  ;;  %v5016_v33 = vsel %vm3254_vm10, %v12257_v37, 0.0 }
0x119f   : > { %5017 = vadd.xlane.f32.xlu1 %v5016_v33  ;;  %v5013_v3 = vsel %vm3254_vm10, %v12259_v17, 0.0  ;;  %v5362_v33 = vld [vmem:[%s14072_s7 + $0x8] sm:$0xff] }
0x11a0   : > { %5014 = vadd.xlane.f32.xlu0 %v5013_v3  ;;  %v5379_v3 = vld [vmem:[%s14072_s7 + $0x90] sm:$0xff] }
0x122c   : > { %v5018_v36 = vpop.xlane.xlu1 %5017 }
0x122d   : > { %12260 = vrcp.f32 %v5018_v36  ;;  %v5015_v38 = vpop.xlane.xlu0 %5014  ;;  %v5363_v36 = vld [vmem:[%s14072_s7 + $0x10] sm:$0xff] }
0x122e   : > { %12262 = vrcp.f32 %v5015_v38  ;;  %v5364_v38 = vld [vmem:[%s14072_s7 + $0x18] sm:$0xff] }
0x1237   : > { %v12261_v39 = vpop.eup %12260 }
0x1238   : > { %v12263_v40 = vpop.eup %12262  ;;  %v5022_v22 = vmul.f32 %v12261_v39, %v12257_v37  ;;  %v5361_v37 = vld [vmem:[%s14072_s7] sm:$0xff] }
0x1239   : > { %v5020_v16 = vmul.f32 %v12263_v40, %v12259_v17  ;;  %v11636_v17 = vpack.c.bf16 %v5378_v30, %v5377_v13  ;;  %v11638_v34 = vpack.c.bf16 %v5362_v33, %v5361_v37  ;;  %v5381_v39 = vld [vmem:[%s14072_s7 + $0xa0] sm:$0xff]  ;;  %v5382_v40 = vld [vmem:[%s14072_s7 + $0xa8] sm:$0xff]  ;;  %v5375_v30 = vld [vmem:[%s14072_s7 + $0x70] sm:$0xff]  ;;  %v5266_v33 = vsub.s32 0, %v12895_v25 }
0x123a   : > { %v5376_v37 = vld [vmem:[%s14072_s7 + $0x78] sm:$0xff] }
0x123b   : > { %10772 = vmatprep.mubr.msk.f32.mxu1 %vm3254_vm10, %v5020_v16  ;;  %v11642_v16 = vpack.c.bf16 %v5364_v38, %v5363_v36 }
0x123c   : > { %10773 = vmatmul.mubr.msk.f32.vlgmr.msra.gmra.mrb[42].mxu1 %vm3254_vm10, %v5022_v22  ;;  %v11644_v22 = vpack.c.bf16 %v5382_v40, %v5381_v39 }
0x123d   : > { %11619 = vmatpush3.bf16.msra.mxu1 %v11616_v35  ;;  %v11640_v35 = vpack.c.bf16 %v5380_v7, %v5379_v3  ;;  %v5262_v3 = vld [vmem:[%s14075_s5] sm:$0x3]  ;;  %v5270_v7 = vsub.s32 1, %v12895_v25 }
0x123e   : > { %11637 = vmatprep.subr.bf16.mxu1 %v11636_v17  ;;  %v11666_v17 = vpack.c.bf16 %v5376_v37, %v5375_v30  ;;  %v9331_v37 = vld [vmem:[%s12566_s29 + $0x130] sm:$0xff]  ;;  %v9567_v25 = vld [vmem:[%s14076_s9 + $0x1] ss:$0 sm:$0xff] }
0x130f   : > { %v10774_v41 = vpop.f32.mrb[42].mxu1 }
0x1310   : > { %v5095_v42 = vpop.f32.mrb[43].mxu1 }
0x1311   : > { %10779 = vmatprep.mubr.msk.f32.mxu1 %vm3254_vm10, %v5095_v42  ;;  %v5366_v42 = vld [vmem:[%s14072_s7 + $0x28] sm:$0xff] }
0x1312   : > { %10780 = vmatmul.mubr.msk.f32.vlgmr.msra.gmra.mrb[30].mxu1 %vm3254_vm10, %v10774_v41  ;;  %v5365_v41 = vld [vmem:[%s14072_s7 + $0x20] sm:$0xff] }
0x1313   : > { %11639 = vmatpush3.bf16.msra.mxu1 %v11638_v34  ;;  %v5267_v34 = vrot.slane %v5262_v3, %v5266_v33 }
0x1314   : > { %11641 = vmatprep.subr.bf16.mxu1 %v11640_v35  ;;  %v5271_v35 = vrot.slane %v5262_v3, %v5270_v7 }
0x1317   : > { %11643 = vmatpush3.bf16.msra.mxu1 %v11642_v16 }
0x1318   : > { %11645 = vmatprep.subr.bf16.mxu1 %v11644_v22 }
0x13e5   : > { %v10781_v5 = vpop.f32.mrb[30].mxu1 }
0x13e6   : > { %v5198_v14 = vadd.f32 %v10781_v5, %v9317_v43  ;;  %v5179_v44 = vpop.f32.mrb[31].mxu1  ;;  %v5384_v5 = vld [vmem:[%s14072_s7 + $0xb8] sm:$0xff] }
0x13e7   : > { %v5197_v45 = vadd.f32 %v9317_v43, %v5179_v44  ;;  %v5383_v43 = vld [vmem:[%s14072_s7 + $0xb0] sm:$0xff] }
0x13e8   : > { %v5200_v46 = vadd.f32 %v5198_v14, %v13027_v27  ;;  %v11646_v14 = vpack.c.bf16 %v5366_v42, %v5365_v41  ;;  %v11648_v44 = vpack.c.bf16 %v5384_v5, %v5383_v43 }
0x13e9   : > { %v5199_v47 = vadd.f32 %v5197_v45, %v13023_v24  ;;  %v5367_v45 = vld [vmem:[%s14072_s7 + $0x30] sm:$0xff] }
0x13ea   : > { %v5206_v48 = vsel %vm2204_vm5, %v5200_v46, 0.0  ;;  %11647 = vmatpush3.bf16.msra.mxu1 %v11646_v14 }
0x13eb   : > { %5207 = vadd.xlane.f32.xlu1 %v5206_v48  ;;  %v5203_v49 = vsel %vm2204_vm5, %v5199_v47, 0.0  ;;  %v5386_v48 = vld [vmem:[%s14072_s7 + $0xc8] sm:$0xff]  ;;  %11649 = vmatprep.subr.bf16.mxu1 %v11648_v44 }
0x13ec   : > { %5204 = vadd.xlane.f32.xlu0 %v5203_v49 }
0x1478   : > { %v5208_v50 = vpop.xlane.xlu1 %5207 }
0x1479   : > { %v5211_v51 = vmul.f32 0.015625, %v5208_v50  ;;  %v5205_v28 = vpop.xlane.xlu0 %5204 }
0x147a   : > { %v5210_v52 = vmul.f32 0.015625, %v5205_v28  ;;  %v5370_v28 = vld [vmem:[%s14072_s7 + $0x48] sm:$0xff] }
0x147b   : > { %v13286_v53 = vsub.f32 %v5200_v46, %v5211_v51  ;;  %v5368_v46 = vld [vmem:[%s14072_s7 + $0x38] sm:$0xff]  ;;  %v5369_v51 = vld [vmem:[%s14072_s7 + $0x40] sm:$0xff] }
0x147c   : > { %v13288_v27 = vsub.f32 %v5199_v47, %v5210_v52  ;;  %v5385_v47 = vld [vmem:[%s14072_s7 + $0xc0] sm:$0xff]  ;;  %v11650_v49 = vpack.c.bf16 %v5368_v46, %v5367_v45  ;;  %v5387_v52 = vld [vmem:[%s14072_s7 + $0xd0] sm:$0xff] }
0x147d   : > { %v5215_v24 = vmul.f32 %v13286_v53, %v13286_v53  ;;  %v11652_v50 = vpack.c.bf16 %v5386_v48, %v5385_v47  ;;  %v9322_v46 = vld [vmem:[%s14076_s9] ss:$0 sm:$0xff]  ;;  %s14088_s9 = sld [smem:[#allocation39_spill]] }
0x147e   : > { %v5214_v54 = vmul.f32 %v13288_v27, %v13288_v27  ;;  %11651 = vmatpush3.bf16.msra.mxu1 %v11650_v49 }
0x147f   : > { %v5219_v55 = vsel %vm2204_vm5, %v5215_v24, 0.0  ;;  %v5388_v24 = vld [vmem:[%s14072_s7 + $0xd8] sm:$0xff]  ;;  %11653 = vmatprep.subr.bf16.mxu1 %v11652_v50 }
0x1480   : > { %5220 = vadd.xlane.f32.xlu1 %v5219_v55  ;;  %v5216_v56 = vsel %vm2204_vm5, %v5214_v54, 0.0  ;;  %v11654_v54 = vpack.c.bf16 %v5370_v28, %v5369_v51  ;;  %v11656_v55 = vpack.c.bf16 %v5388_v24, %v5387_v52 }
0x1481   : > { %5217 = vadd.xlane.f32.xlu0 %v5216_v56  ;;  %v5371_v56 = vld [vmem:[%s14072_s7 + $0x50] sm:$0xff] }
0x1482   : > { %11655 = vmatpush3.bf16.msra.mxu1 %v11654_v54  ;;  %v11658_v61 = vpack.c.bf16 %v5372_v58, %v5371_v56 }
0x1483   : > { %11657 = vmatprep.subr.bf16.mxu1 %v11656_v55 }
0x1486   : > { %11659 = vmatpush3.bf16.msra.mxu1 %v11658_v61 }
0x1487   : > { %11661 = vmatprep.subr.bf16.mxu1 %v11660_v62 }
0x148a   : > { %11663 = vmatpush3.bf16.msra.mxu1 %v11662_v32  ;;  %v9330_v32 = vld [vmem:[%s12566_s29 + $0x128] sm:$0xff] }
0x150d   : > { %v5221_v63 = vpop.xlane.xlu1 %5220 }
0x150e   : > { %v5223_v0 = vmul.f32 0.015625, %v5221_v63  ;;  %v5218_v1 = vpop.xlane.xlu0 %5217 }
0x150f   : > { %v5222_v4 = vmul.f32 0.015625, %v5218_v1 }
0x1510   : > { %v5225_v8 = vadd.f32 1e-05, %v5223_v0 }
0x1511   : > { %v5224_v9 = vadd.f32 1e-05, %v5222_v4 }
0x1512   : > { %12264 = vrsqrt.f32 %v5225_v8 }
0x1513   : > { %12266 = vrsqrt.f32 %v5224_v9  ;;  %v9325_v9 = vld [vmem:[%s12566_s29 + $0x100] sm:$0xff] }
0x151c   : > { %v12265_v10 = vpop.eup %12264 }
0x151d   : > { %v12267_v11 = vpop.eup %12266  ;;  %v5229_v31 = vmul.f32 %v12265_v10, %v13286_v53  ;;  %v5392_v53 = vld [vmem:[%s14072_s7 + $0xf8] sm:$0xff]  ;;  %v9326_v10 = vld [vmem:[%s12566_s29 + $0x108] sm:$0xff] }
0x151e   : > { %v5228_v23 = vmul.f32 %v12267_v11, %v13288_v27  ;;  %v5391_v27 = vld [vmem:[%s14072_s7 + $0xf0] sm:$0xff]  ;;  %v11668_v11 = vpack.c.bf16 %v9326_v10, %v9325_v9 }
0x151f   : > { %v5237_v19 = vmul.f32 %v9318_v12, %v5229_v31  ;;  %v11664_v13 = vpack.c.bf16 %v5392_v53, %v5391_v27  ;;  %v11676_v27 = vpack.c.bf16 %v9330_v32, %v9329_v29  ;;  %v9353_v53 = vld [vmem:[%s14058_s8 + $0x120] sm:$0xff]  ;;  %v9371_v32 = vld [vmem:[%s12566_s29 + $0x150] sm:$0xff] }
0x1520   : > { %v5236_v2 = vmul.f32 %v9318_v12, %v5228_v23  ;;  %v9349_v12 = vld [vmem:[%s14058_s8 + $0x100] sm:$0xff]  ;;  %v9350_v23 = vld [vmem:[%s14058_s8 + $0x108] sm:$0xff]  ;;  %11669 = vmatprep.subr.bf16.mxu0 %v11668_v11 }
0x1521   : > { %v5245_v20 = vadd.f32 %v9319_v15, %v5237_v19  ;;  %11665 = vmatprep.subr.bf16.mxu1 %v11664_v13  ;;  %v11700_v31 = vpack.c.bf16 %v9350_v23, %v9349_v12  ;;  %v9351_v19 = vld [vmem:[%s14058_s8 + $0x110] sm:$0xff]  ;;  %v9354_v13 = vld [vmem:[%s14058_s8 + $0x128] sm:$0xff]  ;;  %v9346_v23 = vld [vmem:[%s14056_s19 + $0x4] ss:$0 sm:$0xff] }
0x1522   : > { %v5244_v18 = vadd.f32 %v9319_v15, %v5236_v2  ;;  %11667 = vmatpush3.bf16.msra.mxu1 %v11666_v17  ;;  %v9327_v15 = vld [vmem:[%s12566_s29 + $0x110] sm:$0xff]  ;;  %v9328_v2 = vld [vmem:[%s12566_s29 + $0x118] sm:$0xff]  ;;  %v11708_v30 = vpack.c.bf16 %v9354_v13, %v9353_v53 }
0x1523   : > { %11701 = vmatprep.subr.bf16.mxu1 %v11700_v31  ;;  %v9332_v17 = vld [vmem:[%s12566_s29 + $0x138] sm:$0xff] }
0x1524   : > { %9320 = vmatmul.mubr.msk.f32.vlgmr.msra.gmra.mrb[24].mxu0 %vm2204_vm5, %v5244_v18  ;;  %v11680_v3 = vpack.c.bf16 %v9332_v17, %v9331_v37  ;;  %v9374_v37 = vld [vmem:[%s12566_s29 + $0x168] sm:$0xff] }
0x1525   : > { %5350 = vmatprep.mubr.f32.mxu0 %v12518_v6  ;;  %11671 = vmatpush3.bf16.msra.mxu0 %v11668_v11 }
0x1528   : > { %9321 = vmatmul.mubr.msk.f32.gmra.mrb[26].mxu0 %vm2204_vm5, %v5245_v20 }
0x15f7   : > { %v5346_v36 = vpop.f32.mrb[24].mxu0 }
0x15f8   : > { %v5347_v38 = vadd.f32 %v5346_v36, %v5267_v34  ;;  %v5348_v39 = vpop.f32.mrb[25].mxu0 }
0x15f9   : > { %v5349_v40 = vadd.f32 %v5348_v39, %v5271_v35  ;;  %v9338_v39 = vld [vmem:[%s14060_s3 + $0x108] sm:$0xff] }
0x15fa   : > { %v5357_v41 = vmax.f32 %v5347_v38, 0.0  ;;  %v9337_v38 = vld [vmem:[%s14060_s3 + $0x100] sm:$0xff] }
0x15fb   : > { %v5358_v16 = vmax.f32 %v5349_v40, 0.0  ;;  %v5352_v22 = vpop.f32.mrb[26].mxu0  ;;  %v11684_v40 = vpack.c.bf16 %v9338_v39, %v9337_v38  ;;  %v9394_v38 = vld [vmem:[%s14058_s8 + $0x148] sm:$0xff] }
0x15fc   : > { %v5353_v42 = vadd.f32 %v5352_v22, %v5267_v34  ;;  %v5354_v43 = vpop.f32.mrb[27].mxu0  ;;  %v9355_v34 = vld [vmem:[%s14058_s8 + $0x130] sm:$0xff] }
0x15fd   : > { %v5355_v5 = vadd.f32 %v5354_v43, %v5271_v35  ;;  %5464 = vmatprep.mubr.f32.mxu1 %v5358_v16  ;;  %v9356_v35 = vld [vmem:[%s14058_s8 + $0x138] sm:$0xff] }
0x15fe   : > { %5465 = vmatmul.mubr.f32.vlgmr.msra.gmra.mrb[44].mxu1 %v5357_v41  ;;  %v5359_v44 = vmax.f32 %v5353_v42, 0.0  ;;  %v11712_v36 = vpack.c.bf16 %v9356_v35, %v9355_v34  ;;  %v9376_v34 = vld [vmem:[%s12566_s29 + $0x178] sm:$0xff] }
0x15ff   : > { %v5360_v14 = vmax.f32 %v5355_v5, 0.0  ;;  %11703 = vmatpush3.bf16.msra.mxu1 %v11700_v31 }
0x1601   : > { %5469 = vmatprep.mubr.f32.mxu1 %v5360_v14 }
0x1602   : > { %5470 = vmatmul.mubr.f32.gmra.mrb[46].mxu1 %v5359_v44  ;;  %v9323_v44 = vld [vmem:[%s14077_s13] ss:$0 sm:$0xff] }
0x16d1   : > { %v9941_v45 = vpop.f32.mrb[44].mxu1 }
0x16d2   : > { %v9942_v47 = vpop.f32.mrb[45].mxu1 }
0x16d3   : > { %v9943_v48 = vadd.f32 %v9942_v47, %v9941_v45 }
0x16d5   : > { %v5467_v49 = vadd.f32 %v9943_v48, %v9322_v46  ;;  %v9944_v50 = vpop.f32.mrb[46].mxu1 }
0x16d6   : > { %v9945_v51 = vpop.f32.mrb[47].mxu1 }
0x16d7   : > { %v9946_v28 = vadd.f32 %v9945_v51, %v9944_v50  ;;  %v5475_v52 = vadd.f32 %v5467_v49, %v5244_v18  ;;  %v11672_v18 = vpack.c.bf16 %v9328_v2, %v9327_v15  ;;  %v9339_v51 = vld [vmem:[%s14060_s3 + $0x110] sm:$0xff] }
0x16d9   : > { %v5472_v24 = vadd.f32 %v9946_v28, %v9322_v46  ;;  %v5479_v54 = vsel %vm2204_vm5, %v5475_v52, 0.0  ;;  %11673 = vmatprep.subr.bf16.mxu0 %v11672_v18  ;;  %v9324_v46 = vld [vmem:[%s14078_s17] ss:$0 sm:$0xff]  ;;  %v9340_v28 = vld [vmem:[%s14060_s3 + $0x118] sm:$0xff] }
0x16da   : > { %5480 = vadd.xlane.f32.xlu0 %v5479_v54  ;;  %11675 = vmatpush3.bf16.msra.mxu0 %v11672_v18  ;;  %v11688_v54 = vpack.c.bf16 %v9340_v28, %v9339_v51  ;;  %v9369_v18 = vld [vmem:[%s12566_s29 + $0x140] sm:$0xff] }
0x16db   : > { %v5476_v55 = vadd.f32 %v5472_v24, %v5245_v20  ;;  %v9352_v20 = vld [vmem:[%s14058_s8 + $0x118] sm:$0xff]  ;;  %11677 = vmatprep.subr.bf16.mxu0 %v11676_v27  ;;  %v9421_v28 = vld [vmem:[%s12566_s29 + $0x1a0] sm:$0xff] }
0x16dc   : > { %v11704_v21 = vpack.c.bf16 %v9352_v20, %v9351_v19  ;;  %v9370_v19 = vld [vmem:[%s12566_s29 + $0x148] sm:$0xff] }
0x16dd   : > { %v5482_v56 = vsel %vm2204_vm5, %v5476_v55, 0.0  ;;  %v11726_v29 = vpack.c.bf16 %v9370_v19, %v9369_v18  ;;  %v9467_v19 = vld [vmem:[%s12566_s29 + $0x1e0] sm:$0xff] }
0x16de   : > { %5483 = vadd.xlane.f32.xlu1 %v5482_v56  ;;  %11705 = vmatprep.subr.bf16.mxu1 %v11704_v21  ;;  %v9342_v56 = vld [vmem:[%s14060_s3 + $0x128] sm:$0xff] }
0x16df   : > { %11707 = vmatpush3.bf16.msra.mxu1 %v11704_v21  ;;  %11679 = vmatpush3.bf16.msra.mxu0 %v11676_v27  ;;  %v9372_v27 = vld [vmem:[%s12566_s29 + $0x158] sm:$0xff] }
0x16e0   : > { %11709 = vmatprep.subr.bf16.mxu1 %v11708_v30  ;;  %11681 = vmatprep.subr.bf16.mxu0 %v11680_v3  ;;  %v11730_v13 = vpack.c.bf16 %v9372_v27, %v9371_v32  ;;  %v9470_v32 = vld [vmem:[%s12566_s29 + $0x1f8] sm:$0xff] }
0x16e3   : > { %11711 = vmatpush3.bf16.msra.mxu1 %v11708_v30  ;;  %11683 = vmatpush3.bf16.msra.mxu0 %v11680_v3  ;;  %v9373_v30 = vld [vmem:[%s12566_s29 + $0x160] sm:$0xff]  ;;  %v9375_v3 = vld [vmem:[%s12566_s29 + $0x170] sm:$0xff] }
0x16e4   : > { %11713 = vmatprep.subr.bf16.mxu1 %v11712_v36  ;;  %11685 = vmatprep.subr.bf16.mxu0 %v11684_v40  ;;  %v11734_v17 = vpack.c.bf16 %v9374_v37, %v9373_v30  ;;  %v11738_v35 = vpack.c.bf16 %v9376_v34, %v9375_v3  ;;  %v9489_v37 = vld [vmem:[%s14058_s8 + $0x1d0] sm:$0xff]  ;;  %v9491_v34 = vld [vmem:[%s14058_s8 + $0x1e0] sm:$0xff] }
0x16e7   : > { %11715 = vmatpush3.bf16.msra.mxu1 %v11712_v36  ;;  %v9393_v36 = vld [vmem:[%s14058_s8 + $0x140] sm:$0xff] }
0x16e8   : > { %v11758_v39 = vpack.c.bf16 %v9394_v38, %v9393_v36  ;;  %v9493_v38 = vld [vmem:[%s14058_s8 + $0x1f0] sm:$0xff] }
0x1767   : > { %v5481_v58 = vpop.xlane.xlu0 %5480 }
0x1768   : > { %v5485_v59 = vmul.f32 0.015625, %v5481_v58 }
0x176a   : > { %v13361_v60 = vsub.f32 %v5475_v52, %v5485_v59  ;;  %v9343_v59 = vld [vmem:[%s14060_s3 + $0x130] sm:$0xff] }
0x176b   : > { %v5484_v61 = vpop.xlane.xlu1 %5483 }
0x176c   : > { %v5486_v62 = vmul.f32 0.015625, %v5484_v61  ;;  %v5489_v63 = vmul.f32 %v13361_v60, %v13361_v60 }
0x176e   : > { %v13365_v0 = vsub.f32 %v5476_v55, %v5486_v62  ;;  %v5491_v1 = vsel %vm2204_vm5, %v5489_v63, 0.0  ;;  %v9341_v55 = vld [vmem:[%s14060_s3 + $0x120] sm:$0xff] }
0x176f   : > { %5492 = vadd.xlane.f32.xlu0 %v5491_v1  ;;  %v11692_v58 = vpack.c.bf16 %v9342_v56, %v9341_v55  ;;  %v9358_v62 = vld [vmem:[%s12591_s24 + $0x4] ss:$0 sm:$0xff]  ;;  %v9423_v55 = vld [vmem:[%s12566_s29 + $0x1b0] sm:$0xff]  ;;  %v9424_v56 = vld [vmem:[%s12566_s29 + $0x1b8] sm:$0xff] }
0x1770   : > { %v5490_v4 = vmul.f32 %v13365_v0, %v13365_v0  ;;  %v9334_v63 = vld [vmem:[%s14057_s14 + $0x4] ss:$0 sm:$0xff] }
0x1772   : > { %v5494_v8 = vsel %vm2204_vm5, %v5490_v4, 0.0 }
0x1773   : > { %5495 = vadd.xlane.f32.xlu1 %v5494_v8 }
0x17fc   : > { %v5493_v16 = vpop.xlane.xlu0 %5492 }
0x17fd   : > { %v5497_v22 = vmul.f32 0.015625, %v5493_v16  ;;  %v9396_v16 = vld [vmem:[%s14058_s8 + $0x158] sm:$0xff] }
0x17ff   : > { %v5499_v41 = vadd.f32 1e-05, %v5497_v22 }
0x1800   : > { %v5496_v42 = vpop.xlane.xlu1 %5495 }
0x1801   : > { %12268 = vrsqrt.f32 %v5499_v41  ;;  %v5498_v43 = vmul.f32 0.015625, %v5496_v42  ;;  %v9397_v41 = vld [vmem:[%s14058_s8 + $0x160] sm:$0xff]  ;;  %v9398_v42 = vld [vmem:[%s14058_s8 + $0x168] sm:$0xff] }
0x1803   : > { %v5500_v5 = vadd.f32 1e-05, %v5498_v43  ;;  %v11766_v43 = vpack.c.bf16 %v9398_v42, %v9397_v41 }
0x1805   : > { %12270 = vrsqrt.f32 %v5500_v5  ;;  %v9399_v5 = vld [vmem:[%s14058_s8 + $0x170] sm:$0xff] }
0x180b   : > { %v12269_v14 = vpop.eup %12268 }
0x180c   : > { %v5503_v45 = vmul.f32 %v12269_v14, %v13361_v60  ;;  %v9344_v60 = vld [vmem:[%s14060_s3 + $0x138] sm:$0xff] }
0x180d   : > { %v11696_v61 = vpack.c.bf16 %v9344_v60, %v9343_v59  ;;  %v9400_v14 = vld [vmem:[%s14058_s8 + $0x178] sm:$0xff]  ;;  %v9441_v59 = vld [vmem:[%s14058_s8 + $0x180] sm:$0xff]  ;;  %v9442_v60 = vld [vmem:[%s14058_s8 + $0x188] sm:$0xff] }
0x180e   : > { %v5511_v47 = vmul.f32 %v9323_v44, %v5503_v45  ;;  %v9417_v45 = vld [vmem:[%s12566_s29 + $0x180] sm:$0xff] }
0x180f   : > { %v12271_v48 = vpop.eup %12270 }
0x1810   : > { %v13392_v49 = vadd.f32 %v9324_v46, %v5511_v47  ;;  %v5504_v50 = vmul.f32 %v12271_v48, %v13365_v0  ;;  %v9419_v48 = vld [vmem:[%s12566_s29 + $0x190] sm:$0xff] }
0x1812   : > { %v5512_v52 = vmul.f32 %v9323_v44, %v5504_v50  ;;  %10798 = vmatprep.mubr.msk.f32.mxu0 %vm2204_vm5, %v13392_v49  ;;  %10836 = vmatprep.mubr.msk.f32.mxu1 %vm2204_vm5, %v13392_v49  ;;  %v11770_v44 = vpack.c.bf16 %v9400_v14, %v9399_v5  ;;  %v9420_v50 = vld [vmem:[%s12566_s29 + $0x198] sm:$0xff]  ;;  %v13500_v14 = vld [vmem:[%s14057_s14 + $0x5] ss:$0 sm:$0xff] }
0x1813   : > { %v11796_v51 = vpack.c.bf16 %v9420_v50, %v9419_v48 }
0x1814   : > { %v13401_v24 = vadd.f32 %v9324_v46, %v5512_v52  ;;  %v9418_v46 = vld [vmem:[%s12566_s29 + $0x188] sm:$0xff] }
0x1815   : > { %v11792_v47 = vpack.c.bf16 %v9418_v46, %v9417_v45  ;;  %v9422_v52 = vld [vmem:[%s12566_s29 + $0x1a8] sm:$0xff] }
0x1816   : > { %10799 = vmatmul.mubr.msk.f32.vlgmr.msra.gmra.mrb[28].mxu0 %vm2204_vm5, %v13401_v24  ;;  %10837 = vmatmul.mubr.msk.f32.vlgmr.msra.gmra.mrb[48].mxu1 %vm2204_vm5, %v13401_v24 }
0x1817   : > { %11687 = vmatpush3.bf16.msra.mxu0 %v11684_v40  ;;  %10817 = vmatprep.mubr.msk.f32.mxu0 %vm2204_vm5, %v13392_v49  ;;  %v9395_v40 = vld [vmem:[%s14058_s8 + $0x150] sm:$0xff] }
0x1818   : > { %11689 = vmatprep.subr.bf16.mxu0 %v11688_v54  ;;  %v11762_v22 = vpack.c.bf16 %v9396_v16, %v9395_v40 }
0x181b   : > { %11691 = vmatpush3.bf16.msra.mxu0 %v11688_v54  ;;  %v11800_v54 = vpack.c.bf16 %v9422_v52, %v9421_v28 }
0x181c   : > { %11693 = vmatprep.subr.bf16.mxu0 %v11692_v58 }
0x181f   : > { %11695 = vmatpush3.bf16.msra.mxu0 %v11692_v58  ;;  %v11804_v58 = vpack.c.bf16 %v9424_v56, %v9423_v55 }
0x1820   : > { %11697 = vmatprep.subr.bf16.mxu0 %v11696_v61 }
0x1823   : > { %11699 = vmatpush3.bf16.msra.mxu0 %v11696_v61  ;;  %v11824_v61 = vpack.c.bf16 %v9442_v60, %v9441_v59  ;;  %v9450_v59 = vld [vmem:[%s12591_s24 + $0x6] ss:$0 sm:$0xff] }
0x1826   : > { %10818 = vmatmul.mubr.msk.f32.vlgmr.msra.gmra.mrb[30].mxu0 %vm2204_vm5, %v13401_v24 }
0x18e9   : > { %v10800_v0 = vpop.f32.mrb[28].mxu0  ;;  %v10838_v1 = vpop.f32.mrb[48].mxu1 }
0x18ea   : > { %v5800_v4 = vadd.f32 %v10838_v1, %v9358_v62  ;;  %v5610_v8 = vpop.f32.mrb[29].mxu0  ;;  %v5794_v9 = vpop.f32.mrb[49].mxu1  ;;  %v5616_v53 = vadd.f32 %v10800_v0, %v9334_v63  ;;  %v9445_v1 = vld [vmem:[%s14058_s8 + $0x1a0] sm:$0xff] }
0x18eb   : > { %v5611_v10 = vadd.f32 %v9334_v63, %v5610_v8  ;;  %v5795_v11 = vadd.f32 %v9358_v62, %v5794_v9  ;;  %v9443_v62 = vld [vmem:[%s14058_s8 + $0x190] sm:$0xff]  ;;  %v9444_v63 = vld [vmem:[%s14058_s8 + $0x198] sm:$0xff] }
0x18ec   : > { %v11828_v0 = vpack.c.bf16 %v9444_v63, %v9443_v62  ;;  %v9447_v9 = vld [vmem:[%s14058_s8 + $0x1b0] sm:$0xff] }
0x18ed   : > { %v11722_v12 = vpack.c.bf16 %v5800_v4, %v5795_v11  ;;  %10843 = vmatprep.mubr.msk.f32.mxu0 %vm3254_vm10, %v5611_v10  ;;  %v9446_v4 = vld [vmem:[%s14058_s8 + $0x1a8] sm:$0xff]  ;;  %v9448_v10 = vld [vmem:[%s14058_s8 + $0x1b8] sm:$0xff] }
0x18ee   : > { %v11832_v8 = vpack.c.bf16 %v9446_v4, %v9445_v1  ;;  %v11836_v11 = vpack.c.bf16 %v9448_v10, %v9447_v9  ;;  %v13522_v1 = vld [vmem:[%s14057_s14 + $0x7] ss:$0 sm:$0xff] }
0x18ef   : > { %11723 = vmatprep.subr.bf16.mxu1 %v11722_v12  ;;  %v9496_v10 = vld [vmem:[%s12591_s24 + $0x7] ss:$0 sm:$0xff] }
0x18f0   : > { %11725 = vmatpush3.bf16.msra.mxu1 %v11722_v12  ;;  %v9463_v12 = vld [vmem:[%s12566_s29 + $0x1c0] sm:$0xff] }
0x18f9   : > { %v10819_v31 = vpop.f32.mrb[30].mxu0 }
0x18fa   : > { %v5708_v15 = vadd.f32 %v10819_v31, %v9346_v23  ;;  %v5702_v2 = vpop.f32.mrb[31].mxu0 }
0x18fb   : > { %v5703_v20 = vadd.f32 %v9346_v23, %v5702_v2  ;;  %v9464_v23 = vld [vmem:[%s12566_s29 + $0x1c8] sm:$0xff]  ;;  %v9466_v2 = vld [vmem:[%s12566_s29 + $0x1d8] sm:$0xff] }
0x18fc   : > { %v11854_v31 = vpack.c.bf16 %v9464_v23, %v9463_v12 }
0x18fd   : > { %v11716_v21 = vpack.c.bf16 %v5708_v15, %v5703_v20  ;;  %v9465_v15 = vld [vmem:[%s12566_s29 + $0x1d0] sm:$0xff]  ;;  %v9468_v20 = vld [vmem:[%s12566_s29 + $0x1e8] sm:$0xff] }
0x18fe   : > { %v11858_v18 = vpack.c.bf16 %v9466_v2, %v9465_v15 }
0x18ff   : > { %11718 = vmatprep.subr.msk.bf16.mxu0 %vm13122_vm11, %v11716_v21 }
0x1900   : > { %11721 = vmatpush3.bf16.xpose.msk.msra.mxu0 %vm13122_vm11, %v11716_v21  ;;  %v11862_v21 = vpack.c.bf16 %v9468_v20, %v9467_v19 }
0x1901   : > { %11727 = vmatprep.subr.bf16.mxu0 %v11726_v29 }
0x1907   : > { %10844 = vmatmul.mubr.msk.f32.vlgmr.msra.gmra.mrb[32].mxu0 %vm3254_vm10, %v5616_v53  ;;  %v9487_v53 = vld [vmem:[%s14058_s8 + $0x1c0] sm:$0xff] }
0x1908   : > { %11729 = vmatpush3.bf16.msra.mxu0 %v11726_v29  ;;  %10869 = vmatprep.mubr.msk.f32.mxu0 %vm2204_vm5, %v13392_v49  ;;  %v9469_v29 = vld [vmem:[%s12566_s29 + $0x1f0] sm:$0xff] }
0x1909   : > { %11731 = vmatprep.subr.bf16.mxu0 %v11730_v13  ;;  %v11866_v27 = vpack.c.bf16 %v9470_v32, %v9469_v29 }
0x190c   : > { %11733 = vmatpush3.bf16.msra.mxu0 %v11730_v13  ;;  %v9488_v13 = vld [vmem:[%s14058_s8 + $0x1c8] sm:$0xff] }
0x190d   : > { %11735 = vmatprep.subr.bf16.mxu0 %v11734_v17  ;;  %v11886_v30 = vpack.c.bf16 %v9488_v13, %v9487_v53 }
0x1910   : > { %11737 = vmatpush3.bf16.msra.mxu0 %v11734_v17  ;;  %v9490_v17 = vld [vmem:[%s14058_s8 + $0x1d8] sm:$0xff] }
0x1911   : > { %11739 = vmatprep.subr.bf16.mxu0 %v11738_v35  ;;  %v11890_v3 = vpack.c.bf16 %v9490_v17, %v9489_v37  ;;  %v9382_v37 = vld [vmem:[%s14060_s3 + $0x148] sm:$0xff] }
0x1914   : > { %11741 = vmatpush3.bf16.msra.mxu0 %v11738_v35  ;;  %v9492_v35 = vld [vmem:[%s14058_s8 + $0x1e8] sm:$0xff] }
0x1915   : > { %11759 = vmatprep.subr.bf16.mxu0 %v11758_v39  ;;  %v11894_v36 = vpack.c.bf16 %v9492_v35, %v9491_v34 }
0x1917   : > { %10870 = vmatmul.mubr.msk.f32.vlgmr.msra.gmra.mrb[34].mxu0 %vm2204_vm5, %v13401_v24 }
0x1918   : > { %11761 = vmatpush3.bf16.msra.mxu0 %v11758_v39  ;;  %10907 = vmatprep.mubr.msk.f32.mxu0 %vm2204_vm5, %v13392_v49  ;;  %v9494_v39 = vld [vmem:[%s14058_s8 + $0x1f8] sm:$0xff]  ;;  %s14087_s8 = sld [smem:[#allocation36_spill]] }
0x1919   : > { %11763 = vmatprep.subr.bf16.mxu0 %v11762_v22  ;;  %v11898_v40 = vpack.c.bf16 %v9494_v39, %v9493_v38  ;;  %v9384_v38 = vld [vmem:[%s14060_s3 + $0x158] sm:$0xff] }
0x191c   : > { %11765 = vmatpush3.bf16.msra.mxu0 %v11762_v22 }
0x191d   : > { %11767 = vmatprep.subr.bf16.mxu0 %v11766_v43 }
0x1920   : > { %11769 = vmatpush3.bf16.msra.mxu0 %v11766_v43 }
0x1921   : > { %11771 = vmatprep.subr.bf16.mxu0 %v11770_v44 }
0x1924   : > { %11773 = vmatpush3.bf16.msra.mxu0 %v11770_v44 }
0x1925   : > { %11793 = vmatprep.subr.bf16.mxu0 %v11792_v47 }
0x1927   : > { %10908 = vmatmul.mubr.msk.f32.vlgmr.msra.gmra.mrb[36].mxu0 %vm2204_vm5, %v13401_v24 }
0x1928   : > { %11795 = vmatpush3.bf16.msra.mxu0 %v11792_v47  ;;  %10954 = vmatprep.mubr.msk.f32.mxu0 %vm2204_vm5, %v13392_v49  ;;  %v9402_v47 = vld [vmem:[%s12591_s24 + $0x5] ss:$0 sm:$0xff] }
0x1929   : > { %11797 = vmatprep.subr.bf16.mxu0 %v11796_v51 }
0x192c   : > { %11799 = vmatpush3.bf16.msra.mxu0 %v11796_v51 }
0x192d   : > { %11801 = vmatprep.subr.bf16.mxu0 %v11800_v54 }
0x1930   : > { %11803 = vmatpush3.bf16.msra.mxu0 %v11800_v54  ;;  %v13511_v54 = vld [vmem:[%s14057_s14 + $0x6] ss:$0 sm:$0xff] }
0x1931   : > { %11805 = vmatprep.subr.bf16.mxu0 %v11804_v58 }
0x1934   : > { %11807 = vmatpush3.bf16.msra.mxu0 %v11804_v58 }
0x1935   : > { %11825 = vmatprep.subr.bf16.mxu0 %v11824_v61 }
0x1937   : > { %10955 = vmatmul.mubr.msk.f32.vlgmr.msra.gmra.mrb[38].mxu0 %vm2204_vm5, %v13401_v24 }
0x1938   : > { %11827 = vmatpush3.bf16.msra.mxu0 %v11824_v61  ;;  %10992 = vmatprep.mubr.msk.f32.mxu0 %vm2204_vm5, %v13392_v49 }
0x1939   : > { %11829 = vmatprep.subr.bf16.mxu0 %v11828_v0 }
0x193c   : > { %11831 = vmatpush3.bf16.msra.mxu0 %v11828_v0 }
0x193d   : > { %11833 = vmatprep.subr.bf16.mxu0 %v11832_v8 }
0x1940   : > { %11835 = vmatpush3.bf16.msra.mxu0 %v11832_v8 }
0x1941   : > { %11837 = vmatprep.subr.bf16.mxu0 %v11836_v11 }
0x1944   : > { %11839 = vmatpush3.bf16.msra.mxu0 %v11836_v11 }
0x1945   : > { %11855 = vmatprep.subr.bf16.mxu0 %v11854_v31 }
0x1947   : > { %10993 = vmatmul.mubr.msk.f32.vlgmr.msra.gmra.mrb[40].mxu0 %vm2204_vm5, %v13401_v24 }
0x1948   : > { %11857 = vmatpush3.bf16.msra.mxu0 %v11854_v31  ;;  %11032 = vmatprep.mubr.msk.f32.mxu0 %vm2204_vm5, %v13392_v49 }
0x1949   : > { %11859 = vmatprep.subr.bf16.mxu0 %v11858_v18 }
0x194c   : > { %11861 = vmatpush3.bf16.msra.mxu0 %v11858_v18 }
0x194d   : > { %11863 = vmatprep.subr.bf16.mxu0 %v11862_v21 }
0x1950   : > { %11865 = vmatpush3.bf16.msra.mxu0 %v11862_v21 }
0x1951   : > { %11867 = vmatprep.subr.bf16.mxu0 %v11866_v27 }
0x1954   : > { %11869 = vmatpush3.bf16.msra.mxu0 %v11866_v27 }
0x1955   : > { %11887 = vmatprep.subr.bf16.mxu0 %v11886_v30 }
0x1957   : > { %11033 = vmatmul.mubr.msk.f32.vlgmr.msra.gmra.mrb[42].mxu0 %vm2204_vm5, %v13401_v24 }
0x1958   : > { %11889 = vmatpush3.bf16.msra.mxu0 %v11886_v30  ;;  %11070 = vmatprep.mubr.msk.f32.mxu0 %vm2204_vm5, %v13392_v49  ;;  %v9381_v30 = vld [vmem:[%s14060_s3 + $0x140] sm:$0xff] }
0x1959   : > { %11891 = vmatprep.subr.bf16.mxu0 %v11890_v3  ;;  %v11742_v17 = vpack.c.bf16 %v9382_v37, %v9381_v30 }
0x195b   : > { %11743 = vmatprep.subr.bf16.mxu1 %v11742_v17 }
0x195c   : > { %11893 = vmatpush3.bf16.msra.mxu0 %v11890_v3 }
0x195d   : > { %11895 = vmatprep.subr.bf16.mxu0 %v11894_v36 }
0x1960   : > { %11897 = vmatpush3.bf16.msra.mxu0 %v11894_v36  ;;  %v9383_v36 = vld [vmem:[%s14060_s3 + $0x150] sm:$0xff] }
0x1961   : > { %11899 = vmatprep.subr.bf16.mxu0 %v11898_v40 }
0x1964   : > { %11901 = vmatpush3.bf16.msra.mxu0 %v11898_v40 }
0x1967   : > { %11071 = vmatmul.mubr.msk.f32.vlgmr.msra.gmra.mrb[44].mxu0 %vm2204_vm5, %v13401_v24 }
0x1968   : > { %7897 = vmatprep.mubr.f32.mxu0 %v12518_v6 }
0x19da   : > { %v10845_v16 = vpop.f32.mrb[32].mxu0 }
0x19db   : > { %v5891_v22 = vmul.f32 0.25, %v10845_v16  ;;  %v5881_v41 = vpop.f32.mrb[33].mxu0 }
0x19dc   : > { %v5890_v42 = vmul.f32 0.25, %v5881_v41  ;;  %v9385_v41 = vld [vmem:[%s14060_s3 + $0x160] sm:$0xff] }
0x19dd   : > { %v5895_v43 = vsel %vm3254_vm10, %v5891_v22, -inf }
0x19de   : > { %5896 = vmax.xlane.f32.xlu1 %v5895_v43  ;;  %v5892_v5 = vsel %vm3254_vm10, %v5890_v42, -inf }
0x19df   : > { %5893 = vmax.xlane.f32.xlu0 %v5892_v5  ;;  %v9387_v5 = vld [vmem:[%s14060_s3 + $0x170] sm:$0xff] }
0x19ea   : > { %v10871_v44 = vpop.f32.mrb[34].mxu0 }
0x19eb   : > { %v13503_v45 = vadd.f32 %v10871_v44, %v13500_v14  ;;  %v13505_v46 = vpop.f32.mrb[35].mxu0  ;;  %v9388_v44 = vld [vmem:[%s14060_s3 + $0x178] sm:$0xff] }
0x19fa   : > { %v10909_v48 = vpop.f32.mrb[36].mxu0 }
0x19fb   : > { %v6271_v50 = vadd.f32 %v10909_v48, %v9402_v47  ;;  %v6265_v51 = vpop.f32.mrb[37].mxu0  ;;  %v6082_v48 = vadd.f32 %v13500_v14, %v13505_v46 }
0x19fc   : > { %v6266_v28 = vadd.f32 %v9402_v47, %v6265_v51  ;;  %v11754_v47 = vpack.c.bf16 %v9388_v44, %v9387_v5  ;;  %v9433_v5 = vld [vmem:[%s14060_s3 + $0x1a0] sm:$0xff]  ;;  %v9434_v44 = vld [vmem:[%s14060_s3 + $0x1a8] sm:$0xff] }
0x19fe   : > { %v13508_v52 = vpack.c.bf16 %v6271_v50, %v6266_v28  ;;  %v9390_v28 = vld [vmem:[%s14056_s19 + $0x5] ss:$0 sm:$0xff] }
0x1a0a   : > { %v10956_v55 = vpop.f32.mrb[38].mxu0 }
0x1a0b   : > { %v13514_v56 = vadd.f32 %v10956_v55, %v13511_v54  ;;  %v13516_v58 = vpop.f32.mrb[39].mxu0 }
0x1a1a   : > { %v10994_v60 = vpop.f32.mrb[40].mxu0 }
0x1a1b   : > { %v6904_v61 = vadd.f32 %v10994_v60, %v9450_v59  ;;  %v6898_v62 = vpop.f32.mrb[41].mxu0 }
0x1a1c   : > { %v6899_v63 = vadd.f32 %v9450_v59, %v6898_v62 }
0x1a1e   : > { %v13519_v0 = vpack.c.bf16 %v6904_v61, %v6899_v63 }
0x1a2a   : > { %v11034_v4 = vpop.f32.mrb[42].mxu0 }
0x1a2b   : > { %v13525_v8 = vadd.f32 %v11034_v4, %v13522_v1  ;;  %v13527_v9 = vpop.f32.mrb[43].mxu0 }
0x1a3a   : > { %v11072_v11 = vpop.f32.mrb[44].mxu0 }
0x1a3b   : > { %v7458_v12 = vadd.f32 %v11072_v11, %v9496_v10  ;;  %v7452_v23 = vpop.f32.mrb[45].mxu0 }
0x1a3c   : > { %v7453_v31 = vadd.f32 %v9496_v10, %v7452_v23 }
0x1a3e   : > { %v13530_v15 = vpack.c.bf16 %v7458_v12, %v7453_v31 }
0x1a6b   : > { %v5897_v2 = vpop.xlane.xlu1 %5896 }
0x1a6c   : > { %v5899_v18 = vsub.f32 %v5891_v22, %v5897_v2  ;;  %v5894_v19 = vpop.xlane.xlu0 %5893  ;;  %v11746_v22 = vpack.c.bf16 %v9384_v38, %v9383_v36  ;;  %v9429_v38 = vld [vmem:[%s14060_s3 + $0x180] sm:$0xff] }
0x1a6d   : > { %v5898_v20 = vsub.f32 %v5890_v42, %v5894_v19  ;;  %v9386_v42 = vld [vmem:[%s14060_s3 + $0x168] sm:$0xff] }
0x1a6e   : > { %v5902_v21 = vmul.f32 1.442695, %v5899_v18  ;;  %v11750_v43 = vpack.c.bf16 %v9386_v42, %v9385_v41  ;;  %v9431_v41 = vld [vmem:[%s14060_s3 + $0x190] sm:$0xff]  ;;  %v9432_v42 = vld [vmem:[%s14060_s3 + $0x198] sm:$0xff] }
0x1a6f   : > { %v5900_v29 = vmul.f32 1.442695, %v5898_v20 }
0x1a70   : > { %12272 = vpow2.f32 %v5902_v21 }
0x1a71   : > { %12274 = vpow2.f32 %v5900_v29  ;;  %v9411_v29 = vld [vmem:[%s12596_s30 + $0x50] sm:$0xff] }
0x1a7a   : > { %v12273_v32 = vpop.eup %12272 }
0x1a7b   : > { %v12275_v27 = vpop.eup %12274  ;;  %v5907_v53 = vsel %vm3254_vm10, %v12273_v32, 0.0 }
0x1a7c   : > { %5908 = vadd.xlane.f32.xlu1 %v5907_v53  ;;  %v5904_v13 = vsel %vm3254_vm10, %v12275_v27, 0.0 }
0x1a7d   : > { %5905 = vadd.xlane.f32.xlu0 %v5904_v13 }
0x1b09   : > { %v5909_v3 = vpop.xlane.xlu1 %5908 }
0x1b0a   : > { %12276 = vrcp.f32 %v5909_v3  ;;  %v5906_v34 = vpop.xlane.xlu0 %5905 }
0x1b0b   : > { %12278 = vrcp.f32 %v5906_v34  ;;  %v9367_v34 = vld [vmem:[%s12596_s30 + $0x40] sm:$0xff] }
0x1b14   : > { %v12277_v35 = vpop.eup %12276 }
0x1b15   : > { %v12279_v39 = vpop.eup %12278  ;;  %v5913_v16 = vmul.f32 %v12277_v35, %v12273_v32  ;;  %v9412_v32 = vld [vmem:[%s12596_s30 + $0x58] sm:$0xff]  ;;  %v9368_v35 = vld [vmem:[%s12596_s30 + $0x48] sm:$0xff] }
0x1b16   : > { %v5911_v40 = vmul.f32 %v12279_v39, %v12275_v27  ;;  %v11784_v27 = vpack.c.bf16 %v9412_v32, %v9411_v29  ;;  %v11788_v36 = vpack.c.bf16 %v9368_v35, %v9367_v34  ;;  %v9430_v39 = vld [vmem:[%s14060_s3 + $0x188] sm:$0xff]  ;;  %v9477_v34 = vld [vmem:[%s14060_s3 + $0x1d0] sm:$0xff]  ;;  %v9478_v35 = vld [vmem:[%s14060_s3 + $0x1d8] sm:$0xff] }
0x1b18   : > { %10850 = vmatprep.mubr.msk.f32.mxu1 %vm3254_vm10, %v5911_v40 }
0x1b19   : > { %10851 = vmatmul.mubr.msk.f32.vlgmr.msra.gmra.mrb[50].mxu1 %vm3254_vm10, %v5913_v16 }
0x1b1a   : > { %11745 = vmatpush3.bf16.msra.mxu1 %v11742_v17  ;;  %10888 = vmatprep.mubr.msk.f32.mxu1 %vm2204_vm5, %v13392_v49 }
0x1b1b   : > { %11747 = vmatprep.subr.bf16.mxu1 %v11746_v22 }
0x1b1e   : > { %11749 = vmatpush3.bf16.msra.mxu1 %v11746_v22  ;;  %v11808_v22 = vpack.c.bf16 %v9430_v39, %v9429_v38  ;;  %v11874_v39 = vpack.c.bf16 %v9478_v35, %v9477_v34 }
0x1b1f   : > { %11751 = vmatprep.subr.bf16.mxu1 %v11750_v43 }
0x1b22   : > { %11753 = vmatpush3.bf16.msra.mxu1 %v11750_v43  ;;  %v11812_v43 = vpack.c.bf16 %v9432_v42, %v9431_v41  ;;  %v9481_v41 = vld [vmem:[%s14060_s3 + $0x1f0] sm:$0xff]  ;;  %v9482_v42 = vld [vmem:[%s14060_s3 + $0x1f8] sm:$0xff] }
0x1b23   : > { %11755 = vmatprep.subr.bf16.mxu1 %v11754_v47 }
0x1b26   : > { %11757 = vmatpush3.bf16.msra.mxu1 %v11754_v47  ;;  %v11816_v47 = vpack.c.bf16 %v9434_v44, %v9433_v5  ;;  %v7269_v5 = vadd.f32 %v13522_v1, %v13527_v9  ;;  %v9484_v44 = vld [vmem:[%s14056_s19 + $0x7] ss:$0 sm:$0xff] }
0x1b29   : > { %10889 = vmatmul.mubr.msk.f32.vlgmr.msra.gmra.mrb[52].mxu1 %vm2204_vm5, %v13401_v24 }
0x1b2a   : > { %10914 = vmatprep.mubr.msk.f32.mxu1 %vm3254_vm10, %v6082_v48  ;;  %v9435_v48 = vld [vmem:[%s14060_s3 + $0x1b0] sm:$0xff] }
0x1bec   : > { %v13551_v50 = vpop.f32.mrb[50].mxu1 }
0x1bed   : > { %v5986_v51 = vpop.f32.mrb[51].mxu1 }
0x1bfc   : > { %v10890_v55 = vpop.f32.mrb[52].mxu1 }
0x1bfd   : > { %v6179_v59 = vadd.f32 %v10890_v55, %v9390_v28  ;;  %v6173_v60 = vpop.f32.mrb[53].mxu1  ;;  %v6715_v55 = vadd.f32 %v13511_v54, %v13516_v58 }
0x1bfe   : > { %v6174_v61 = vadd.f32 %v9390_v28, %v6173_v60  ;;  %v9436_v28 = vld [vmem:[%s14060_s3 + $0x1b8] sm:$0xff] }
0x1c00   : > { %v11774_v62 = vpack.c.bf16 %v6179_v59, %v6174_v61 }
0x1c02   : > { %11776 = vmatprep.subr.msk.bf16.mxu1 %vm13122_vm11, %v11774_v62 }
0x1c03   : > { %11779 = vmatpush3.bf16.xpose.msk.msra.mxu1 %vm13122_vm11, %v11774_v62 }
0x1c04   : > { %11781 = vmatprep.subr.bf16.mxu1 %v13508_v52 }
0x1c0a   : > { %10915 = vmatmul.mubr.msk.f32.vlgmr.msra.gmra.mrb[54].mxu1 %vm3254_vm10, %v13503_v45 }
0x1c0b   : > { %11783 = vmatpush3.bf16.msra.mxu1 %v13508_v52 }
0x1c0c   : > { %11785 = vmatprep.subr.bf16.mxu1 %v11784_v27 }
0x1cdd   : > { %v10916_v14 = vpop.f32.mrb[54].mxu1 }
0x1cde   : > { %v6362_v46 = vmul.f32 0.25, %v10916_v14  ;;  %v6352_v63 = vpop.f32.mrb[55].mxu1 }
0x1cdf   : > { %v6361_v4 = vmul.f32 0.25, %v6352_v63 }
0x1ce0   : > { %v6366_v10 = vsel %vm3254_vm10, %v6362_v46, -inf }
0x1ce1   : > { %6367 = vmax.xlane.f32.xlu1 %v6366_v10  ;;  %v6363_v11 = vsel %vm3254_vm10, %v6361_v4, -inf }
0x1ce2   : > { %6364 = vmax.xlane.f32.xlu0 %v6363_v11 }
0x1d6e   : > { %v6368_v12 = vpop.xlane.xlu1 %6367 }
0x1d6f   : > { %v6370_v23 = vsub.f32 %v6362_v46, %v6368_v12  ;;  %v6365_v31 = vpop.xlane.xlu0 %6364 }
0x1d70   : > { %v6369_v2 = vsub.f32 %v6361_v4, %v6365_v31 }
0x1d71   : > { %v6373_v18 = vmul.f32 1.442695, %v6370_v23 }
0x1d72   : > { %v6371_v45 = vmul.f32 1.442695, %v6369_v2 }
0x1d73   : > { %12280 = vpow2.f32 %v6373_v18 }
0x1d74   : > { %12282 = vpow2.f32 %v6371_v45 }
0x1d7d   : > { %v12281_v52 = vpop.eup %12280 }
0x1d7e   : > { %v12283_v19 = vpop.eup %12282  ;;  %v6378_v20 = vsel %vm3254_vm10, %v12281_v52, 0.0 }
0x1d7f   : > { %6379 = vadd.xlane.f32.xlu1 %v6378_v20  ;;  %v6375_v21 = vsel %vm3254_vm10, %v12283_v19, 0.0  ;;  %v9460_v20 = vld [vmem:[%s12596_s30 + $0x68] sm:$0xff] }
0x1d80   : > { %6376 = vadd.xlane.f32.xlu0 %v6375_v21 }
0x1e0c   : > { %v6380_v53 = vpop.xlane.xlu1 %6379 }
0x1e0d   : > { %12284 = vrcp.f32 %v6380_v53  ;;  %v6377_v13 = vpop.xlane.xlu0 %6376 }
0x1e0e   : > { %12286 = vrcp.f32 %v6377_v13 }
0x1e17   : > { %v12285_v30 = vpop.eup %12284 }
0x1e18   : > { %v12287_v37 = vpop.eup %12286  ;;  %v6384_v3 = vmul.f32 %v12285_v30, %v12281_v52 }
0x1e19   : > { %v6382_v17 = vmul.f32 %v12287_v37, %v12283_v19  ;;  %v9459_v19 = vld [vmem:[%s12596_s30 + $0x60] sm:$0xff] }
0x1e1a   : > { %v11850_v21 = vpack.c.bf16 %v9460_v20, %v9459_v19  ;;  %v9475_v37 = vld [vmem:[%s14060_s3 + $0x1c0] sm:$0xff] }
0x1e1b   : > { %10921 = vmatprep.mubr.msk.f32.mxu1 %vm3254_vm10, %v6382_v17  ;;  %v9476_v17 = vld [vmem:[%s14060_s3 + $0x1c8] sm:$0xff]  ;;  %v9510_v19 = vld [vmem:[%s14059_s6 + $0x1] ss:$0 sm:$0xff]  ;;  %s14083_s6 = sld [smem:[#allocation32_spill]] }
0x1e1c   : > { %10922 = vmatmul.mubr.msk.f32.vlgmr.msra.gmra.mrb[56].mxu1 %vm3254_vm10, %v6384_v3  ;;  %v11870_v3 = vpack.c.bf16 %v9476_v17, %v9475_v37 }
0x1e1d   : > { %11787 = vmatpush3.bf16.msra.mxu1 %v11784_v27 }
0x1e1e   : > { %11789 = vmatprep.subr.bf16.mxu1 %v11788_v36 }
0x1eef   : > { %v10923_v40 = vpop.f32.mrb[56].mxu1 }
0x1ef0   : > { %v6457_v16 = vpop.f32.mrb[57].mxu1 }
0x1ef1   : > { %10928 = vmatprep.mubr.msk.f32.mxu1 %vm3254_vm10, %v6457_v16  ;;  %v9480_v16 = vld [vmem:[%s14060_s3 + $0x1e8] sm:$0xff] }
0x1ef2   : > { %10929 = vmatmul.mubr.msk.f32.vlgmr.msra.gmra.mrb[58].mxu1 %vm3254_vm10, %v10923_v40  ;;  %v9479_v40 = vld [vmem:[%s14060_s3 + $0x1e0] sm:$0xff] }
0x1ef3   : > { %10935 = vmatprep.mubr.msk.f32.mxu1 %vm3254_vm10, %v5986_v51  ;;  %11791 = vmatpush3.bf16.msra.mxu1 %v11788_v36  ;;  %v11820_v51 = vpack.c.bf16 %v9436_v28, %v9435_v48 }
0x1ef4   : > { %11809 = vmatprep.subr.bf16.mxu1 %v11808_v22 }
0x1efa   : > { %10936 = vmatmul.mubr.msk.f32.vlgmr.msra.gmra.mrb[58].mxu1 %vm3254_vm10, %v13551_v50  ;;  %v9438_v50 = vld [vmem:[%s14056_s19 + $0x6] ss:$0 sm:$0xff] }
0x1efb   : > { %11811 = vmatpush3.bf16.msra.mxu1 %v11808_v22  ;;  %10973 = vmatprep.mubr.msk.f32.mxu1 %vm2204_vm5, %v13392_v49  ;;  %v11878_v22 = vpack.c.bf16 %v9480_v16, %v9479_v40  ;;  %v9516_v40 = vld [vmem:[%s14071_s18 + $0x88] sm:$0xff]  ;;  %v9518_v16 = vld [vmem:[%s14071_s18 + $0x98] sm:$0xff] }
0x1efc   : > { %11813 = vmatprep.subr.bf16.mxu1 %v11812_v43 }
0x1eff   : > { %11815 = vmatpush3.bf16.msra.mxu1 %v11812_v43  ;;  %v11882_v43 = vpack.c.bf16 %v9482_v42, %v9481_v41  ;;  %v9515_v41 = vld [vmem:[%s14071_s18 + $0x80] sm:$0xff]  ;;  %v9517_v42 = vld [vmem:[%s14071_s18 + $0x90] sm:$0xff] }
0x1f00   : > { %11817 = vmatprep.subr.bf16.mxu1 %v11816_v47 }
0x1f03   : > { %11819 = vmatpush3.bf16.msra.mxu1 %v11816_v47 }
0x1f04   : > { %11821 = vmatprep.subr.bf16.mxu1 %v11820_v51 }
0x1f07   : > { %11823 = vmatpush3.bf16.msra.mxu1 %v11820_v51 }
0x1f0a   : > { %10974 = vmatmul.mubr.msk.f32.vlgmr.msra.gmra.mrb[60].mxu1 %vm2204_vm5, %v13401_v24 }
0x1f0b   : > { %10999 = vmatprep.mubr.msk.f32.mxu1 %vm3254_vm10, %v6715_v55 }
0x1fdd   : > { %v10975_v59 = vpop.f32.mrb[60].mxu1 }
0x1fde   : > { %v6812_v60 = vadd.f32 %v10975_v59, %v9438_v50  ;;  %v6806_v61 = vpop.f32.mrb[61].mxu1 }
0x1fdf   : > { %v6807_v62 = vadd.f32 %v9438_v50, %v6806_v61 }
0x1fe1   : > { %v11840_v14 = vpack.c.bf16 %v6812_v60, %v6807_v62 }
0x1fe3   : > { %11842 = vmatprep.subr.msk.bf16.mxu1 %vm13122_vm11, %v11840_v14 }
0x1fe4   : > { %11845 = vmatpush3.bf16.xpose.msk.msra.mxu1 %vm13122_vm11, %v11840_v14 }
0x1fe5   : > { %11847 = vmatprep.subr.bf16.mxu1 %v13519_v0 }
0x1feb   : > { %11000 = vmatmul.mubr.msk.f32.vlgmr.msra.gmra.mrb[62].mxu1 %vm3254_vm10, %v13514_v56 }
0x1fec   : > { %11849 = vmatpush3.bf16.msra.mxu1 %v13519_v0 }
0x1fed   : > { %11851 = vmatprep.subr.bf16.mxu1 %v11850_v21 }
0x20be   : > { %v11001_v54 = vpop.f32.mrb[62].mxu1 }
0x20bf   : > { %v6995_v58 = vmul.f32 0.25, %v11001_v54  ;;  %v6985_v46 = vpop.f32.mrb[63].mxu1 }
0x20c0   : > { %v6994_v63 = vmul.f32 0.25, %v6985_v46 }
0x20c1   : > { %v6999_v4 = vsel %vm3254_vm10, %v6995_v58, -inf }
0x20c2   : > { %7000 = vmax.xlane.f32.xlu1 %v6999_v4  ;;  %v6996_v10 = vsel %vm3254_vm10, %v6994_v63, -inf }
0x20c3   : > { %6997 = vmax.xlane.f32.xlu0 %v6996_v10  ;;  %v9505_v10 = vld [vmem:[%s12596_s30 + $0x70] sm:$0xff] }
0x214f   : > { %v7001_v11 = vpop.xlane.xlu1 %7000 }
0x2150   : > { %v7003_v12 = vsub.f32 %v6995_v58, %v7001_v11  ;;  %v6998_v23 = vpop.xlane.xlu0 %6997  ;;  %v9506_v11 = vld [vmem:[%s12596_s30 + $0x78] sm:$0xff] }
0x2151   : > { %v7002_v31 = vsub.f32 %v6994_v63, %v6998_v23 }
0x2152   : > { %v7006_v2 = vmul.f32 1.442695, %v7003_v12  ;;  %v11912_v12 = vpack.c.bf16 %v9506_v11, %v9505_v10  ;;  %v9552_v10 = vld [vmem:[%s14072_s7 + $0x190] sm:$0xff]  ;;  %v9553_v11 = vld [vmem:[%s14072_s7 + $0x198] sm:$0xff] }
0x2153   : > { %v7004_v56 = vmul.f32 1.442695, %v7002_v31 }
0x2154   : > { %12288 = vpow2.f32 %v7006_v2 }
0x2155   : > { %12290 = vpow2.f32 %v7004_v56 }
0x215e   : > { %v12289_v0 = vpop.eup %12288 }
0x215f   : > { %v12291_v18 = vpop.eup %12290  ;;  %v7011_v45 = vsel %vm3254_vm10, %v12289_v0, 0.0 }
0x2160   : > { %7012 = vadd.xlane.f32.xlu1 %v7011_v45  ;;  %v7008_v52 = vsel %vm3254_vm10, %v12291_v18, 0.0 }
0x2161   : > { %7009 = vadd.xlane.f32.xlu0 %v7008_v52 }
0x21ed   : > { %v7013_v29 = vpop.xlane.xlu1 %7012 }
0x21ee   : > { %12292 = vrcp.f32 %v7013_v29  ;;  %v7010_v32 = vpop.xlane.xlu0 %7009 }
0x21ef   : > { %12294 = vrcp.f32 %v7010_v32 }
0x21f8   : > { %v12293_v27 = vpop.eup %12292 }
0x21f9   : > { %v12295_v53 = vpop.eup %12294  ;;  %v7017_v30 = vmul.f32 %v12293_v27, %v12289_v0 }
0x21fa   : > { %v7015_v13 = vmul.f32 %v12295_v53, %v12291_v18 }
0x21fc   : > { %11006 = vmatprep.mubr.msk.f32.mxu1 %vm3254_vm10, %v7015_v13 }
0x21fd   : > { %11007 = vmatmul.mubr.msk.f32.vlgmr.msra.gmra.mrb[64].mxu1 %vm3254_vm10, %v7017_v30 }
0x21fe   : > { %11853 = vmatpush3.bf16.msra.mxu1 %v11850_v21 }
0x21ff   : > { %11871 = vmatprep.subr.bf16.mxu1 %v11870_v3 }
0x22d0   : > { %v11008_v36 = vpop.f32.mrb[64].mxu1 }
0x22d1   : > { %v7090_v38 = vpop.f32.mrb[65].mxu1 }
0x22d2   : > { %11013 = vmatprep.mubr.msk.f32.mxu1 %vm3254_vm10, %v7090_v38 }
0x22d3   : > { %11014 = vmatmul.mubr.msk.f32.vlgmr.msra.gmra.mrb[58].mxu1 %vm3254_vm10, %v11008_v36 }
0x22d4   : > { %11873 = vmatpush3.bf16.msra.mxu1 %v11870_v3  ;;  %11051 = vmatprep.mubr.msk.f32.mxu1 %vm2204_vm5, %v13392_v49 }
0x22d5   : > { %11875 = vmatprep.subr.bf16.mxu1 %v11874_v39 }
0x22d8   : > { %11877 = vmatpush3.bf16.msra.mxu1 %v11874_v39 }
0x22d9   : > { %11879 = vmatprep.subr.bf16.mxu1 %v11878_v22 }
0x22dc   : > { %11881 = vmatpush3.bf16.msra.mxu1 %v11878_v22  ;;  %v11916_v22 = vpack.c.bf16 %v9518_v16, %v9516_v40  ;;  %v9544_v40 = vld [vmem:[%s14072_s7 + $0x150] sm:$0xff]  ;;  %v9545_v16 = vld [vmem:[%s14072_s7 + $0x158] sm:$0xff] }
0x22dd   : > { %11883 = vmatprep.subr.bf16.mxu1 %v11882_v43 }
0x22de   : > { %11917 = vmatprep.subr.bf16.mxu0 %v11916_v22  ;;  %v9562_v22 = vld [vmem:[%s14072_s7 + $0x1e0] sm:$0xff] }
0x22e0   : > { %11885 = vmatpush3.bf16.msra.mxu1 %v11882_v43  ;;  %v11918_v43 = vpack.c.bf16 %v9517_v42, %v9515_v41  ;;  %v9563_v41 = vld [vmem:[%s14072_s7 + $0x1e8] sm:$0xff]  ;;  %v11954_v42 = vpack.c.bf16 %v9545_v16, %v9544_v40 }
0x22e2   : > { %11919 = vmatpush1.bf16.msra.mxu0 %v11918_v43  ;;  %v11956_v43 = vpack.c.bf16 %v9563_v41, %v9562_v22 }
0x22e3   : > { %11052 = vmatmul.mubr.msk.f32.vlgmr.msra.gmra.mrb[66].mxu1 %vm2204_vm5, %v13401_v24 }
0x22e4   : > { %11077 = vmatprep.mubr.msk.f32.mxu1 %vm3254_vm10, %v7269_v5  ;;  %v9520_v5 = vld [vmem:[%s14071_s18 + $0xa8] sm:$0xff] }
0x23b6   : > { %v11053_v47 = vpop.f32.mrb[66].mxu1 }
0x23b7   : > { %v7366_v48 = vadd.f32 %v11053_v47, %v9484_v44  ;;  %v7360_v28 = vpop.f32.mrb[67].mxu1 }
0x23b8   : > { %v7361_v51 = vadd.f32 %v9484_v44, %v7360_v28  ;;  %v9522_v44 = vld [vmem:[%s14071_s18 + $0xb8] sm:$0xff]  ;;  %v9521_v28 = vld [vmem:[%s14071_s18 + $0xb0] sm:$0xff] }
0x23b9   : > { %v11920_v47 = vpack.c.bf16 %v9522_v44, %v9520_v5 }
0x23ba   : > { %v11902_v55 = vpack.c.bf16 %v7366_v48, %v7361_v51  ;;  %v9519_v48 = vld [vmem:[%s14071_s18 + $0xa0] sm:$0xff] }
0x23bb   : > { %v11922_v51 = vpack.c.bf16 %v9521_v28, %v9519_v48  ;;  %11921 = vmatprep.subr.bf16.mxu0 %v11920_v47 }
0x23bc   : > { %11904 = vmatprep.subr.msk.bf16.mxu1 %vm13122_vm11, %v11902_v55 }
0x23bd   : > { %11907 = vmatpush3.bf16.xpose.msk.msra.mxu1 %vm13122_vm11, %v11902_v55  ;;  %11923 = vmatpush1.bf16.msra.mxu0 %v11922_v51  ;;  %v9524_v55 = vld [vmem:[%s14071_s18 + $0xc8] sm:$0xff] }
0x23be   : > { %11909 = vmatprep.subr.bf16.mxu1 %v13530_v15 }
0x23c4   : > { %11078 = vmatmul.mubr.msk.f32.vlgmr.msra.gmra.mrb[68].mxu1 %vm3254_vm10, %v13525_v8 }
0x23c5   : > { %11911 = vmatpush3.bf16.msra.mxu1 %v13530_v15 }
0x23c6   : > { %11913 = vmatprep.subr.bf16.mxu1 %v11912_v12 }
0x2497   : > { %v11079_v1 = vpop.f32.mrb[68].mxu1 }
0x2498   : > { %v7549_v9 = vmul.f32 0.25, %v11079_v1  ;;  %v7539_v50 = vpop.f32.mrb[69].mxu1  ;;  %v9526_v1 = vld [vmem:[%s14071_s18 + $0xd8] sm:$0xff] }
0x2499   : > { %v7548_v59 = vmul.f32 0.25, %v7539_v50  ;;  %v9523_v50 = vld [vmem:[%s14071_s18 + $0xc0] sm:$0xff] }
0x249a   : > { %v7553_v60 = vsel %vm3254_vm10, %v7549_v9, -inf }
0x249b   : > { %7554 = vmax.xlane.f32.xlu1 %v7553_v60  ;;  %v7550_v61 = vsel %vm3254_vm10, %v7548_v59, -inf }
0x249c   : > { %7551 = vmax.xlane.f32.xlu0 %v7550_v61  ;;  %v9528_v61 = vld [vmem:[%s14071_s18 + $0xe8] sm:$0xff] }
0x2528   : > { %v7555_v57 = vpop.xlane.xlu1 %7554 }
0x2529   : > { %v7557_v62 = vsub.f32 %v7549_v9, %v7555_v57  ;;  %v7552_v14 = vpop.xlane.xlu0 %7551  ;;  %v11924_v9 = vpack.c.bf16 %v9526_v1, %v9524_v55  ;;  %v9530_v57 = vld [vmem:[%s14071_s18 + $0xf8] sm:$0xff] }
0x252a   : > { %v7556_v54 = vsub.f32 %v7548_v59, %v7552_v14  ;;  %v9525_v59 = vld [vmem:[%s14071_s18 + $0xd0] sm:$0xff]  ;;  %v9527_v14 = vld [vmem:[%s14071_s18 + $0xe0] sm:$0xff] }
0x252b   : > { %v7560_v58 = vmul.f32 1.442695, %v7557_v62  ;;  %v11926_v60 = vpack.c.bf16 %v9525_v59, %v9523_v50  ;;  %11925 = vmatprep.subr.bf16.mxu0 %v11924_v9  ;;  %v11928_v62 = vpack.c.bf16 %v9530_v57, %v9528_v61  ;;  %v9513_v9 = vld [vmem:[%s14073_s10 + $0x1] ss:$0 sm:$0xff]  ;;  %s13874_s10 = sshll.u32 %s12734_s0, 4 }
0x252c   : > { %v7558_v8 = vmul.f32 1.442695, %v7556_v54  ;;  %v9529_v54 = vld [vmem:[%s14071_s18 + $0xf0] sm:$0xff]  ;;  %s12522_s18 = smov [#allocation6]  }
0x252d   : > { %12296 = vpow2.f32 %v7560_v58  ;;  %11927 = vmatpush1.bf16.msra.mxu0 %v11926_v60  ;;  %v11930_v58 = vpack.c.bf16 %v9529_v54, %v9527_v14  ;;  %v9514_v60 = vld [vmem:[%s14074_s1 + $0x1] ss:$0 sm:$0xff]  ;;  %s14079_s1 = sld [smem:[#allocation31_spill]] }
0x252e   : > { %12298 = vpow2.f32 %v7558_v8  ;;  %11929 = vmatprep.subr.bf16.mxu0 %v11928_v62  ;;  %v9550_v8 = vld [vmem:[%s14072_s7 + $0x180] sm:$0xff] }
0x252f   : > { %v9546_v54 = vld [vmem:[%s14072_s7 + $0x160] sm:$0xff] }
0x2531   : > { %11931 = vmatpush1.bf16.msra.mxu0 %v11930_v58  ;;  %v9547_v58 = vld [vmem:[%s14072_s7 + $0x168] sm:$0xff] }
0x2537   : > { %v12297_v15 = vpop.eup %12296 }
0x2538   : > { %v12299_v46 = vpop.eup %12298  ;;  %v7565_v63 = vsel %vm3254_vm10, %v12297_v15, 0.0 }
0x2539   : > { %7566 = vadd.xlane.f32.xlu1 %v7565_v63  ;;  %v7562_v4 = vsel %vm3254_vm10, %v12299_v46, 0.0 }
0x253a   : > { %7563 = vadd.xlane.f32.xlu0 %v7562_v4  ;;  %v9535_v4 = vld [vmem:[%s14072_s7 + $0x108] sm:$0xff] }
0x25c6   : > { %v7567_v23 = vpop.xlane.xlu1 %7566 }
0x25c7   : > { %12300 = vrcp.f32 %v7567_v23  ;;  %v7564_v31 = vpop.xlane.xlu0 %7563  ;;  %v11936_v23 = vpack.c.bf16 %v9553_v11, %v9552_v10  ;;  %v9531_v10 = vld [vmem:[%s14075_s5 + $0x2] sm:$0x3] }
0x25c8   : > { %12302 = vrcp.f32 %v7564_v31  ;;  %v9536_v31 = vld [vmem:[%s14072_s7 + $0x110] sm:$0xff]  ;;  %v7820_v11 = vrot.slane %v9531_v10, %v5266_v33 }
0x25d1   : > { %v12301_v2 = vpop.eup %12300 }
0x25d2   : > { %v12303_v56 = vpop.eup %12302  ;;  %v7571_v18 = vmul.f32 %v12301_v2, %v12297_v15  ;;  %v9551_v15 = vld [vmem:[%s14072_s7 + $0x188] sm:$0xff]  ;;  %v9537_v2 = vld [vmem:[%s14072_s7 + $0x118] sm:$0xff] }
0x25d3   : > { %v7569_v0 = vmul.f32 %v12303_v56, %v12299_v46  ;;  %v9534_v46 = vld [vmem:[%s14072_s7 + $0x100] sm:$0xff]  ;;  %v11932_v63 = vpack.c.bf16 %v9551_v15, %v9550_v8  ;;  %v11958_v8 = vpack.c.bf16 %v9547_v58, %v9546_v54 }
0x25d4   : > { %v9554_v56 = vld [vmem:[%s14072_s7 + $0x1a0] sm:$0xff] }
0x25d5   : > { %11084 = vmatprep.mubr.msk.f32.mxu1 %vm3254_vm10, %v7569_v0  ;;  %v9555_v0 = vld [vmem:[%s14072_s7 + $0x1a8] sm:$0xff] }
0x25d6   : > { %11085 = vmatmul.mubr.msk.f32.vlgmr.msra.gmra.mrb[70].mxu1 %vm3254_vm10, %v7571_v18  ;;  %v11938_v18 = vpack.c.bf16 %v9537_v2, %v9536_v31 }
0x25d7   : > { %11915 = vmatpush3.bf16.msra.mxu1 %v11912_v12  ;;  %v11934_v12 = vpack.c.bf16 %v9535_v4, %v9534_v46  ;;  %v9548_v46 = vld [vmem:[%s14072_s7 + $0x170] sm:$0xff] }
0x25d8   : > { %11933 = vmatprep.subr.bf16.mxu1 %v11932_v63  ;;  %v9549_v63 = vld [vmem:[%s14072_s7 + $0x178] sm:$0xff] }
0x25d9   : > { %v11962_v4 = vpack.c.bf16 %v9549_v63, %v9548_v46  ;;  %v9571_v63 = vld [vmem:[%s14078_s17 + $0x1] ss:$0 sm:$0xff] }
0x26a9   : > { %v11086_v45 = vpop.f32.mrb[70].mxu1 }
0x26aa   : > { %v7644_v52 = vpop.f32.mrb[71].mxu1 }
0x26ab   : > { %11091 = vmatprep.mubr.msk.f32.mxu1 %vm3254_vm10, %v7644_v52  ;;  %v9538_v52 = vld [vmem:[%s14072_s7 + $0x120] sm:$0xff] }
0x26ac   : > { %11092 = vmatmul.mubr.msk.f32.vlgmr.msra.gmra.mrb[58].mxu1 %vm3254_vm10, %v11086_v45  ;;  %v11940_v45 = vpack.c.bf16 %v9555_v0, %v9554_v56 }
0x26ad   : > { %11935 = vmatpush3.bf16.msra.mxu1 %v11934_v12  ;;  %v7824_v12 = vrot.slane %v9531_v10, %v5270_v7 }
0x26ae   : > { %11937 = vmatprep.subr.bf16.mxu1 %v11936_v23 }
0x26b1   : > { %11939 = vmatpush3.bf16.msra.mxu1 %v11938_v18 }
0x26b2   : > { %11941 = vmatprep.subr.bf16.mxu1 %v11940_v45 }
0x277f   : > { %v11093_v20 = vpop.f32.mrb[58].mxu1 }
0x2780   : > { %v7748_v21 = vadd.f32 %v11093_v20, %v9510_v19  ;;  %v7728_v29 = vpop.f32.mrb[59].mxu1  ;;  %v9556_v20 = vld [vmem:[%s14072_s7 + $0x1b0] sm:$0xff] }
0x2781   : > { %v7747_v32 = vadd.f32 %v9510_v19, %v7728_v29  ;;  %v9539_v19 = vld [vmem:[%s14072_s7 + $0x128] sm:$0xff] }
0x2782   : > { %v7750_v27 = vadd.f32 %v7748_v21, %v13401_v24  ;;  %v9557_v21 = vld [vmem:[%s14072_s7 + $0x1b8] sm:$0xff]  ;;  %v11942_v29 = vpack.c.bf16 %v9539_v19, %v9538_v52 }
0x2783   : > { %v7749_v53 = vadd.f32 %v7747_v32, %v13392_v49  ;;  %v11944_v32 = vpack.c.bf16 %v9557_v21, %v9556_v20 }
0x2784   : > { %v7758_v13 = vsel %vm2204_vm5, %v7750_v27, 0.0  ;;  %11943 = vmatpush3.bf16.msra.mxu1 %v11942_v29 }
0x2785   : > { %7759 = vadd.xlane.f32.xlu1 %v7758_v13  ;;  %v7755_v30 = vsel %vm2204_vm5, %v7749_v53, 0.0  ;;  %v9558_v13 = vld [vmem:[%s14072_s7 + $0x1c0] sm:$0xff]  ;;  %11945 = vmatprep.subr.bf16.mxu1 %v11944_v32 }
0x2786   : > { %7756 = vadd.xlane.f32.xlu0 %v7755_v30  ;;  %v9559_v30 = vld [vmem:[%s14072_s7 + $0x1c8] sm:$0xff] }
0x2812   : > { %v7760_v37 = vpop.xlane.xlu1 %7759 }
0x2813   : > { %v7762_v17 = vmul.f32 0.015625, %v7760_v37  ;;  %v7757_v3 = vpop.xlane.xlu0 %7756 }
0x2814   : > { %v7761_v34 = vmul.f32 0.015625, %v7757_v3  ;;  %v9542_v3 = vld [vmem:[%s14072_s7 + $0x140] sm:$0xff] }
0x2815   : > { %v13650_v35 = vsub.f32 %v7750_v27, %v7762_v17  ;;  %v9540_v27 = vld [vmem:[%s14072_s7 + $0x130] sm:$0xff]  ;;  %v11948_v17 = vpack.c.bf16 %v9559_v30, %v9558_v13 }
0x2816   : > { %v13652_v24 = vsub.f32 %v7749_v53, %v7761_v34  ;;  %v9541_v53 = vld [vmem:[%s14072_s7 + $0x138] sm:$0xff]  ;;  %v9543_v34 = vld [vmem:[%s14072_s7 + $0x148] sm:$0xff] }
0x2817   : > { %v7766_v49 = vmul.f32 %v13650_v35, %v13650_v35  ;;  %v11946_v37 = vpack.c.bf16 %v9541_v53, %v9540_v27 }
0x2818   : > { %v7765_v36 = vmul.f32 %v13652_v24, %v13652_v24 }
0x2819   : > { %v7770_v38 = vsel %vm2204_vm5, %v7766_v49, 0.0  ;;  %v9560_v49 = vld [vmem:[%s14072_s7 + $0x1d0] sm:$0xff]  ;;  %11947 = vmatpush3.bf16.msra.mxu1 %v11946_v37 }
0x281a   : > { %7771 = vadd.xlane.f32.xlu1 %v7770_v38  ;;  %v7767_v39 = vsel %vm2204_vm5, %v7765_v36, 0.0  ;;  %v9561_v36 = vld [vmem:[%s14072_s7 + $0x1d8] sm:$0xff]  ;;  %v11950_v38 = vpack.c.bf16 %v9543_v34, %v9542_v3  ;;  %11949 = vmatprep.subr.bf16.mxu1 %v11948_v17 }
0x281b   : > { %7768 = vadd.xlane.f32.xlu0 %v7767_v39  ;;  %v11952_v39 = vpack.c.bf16 %v9561_v36, %v9560_v49 }
0x281d   : > { %11951 = vmatpush3.bf16.msra.mxu1 %v11950_v38 }
0x281e   : > { %11953 = vmatprep.subr.bf16.mxu1 %v11952_v39 }
0x2821   : > { %11955 = vmatpush3.bf16.msra.mxu1 %v11954_v42 }
0x2822   : > { %11957 = vmatprep.subr.bf16.mxu1 %v11956_v43 }
0x2825   : > { %11959 = vmatpush3.bf16.msra.mxu1 %v11958_v8 }
0x28a7   : > { %v7772_v5 = vpop.xlane.xlu1 %7771 }
0x28a8   : > { %v7774_v44 = vmul.f32 0.015625, %v7772_v5  ;;  %v7769_v47 = vpop.xlane.xlu0 %7768 }
0x28a9   : > { %v7773_v48 = vmul.f32 0.015625, %v7769_v47  ;;  %v8224_v47 = vld [vmem:[%s14079_s1 + $0x8] sm:$0xff] }
0x28aa   : > { %v7776_v28 = vadd.f32 1e-05, %v7774_v44  ;;  %v12519_v44 = vmov 0.0|0.0  }
0x28ab   : > { %v7775_v51 = vadd.f32 1e-05, %v7773_v48  ;;  %11964 = vmatprep.subr.bf16.mxu0 %v12519_v44  ;;  %v8223_v48 = vld [vmem:[%s14079_s1] sm:$0xff] }
0x28ac   : > { %12304 = vrsqrt.f32 %v7776_v28  ;;  %v13734_v28 = vld [vmem:[%s14079_s1 + $0x18] sm:$0xff] }
0x28ad   : > { %12306 = vrsqrt.f32 %v7775_v51  ;;  %v8236_v51 = vmul.f32 %v8224_v47, %v8224_v47 }
0x28b6   : > { %v12305_v55 = vpop.eup %12304 }
0x28b7   : > { %v12307_v1 = vpop.eup %12306  ;;  %v7780_v59 = vmul.f32 %v12305_v55, %v13650_v35  ;;  %v9565_v35 = vld [vmem:[%s14072_s7 + $0x1f8] sm:$0xff]  ;;  %v8235_v55 = vmul.f32 %v8223_v48, %v8223_v48 }
0x28b8   : > { %v7779_v50 = vmul.f32 %v12307_v1, %v13652_v24  ;;  %v9564_v24 = vld [vmem:[%s14072_s7 + $0x1f0] sm:$0xff]  ;;  %v8238_v1 = vmul.f32 %v13734_v28, %v13734_v28  ;;  %s14086_s7 = sld [smem:[#allocation37_spill]] }
0x28b9   : > { %v7788_v62 = vmul.f32 %v9513_v9, %v7780_v59  ;;  %v11960_v15 = vpack.c.bf16 %v9565_v35, %v9564_v24  ;;  %v8242_v59 = vsel %vm2204_vm5, %v8236_v51, 0.0 }
0x28ba   : > { %v7787_v61 = vmul.f32 %v9513_v9, %v7779_v50  ;;  %v13739_v9 = vld [vmem:[%s14079_s1 + $0x10] sm:$0xff]  ;;  %s13748_s1 = sand.u32 1, %s12472_s23  }
0x28bb   : > { %v7796_v14 = vadd.f32 %v9514_v60, %v7788_v62  ;;  %11961 = vmatprep.subr.bf16.mxu1 %v11960_v15  ;;  %v8237_v50 = vmul.f32 %v13739_v9, %v13739_v9  ;;  %v9570_v15 = vld [vmem:[%s14077_s13 + $0x1] ss:$0 sm:$0xff]  ;;  %s9024_s3 = sshll.u32 %s13748_s1, 4  ;;  %s13878_s13 = scalar_lea.hbm %s14055_s4, %s13874_s10 }
0x28bc   : > { %v7795_v57 = vadd.f32 %v9514_v60, %v7787_v61  ;;  %11963 = vmatpush3.bf16.msra.mxu1 %v11962_v4  ;;  %v8239_v60 = vsel %vm2204_vm5, %v8235_v55, 0.0  ;;  %v8248_v61 = vsel %vm2204_vm5, %v8238_v1, 0.0  ;;  %s13753_s5 = scalar_lea.vmem [#allocation9], %s9024_s3  ;;  %s14082_s3 = sld [smem:[#allocation33_spill]] }
0x28bd   : > { %11978 = vmatprep.subr.bf16.mxu1 %v12519_v44  ;;  %s14091_s14 = scalar_lea.vmem [#allocation6], %s13748_s1 }
0x28be   : > { %9532 = vmatmul.mubr.msk.f32.vlgmr.msra.gmra.mrb[46].mxu0 %vm2204_vm5, %v7795_v57  ;;  %s8816_s17 = sshll.u32 %s14091_s14, 4  ;;  %s8817_s17 = int_to_ptr.vmem [resolvable:$true] %s8816_s17 }
0x28bf   : > { %7903 = vmatprep.mubr.f32.mxu0 %v12518_v6 }
0x28c2   : > { %9533 = vmatmul.mubr.msk.f32.gmra.mrb[48].mxu0 %vm2204_vm5, %v7796_v14 }
0x28c3   : > { %11098 = vmatprep.mubr.msk.f32.mxu0 %vm12520_vm12, %v12518_v6 }
0x2991   : > { %v7899_v23 = vpop.f32.mrb[46].mxu0 }
0x2992   : > { %v7900_v31 = vadd.f32 %v7899_v23, %v7820_v11  ;;  %v7901_v2 = vpop.f32.mrb[47].mxu0 }
0x2993   : > { %v7902_v56 = vadd.f32 %v7901_v2, %v7824_v12 }
0x2994   : > { %v7910_v45 = vmax.f32 %v7900_v31, 0.0 }
0x2995   : > { %v7911_v0 = vmax.f32 %v7902_v56, 0.0  ;;  %v7905_v18 = vpop.f32.mrb[48].mxu0  ;;  %v12521_v56 = vmov 0.0625  }
0x2996   : > { %v7906_v52 = vadd.f32 %v7905_v18, %v7820_v11  ;;  %v7907_v19 = vpop.f32.mrb[49].mxu0 }
0x2997   : > { %v7908_v20 = vadd.f32 %v7907_v19, %v7824_v12  ;;  %8019 = vmatprep.mubr.f32.mxu1 %v7911_v0 }
0x2998   : > { %8020 = vmatmul.mubr.f32.vlgmr.msra.gmra.mrb[72].mxu1 %v7910_v45  ;;  %v7912_v29 = vmax.f32 %v7906_v52, 0.0 }
0x2999   : > { %v7913_v21 = vmax.f32 %v7908_v20, 0.0 }
0x299b   : > { %8024 = vmatprep.mubr.f32.mxu1 %v7913_v21 }
0x299c   : > { %8025 = vmatmul.mubr.f32.gmra.mrb[74].mxu1 %v7912_v29 }
0x299d   : > { %11127 = vmatprep.mubr.msk.f32.mxu1 %vm12520_vm12, %v12518_v6 }
0x2a6b   : > { %v10147_v33 = vpop.f32.mrb[72].mxu1 }
0x2a6c   : > { %v10148_v7 = vpop.f32.mrb[73].mxu1 }
0x2a6d   : > { %v10149_v32 = vadd.f32 %v10148_v7, %v10147_v33 }
0x2a6f   : > { %v8022_v27 = vadd.f32 %v10149_v32, %v9567_v25  ;;  %v10150_v53 = vpop.f32.mrb[74].mxu1 }
0x2a70   : > { %v10151_v13 = vpop.f32.mrb[75].mxu1 }
0x2a71   : > { %v10152_v30 = vadd.f32 %v10151_v13, %v10150_v53  ;;  %v8030_v37 = vadd.f32 %v8022_v27, %v7795_v57  ;;  %v8245_v57 = vsel %vm2204_vm5, %v8237_v50, 0.0  ;;  %v8353_v50 = vld [vmem:[%s14083_s6 + $0x18] sm:$0xff] }
0x2a73   : > { %v8027_v17 = vadd.f32 %v10152_v30, %v9567_v25  ;;  %v8036_v3 = vsel %vm2204_vm5, %v8030_v37, 0.0 }
0x2a74   : > { %8037 = vadd.xlane.f32.xlu0 %v8036_v3 }
0x2a75   : > { %v8031_v34 = vadd.f32 %v8027_v17, %v7796_v14 }
0x2a77   : > { %v8039_v49 = vsel %vm2204_vm5, %v8031_v34, 0.0 }
0x2a78   : > { %8040 = vadd.xlane.f32.xlu1 %v8039_v49 }
0x2b01   : > { %v8038_v36 = vpop.xlane.xlu0 %8037 }
0x2b02   : > { %v8042_v38 = vmul.f32 0.015625, %v8038_v36 }
0x2b04   : > { %v8044_v39 = vsub.f32 %v8030_v37, %v8042_v38 }
0x2b05   : > { %v8041_v40 = vpop.xlane.xlu1 %8040 }
0x2b06   : > { %v8043_v16 = vmul.f32 0.015625, %v8041_v40  ;;  %v8046_v22 = vmul.f32 %v8044_v39, %v8044_v39  ;;  %v8358_v40 = vld [vmem:[%s14082_s3] sm:$0xff] }
0x2b08   : > { %v8045_v41 = vsub.f32 %v8031_v34, %v8043_v16  ;;  %v8048_v42 = vsel %vm2204_vm5, %v8046_v22, 0.0  ;;  %v8359_v16 = vld [vmem:[%s14082_s3 + $0x8] sm:$0xff]  ;;  %v8360_v22 = vld [vmem:[%s14082_s3 + $0x10] sm:$0xff] }
0x2b09   : > { %8049 = vadd.xlane.f32.xlu0 %v8048_v42  ;;  %v8361_v42 = vld [vmem:[%s14082_s3 + $0x18] sm:$0xff]  ;;  %s14084_s3 = sld [smem:[#allocation35_spill]] }
0x2b0a   : > { %v8047_v43 = vmul.f32 %v8045_v41, %v8045_v41 }
0x2b0c   : > { %v8051_v5 = vsel %vm2204_vm5, %v8047_v43, 0.0  ;;  %v11982_v43 = vpack.c.bf16 %v8361_v42, %v8360_v22 }
0x2b0d   : > { %8052 = vadd.xlane.f32.xlu1 %v8051_v5  ;;  %8240 = vadd.xlane.f32.xlu0 %v8239_v60  ;;  %v8354_v60 = vld [vmem:[%s14083_s6 + $0x20] sm:$0xff] }
0x2b0f   : > { %v8524_v29 = vld [vmem:[%s14084_s3 + $0x68] sm:$0xff] }
0x2b11   : > { %8243 = vadd.xlane.f32.xlu1 %v8242_v59  ;;  %8246 = vadd.xlane.f32.xlu0 %v8245_v57 }
0x2b15   : > { %8249 = vadd.xlane.f32.xlu1 %v8248_v61  ;;  %v8355_v61 = vld [vmem:[%s14083_s6 + $0x28] sm:$0xff] }
0x2b16   : > { %v11991_v57 = vpack.c.bf16 %v8355_v61, %v8354_v60  ;;  %v8695_v60 = vld [vmem:[%s14088_s9 + $0x38] sm:$0xff] }
0x2b96   : > { %v8050_v62 = vpop.xlane.xlu0 %8049 }
0x2b97   : > { %v8054_v14 = vmul.f32 0.015625, %v8050_v62  ;;  %v8356_v62 = vld [vmem:[%s14083_s6 + $0x30] sm:$0xff] }
0x2b99   : > { %v8056_v54 = vadd.f32 1e-05, %v8054_v14  ;;  %v8357_v14 = vld [vmem:[%s14083_s6 + $0x38] sm:$0xff] }
0x2b9a   : > { %v8053_v58 = vpop.xlane.xlu1 %8052  ;;  %v8241_v18 = vpop.xlane.xlu0 %8240 }
0x2b9b   : > { %12308 = vrsqrt.f32 %v8056_v54  ;;  %v8055_v8 = vmul.f32 0.015625, %v8053_v58  ;;  %v8251_v52 = vadd.f32 1e-08, %v8241_v18  ;;  %v11994_v54 = vpack.c.bf16 %v8357_v14, %v8356_v62  ;;  %v8511_v58 = vld [vmem:[%s14084_s3] sm:$0xff]  ;;  %v8698_v14 = vld [vmem:[%s14088_s9 + $0x50] sm:$0xff] }
0x2b9d   : > { %v8057_v24 = vadd.f32 1e-05, %v8055_v8  ;;  %v8512_v8 = vld [vmem:[%s14084_s3 + $0x8] sm:$0xff] }
0x2b9e   : > { %v8244_v0 = vpop.xlane.xlu1 %8243  ;;  %v8247_v27 = vpop.xlane.xlu0 %8246 }
0x2b9f   : > { %12310 = vrsqrt.f32 %v8057_v24  ;;  %v8252_v45 = vadd.f32 1e-08, %v8244_v0  ;;  %v8253_v17 = vadd.f32 1e-08, %v8247_v27  ;;  %v11997_v24 = vpack.c.bf16 %v8512_v8, %v8511_v58  ;;  %v8520_v0 = vld [vmem:[%s14084_s3 + $0x48] sm:$0xff]  ;;  %v8700_v8 = vld [vmem:[%s14088_s9 + $0x60] sm:$0xff] }
0x2ba1   : > { %12312 = vrsqrt.f32 %v8252_v45  ;;  %v8521_v45 = vld [vmem:[%s14084_s3 + $0x50] sm:$0xff] }
0x2ba2   : > { %12314 = vrsqrt.f32 %v8251_v52  ;;  %v8250_v32 = vpop.xlane.xlu1 %8249  ;;  %v8522_v52 = vld [vmem:[%s14084_s3 + $0x58] sm:$0xff] }
0x2ba3   : > { %v8254_v37 = vadd.f32 1e-08, %v8250_v32 }
0x2ba5   : > { %v12309_v35 = vpop.eup %12308  ;;  %12316 = vrsqrt.f32 %v8254_v37 }
0x2ba6   : > { %v8060_v46 = vmul.f32 %v12309_v35, %v8044_v39  ;;  %12318 = vrsqrt.f32 %v8253_v17  ;;  %v8513_v35 = vld [vmem:[%s14084_s3 + $0x10] sm:$0xff] }
0x2ba8   : > { %v8068_v4 = vmul.f32 %v9570_v15, %v8060_v46 }
0x2ba9   : > { %v12311_v10 = vpop.eup %12310 }
0x2baa   : > { %v8061_v11 = vmul.f32 %v12311_v10, %v8045_v41  ;;  %v8076_v12 = vadd.f32 %v9571_v63, %v8068_v4  ;;  %v11979_v41 = vpack.c.bf16 %v8359_v16, %v8358_v40  ;;  %v8515_v10 = vld [vmem:[%s14084_s3 + $0x20] sm:$0xff] }
0x2bab   : > { %v12313_v19 = vpop.eup %12312 }
0x2bac   : > { %v8069_v23 = vmul.f32 %v9570_v15, %v8061_v11  ;;  %8078 = vst.msk [vmem:[%s13753_s5] sm:$0xff] %vm2204_vm5, %v8076_v12  ;;  %v12315_v20 = vpop.eup %12314  ;;  %v8260_v21 = vmul.f32 %v12313_v19, %v8224_v47  ;;  %11980 = vmatpush3.bf16.msra.mxu1 %v11979_v41  ;;  %v8514_v15 = vld [vmem:[%s14084_s3 + $0x18] sm:$0xff]  ;;  %v8516_v11 = vld [vmem:[%s14084_s3 + $0x28] sm:$0xff] }
0x2bad   : > { %11981 = vmatprep.subr.bf16.mxu1 %v12519_v44  ;;  %v12000_v4 = vpack.c.bf16 %v8514_v15, %v8513_v35  ;;  %v8702_v15 = vld [vmem:[%s14088_s9 + $0x70] sm:$0xff] }
0x2bae   : > { %v8077_v31 = vadd.f32 %v9571_v63, %v8069_v23  ;;  %v8517_v23 = vld [vmem:[%s14084_s3 + $0x30] sm:$0xff] }
0x2baf   : > { %v12317_v34 = vpop.eup %12316 }
0x2bb0   : > { %v11965_v2 = vpack.c.bf16 %v8077_v31, %v8076_v12  ;;  %8079 = vst.msk [vmem:[%s13753_s5 + $0x8] sm:$0xff] %vm2204_vm5, %v8077_v31  ;;  %v12319_v49 = vpop.eup %12318  ;;  %v8262_v36 = vmul.f32 %v12317_v34, %v13734_v28  ;;  %11983 = vmatpush3.bf16.msra.mxu1 %v11982_v43  ;;  %v8351_v28 = vld [vmem:[%s14083_s6 + $0x8] sm:$0xff]  ;;  %v12003_v12 = vpack.c.bf16 %v8516_v11, %v8515_v10  ;;  %v8518_v31 = vld [vmem:[%s14084_s3 + $0x38] sm:$0xff]  ;;  %v8688_v43 = vld [vmem:[%s14088_s9] sm:$0xff] }
0x2bb1   : > { %v8261_v38 = vmul.f32 %v12319_v49, %v13739_v9  ;;  %11996 = vmatprep.subr.bf16.mxu1 %v12519_v44  ;;  %v8352_v9 = vld [vmem:[%s14083_s6 + $0x10] sm:$0xff]  ;;  %v8607_v34 = vld [vmem:[%s14086_s7 + $0x8] sm:$0x3] }
0x2bb2   : > { %11966 = vmatpush3.bf16.msra.mxu0 %v11965_v2  ;;  %v11988_v59 = vpack.c.bf16 %v8353_v50, %v8352_v9  ;;  %v12006_v2 = vpack.c.bf16 %v8518_v31, %v8517_v23  ;;  %v8693_v9 = vld [vmem:[%s14088_s9 + $0x28] sm:$0xff] }
0x2bb3   : > { %11967 = vmatprep.subr.bf16.mxu0 %v12519_v44  ;;  %v11975_v39 = vpack.c.bf16 %v8262_v36, %v8261_v38  ;;  %v8527_v36 = vld [vmem:[%s14087_s8] sm:$0x1]  ;;  %s14016_s8 = scalar_lea.vmem [#allocation6], %s13748_s1 }
0x2bb5   : > { %11099 = vmatmul.mubr.msk.f32.vlgmr.msra.gmra.mrb[50].mxu0 %vm3254_vm10, %v12521_v56 }
0x2bb6   : > { %11969 = vmatpush3.bf16.msra.mxu0 %v13025_v26  ;;  %11105 = vmatprep.mubr.msk.f32.mxu0 %vm12520_vm12, %v12518_v6  ;;  %v8259_v26 = vmul.f32 %v12315_v20, %v8223_v48  ;;  %v8350_v48 = vld [vmem:[%s14083_s6] sm:$0xff]  ;;  %s14012_s6 = scalar_lea.vmem [#allocation8], %s13748_s1 }
0x2bb7   : > { %11970 = vmatprep.subr.bf16.mxu0 %v12519_v44  ;;  %v11985_v55 = vpack.c.bf16 %v8351_v28, %v8350_v48  ;;  %v8690_v48 = vld [vmem:[%s14088_s9 + $0x10] sm:$0xff]  ;;  %v8691_v28 = vld [vmem:[%s14088_s9 + $0x18] sm:$0xff] }
0x2bb8   : > { %v11971_v33 = vpack.c.bf16 %v8260_v21, %v8259_v26  ;;  %v12012_v21 = vpack.c.bf16 %v8522_v52, %v8521_v45  ;;  %v8523_v26 = vld [vmem:[%s14084_s3 + $0x60] sm:$0xff] }
0x2bb9   : > { %11106 = vmatmul.mubr.msk.f32.vlgmr.msra.gmra.mrb[52].mxu0 %vm3254_vm10, %v12521_v56  ;;  %v8519_v56 = vld [vmem:[%s14084_s3 + $0x40] sm:$0xff] }
0x2bba   : > { %11116 = vmatprep.mubr.msk.f32.mxu0 %vm12520_vm12, %v12518_v6  ;;  %v12009_v18 = vpack.c.bf16 %v8520_v0, %v8519_v56 }
0x2bbf   : > { %11973 = vmatpush3.bf16.xpose.msk.msra.mxu0 %vm13770_vm13, %v11971_v33  ;;  %v12015_v33 = vpack.c.bf16 %v8524_v29, %v8523_v26 }
0x2bc0   : > { %11974 = vmatprep.subr.bf16.mxu0 %v12519_v44 }
0x2bc7   : > { %11977 = vmatpush3.bf16.xpose.msk.msra.mxu0 %vm13770_vm13, %v11975_v39 }
0x2bc8   : > { %11984 = vmatprep.subr.bf16.mxu0 %v12519_v44 }
0x2c88   : > { %v8149_v25 = vpop.f32.mrb[50].mxu0 }
0x2c89   : > { %v11100_v7 = vpop.f32.mrb[51].mxu0 }
0x2c8a   : > { %v8526_v7 = vld [vmem:[%s14084_s3 + $0x78] sm:$0xff] }
0x2c8c   : > { %v8219_v53 = vpop.f32.mrb[52].mxu0 }
0x2c8d   : > { %v8227_v13 = vmul.f32 %v8219_v53, %v8219_v53  ;;  %v11107_v30 = vpop.f32.mrb[53].mxu0 }
0x2c8f   : > { %v8229_v3 = vsel %vm8228_vm14, %v8227_v13, 0.0 }
0x2c90   : > { %8230 = vadd.xlane.f32.xlu0 %v8229_v3  ;;  %v8606_v3 = vld [vmem:[%s14086_s7] sm:$0xff]  ;;  %s8781_s7 = sand.u32 1, %s12734_s0  }
0x2c91   : > { %v12021_v49 = vpack.c.bf16 %v8607_v34, %v8606_v3 }
0x2d1d   : > { %v8231_v5 = vpop.xlane.xlu0 %8230 }
0x2d1e   : > { %v8232_v47 = vadd.f32 1e-08, %v8231_v5  ;;  %v8689_v5 = vld [vmem:[%s14088_s9 + $0x8] sm:$0xff] }
0x2d20   : > { %12320 = vrsqrt.f32 %v8232_v47  ;;  %v12025_v47 = vpack.c.bf16 %v8689_v5, %v8688_v43 }
0x2d2a   : > { %v12321_v51 = vpop.eup %12320 }
0x2d2b   : > { %v8234_v1 = vmul.f32 %v12321_v51, %v8219_v53 }
0x2d2d   : > { %11117 = vmatmul.mubr.msk.f32.vlgmr.msra.gmra.mrb[54].mxu0 %vm2204_vm5, %v8234_v1  ;;  %v8692_v1 = vld [vmem:[%s14088_s9 + $0x20] sm:$0xff] }
0x2d2e   : > { %11986 = vmatpush3.bf16.msra.mxu0 %v11985_v55  ;;  %11146 = vmatprep.mubr.msk.f32.mxu0 %vm12520_vm12, %v12518_v6  ;;  %v12028_v55 = vpack.c.bf16 %v8691_v28, %v8690_v48  ;;  %v12031_v50 = vpack.c.bf16 %v8693_v9, %v8692_v1 }
0x2d2f   : > { %11987 = vmatprep.subr.bf16.mxu0 %v12519_v44 }
0x2d32   : > { %11989 = vmatpush3.bf16.msra.mxu0 %v11988_v59  ;;  %v8694_v59 = vld [vmem:[%s14088_s9 + $0x30] sm:$0xff] }
0x2d33   : > { %11990 = vmatprep.subr.bf16.mxu0 %v12519_v44  ;;  %v12034_v61 = vpack.c.bf16 %v8695_v60, %v8694_v59 }
0x2d36   : > { %11992 = vmatpush3.bf16.msra.mxu0 %v11991_v57  ;;  %v8696_v57 = vld [vmem:[%s14088_s9 + $0x40] sm:$0xff] }
0x2d37   : > { %11993 = vmatprep.subr.bf16.mxu0 %v12519_v44 }
0x2d3a   : > { %11995 = vmatpush3.bf16.msra.mxu0 %v11994_v54  ;;  %v8699_v54 = vld [vmem:[%s14088_s9 + $0x58] sm:$0xff] }
0x2d3b   : > { %12020 = vmatprep.subr.bf16.mxu0 %v12519_v44  ;;  %v12040_v58 = vpack.c.bf16 %v8699_v54, %v8698_v14 }
0x2d3d   : > { %11147 = vmatmul.mubr.msk.f32.vlgmr.msra.gmra.mrb[56].mxu0 %vm2204_vm5, %v8149_v25  ;;  %v8525_v25 = vld [vmem:[%s14084_s3 + $0x70] sm:$0xff] }
0x2d3e   : > { %11188 = vmatprep.mubr.msk.f32.mxu0 %vm12520_vm12, %v12518_v6  ;;  %v12018_v32 = vpack.c.bf16 %v8526_v7, %v8525_v25  ;;  %12023 = vmatpush3.bf16.msk.msra.mxu0 %vm12022_vm2, %v12021_v49 }
0x2d3f   : > { %12024 = vmatprep.subr.bf16.mxu0 %v12519_v44 }
0x2e00   : > { %v8344_v46 = vpop.f32.mrb[54].mxu0 }
0x2e01   : > { %8349 = vst.msk [vmem:[%s14012_s6] sm:$0x1] %vm8348_vm15, %v8344_v46  ;;  %v11118_v63 = vpop.f32.mrb[55].mxu0  ;;  %11128 = vmatmul.mubr.msk.f32.vlgmr.msra.gmra.mrb[76].mxu1 %vm2892_vm9, %v8344_v46  ;;  %s14085_s6 = sld [smem:[#allocation34_spill]]  ;;  %v8703_v46 = vld [vmem:[%s14088_s9 + $0x78] sm:$0xff] }
0x2e02   : > { %11998 = vmatpush3.bf16.msra.mxu1 %v11997_v24  ;;  %11181 = vmatprep.mubr.msk.f32.mxu1 %vm12520_vm12, %v12518_v6  ;;  %v8701_v24 = vld [vmem:[%s14088_s9 + $0x68] sm:$0xff]  ;;  %v12046_v63 = vpack.c.bf16 %v8703_v46, %v8702_v15 }
0x2e03   : > { %11999 = vmatprep.subr.bf16.mxu1 %v12519_v44  ;;  %v12043_v35 = vpack.c.bf16 %v8701_v24, %v8700_v8 }
0x2e06   : > { %12001 = vmatpush3.bf16.msra.mxu1 %v12000_v4 }
0x2e07   : > { %12002 = vmatprep.subr.bf16.mxu1 %v12519_v44  ;;  %v8508_v53 = vld [vmem:[%s14085_s6] sm:$0x1]  ;;  %s14089_s6 = sld [smem:[#allocation38_spill]] }
0x2e0a   : > { %12004 = vmatpush3.bf16.msra.mxu1 %v12003_v12 }
0x2e0b   : > { %12005 = vmatprep.subr.bf16.mxu1 %v12519_v44 }
0x2e0d   : > { %v8608_v4 = vld [vmem:[%s14089_s6] sm:$0x1]  ;;  %s13884_s6 = scalar_lea.sflag [#allocation7], %s8781_s7 }
0x2e0e   : > { %12007 = vmatpush3.bf16.msra.mxu1 %v12006_v2 }
0x2e0f   : > { %12008 = vmatprep.subr.bf16.mxu1 %v12519_v44 }
0x2e10   : > { %v8504_v19 = vpop.f32.mrb[56].mxu0 }
0x2e11   : > { %v11148_v20 = vpop.f32.mrb[57].mxu0 }
0x2e12   : > { %12010 = vmatpush3.bf16.msra.mxu1 %v12009_v18 }
0x2e13   : > { %12011 = vmatprep.subr.bf16.mxu1 %v12519_v44 }
0x2e16   : > { %12013 = vmatpush3.bf16.msra.mxu1 %v12012_v21 }
0x2e17   : > { %12014 = vmatprep.subr.bf16.mxu1 %v12519_v44 }
0x2e1a   : > { %12016 = vmatpush3.bf16.msra.mxu1 %v12015_v33 }
0x2e1b   : > { %12017 = vmatprep.subr.bf16.mxu1 %v12519_v44 }
0x2e1e   : > { %12019 = vmatpush3.bf16.msra.mxu1 %v12018_v32 }
0x2ed4   : > { %v8431_v27 = vpop.f32.mrb[76].mxu1 }
0x2ed5   : > { %v8505_v13 = vadd.f32 %v8504_v19, %v8431_v27  ;;  %v11129_v30 = vpop.f32.mrb[77].mxu1 }
0x2ed7   : > { %v8509_v37 = vadd.f32 %v8508_v53, %v8505_v13 }
0x2ed9   : > { %v8510_v17 = vmax.f32 %v8509_v37, 0.0 }
0x2edb   : > { %11182 = vmatmul.mubr.f32.vlgmr.msra.gmra.mrb[78].mxu1 %v8510_v17 }
0x2fae   : > { %v8594_v38 = vpop.f32.mrb[78].mxu1 }
0x2faf   : > { %v8595_v39 = vadd.f32 %v8594_v38, %v8527_v36  ;;  %v11183_v40 = vpop.f32.mrb[79].mxu1 }
0x2fb1   : > { %v8598_v16 = vsub.f32 0.0, %v8595_v39 }
0x2fb3   : > { %v8599_v22 = vmul.f32 1.442695, %v8598_v16 }
0x2fb5   : > { %12322 = vpow2.f32 %v8599_v22 }
0x2fbf   : > { %v12323_v41 = vpop.eup %12322 }
0x2fc0   : > { %v8601_v42 = vadd.f32 1.0, %v12323_v41 }
0x2fc2   : > { %12324 = vrcp.f32 %v8601_v42 }
0x2fcc   : > { %v12325_v51 = vpop.eup %12324 }
0x2fcd   : > { %11189 = vmatmul.mubr.msk.f32.vlgmr.msra.gmra.mrb[58].mxu0 %vm8609_vm1, %v12325_v51  ;;  %8605 = vst.msk [vmem:[%s14016_s8] sm:$0x1] %vm8604_vm3, %v12325_v51  ;;  %s14090_s8 = scalar_lea.vmem [#allocation8], %s13748_s1 }
0x2fce   : > { %12026 = vmatpush3.bf16.msra.mxu0 %v12025_v47  ;;  %11223 = vmatprep.mubr.msk.f32.mxu0 %vm12520_vm12, %v12518_v6  ;;  %v8697_v6 = vld [vmem:[%s14088_s9 + $0x48] sm:$0xff]  ;;  %s8829_s3 = sshll.u32 %s14090_s8, 4  ;;  %s12326_s9 = scalar_lea.vmem %s8817_s17, 16  ;;  %s13882_s3 = int_to_ptr.vmem [resolvable:$true] %s8829_s3 }
0x2fcf   : > { %12027 = vmatprep.subr.bf16.mxu0 %v12519_v44  ;;  %v12037_v62 = vpack.c.bf16 %v8697_v6, %v8696_v57  ;;  %p12327_p11 = scmp.ne.s32.totalorder %s8817_s17, %s12326_s9  ;;  %s12330_s8 = sshll.u32 %s12522_s18, 4  ;;  %s12331_s8 = int_to_ptr.vmem [resolvable:$false] %s12330_s8 }
0x2fd0   : > { %s12332_s19 = scalar_lea.vmem %s12331_s8, 32  ;;  %p12333_p0 = scmp.lt.s32.totalorder %s8817_s17, %s12331_s8 }
0x2fd1   : > { %p12328_p12 = pnand %p12327_p11, %p12753_p5  ;;  %p12334_p1 = scmp.lt.s32.totalorder %s12332_s19, %s12326_s9 }
0x2fd2   : > { %12029 = vmatpush3.bf16.msra.mxu0 %v12028_v55 }
0x2fd3   : > { %12030 = vmatprep.subr.bf16.mxu0 %v12519_v44  ;;  %p12329_p13 = pneg %p12328_p12  ;;  %p12335_p2 = por %p12334_p1, %p12333_p0 }
0x2fd5   : > { %p12336_p3 = pnand %p12335_p2, %p12329_p13 }
0x2fd6   : > { %12032 = vmatpush3.bf16.msra.mxu0 %v12031_v50 }
0x2fd7   : > { %12033 = vmatprep.subr.bf16.mxu0 %v12519_v44 }
0x2fda   : > { %12035 = vmatpush3.bf16.msra.mxu0 %v12034_v61 }
0x2fdb   : > { %12036 = vmatprep.subr.bf16.mxu0 %v12519_v44 }
0x2fde   : > { %12038 = vmatpush3.bf16.msra.mxu0 %v12037_v62 }
0x2fdf   : > { %12039 = vmatprep.subr.bf16.mxu0 %v12519_v44 }
0x2fe2   : > { %12041 = vmatpush3.bf16.msra.mxu0 %v12040_v58 }
0x2fe3   : > { %12042 = vmatprep.subr.bf16.mxu0 %v12519_v44 }
0x2fe6   : > { %12044 = vmatpush3.bf16.msra.mxu0 %v12043_v35 }
0x2fe7   : > { %12045 = vmatprep.subr.bf16.mxu0 %v12519_v44 }
0x2fea   : > { %12047 = vmatpush3.bf16.msra.mxu0 %v12046_v63 }
0x30a0   : > { %v8683_v10 = vpop.f32.mrb[58].mxu0 }
0x30a1   : > { %v8684_v11 = vadd.f32 %v8683_v10, %v8608_v4  ;;  %v11190_v12 = vpop.f32.mrb[59].mxu0 }
0x30a3   : > { %v8687_v23 = vmax.f32 %v8684_v11, 0.0 }
0x30a5   : > { %11224 = vmatmul.mubr.f32.vlgmr.msra.gmra.mrb[60].mxu0 %v8687_v23 }
0x30a6   : > { %12339 = shalt.err (!%p12336_p3)
}
0x30a7   : > { %s12340_s14 = scalar_lea.hbm %s13878_s13, 16  ;;  %s12344_s18 = scalar_lea.hbm %s14055_s4, 32 }
0x30a8   : > { %p12341_p4 = scmp.ne.s32.totalorder %s13878_s13, %s12340_s14  ;;  %p12345_p9 = scmp.lt.u32.totalorder %s13878_s13, %s14055_s4 }
0x30a9   : > { %p12346_p10 = scmp.lt.u32.totalorder %s12344_s18, %s12340_s14  ;;  %p12348_p12 = scmp.lt.u32.totalorder %s12340_s14, %s13878_s13 }
0x30aa   : > { %p12342_p7 = pnand %p12341_p4, %p12753_p5 }
0x30ab   : > { %p12347_p11 = por %p12346_p10, %p12345_p9 }
0x30ac   : > { %p12343_p8 = pneg %p12342_p7 }
0x30ad   : > { %p12349_p0 = por %p12348_p12, %p12347_p11 }
0x30af   : > { %p12350_p13 = pnand %p12349_p0, %p12343_p8 }
0x30b1   : > { %12353 = shalt.err (!%p12350_p13)
}
0x30b2   : > { %12137 = dma.vmem_to_hbm [thread:$0]  (%p12753_p5), %s8817_s17, 16, %s13878_s13, %s13884_s6  }
0x30b3   : > { %s8827_s9 = scalar_lea.hbm %s12706_s12, %s13874_s10  ;;  %s12354_s19 = scalar_lea.vmem %s13882_s3, 16 }
0x30b4   : > { %p12355_p1 = scmp.ne.s32.totalorder %s13882_s3, %s12354_s19  ;;  %s12523_s7 = smov [#allocation8]  }
0x30b5   : > { %s12358_s8 = sshll.u32 %s12523_s7, 4  ;;  %s12359_s8 = int_to_ptr.vmem [resolvable:$false] %s12358_s8 }
0x30b6   : > { %p12356_p2 = pnand %p12355_p1, %p12753_p5  ;;  %s12360_s14 = scalar_lea.vmem %s12359_s8, 32 }
0x30b7   : > { %p12361_p4 = scmp.lt.s32.totalorder %s13882_s3, %s12359_s8  ;;  %p12362_p7 = scmp.lt.s32.totalorder %s12360_s14, %s12354_s19 }
0x30b8   : > { %p12357_p3 = pneg %p12356_p2 }
0x30b9   : > { %p12363_p8 = por %p12362_p7, %p12361_p4 }
0x30bb   : > { %p12364_p9 = pnand %p12363_p8, %p12357_p3 }
0x30bd   : > { %12367 = shalt.err (!%p12364_p9)
}
0x30be   : > { %s12368_s18 = scalar_lea.hbm %s8827_s9, 16  ;;  %s12372_s13 = scalar_lea.hbm %s12706_s12, 32 }
0x30bf   : > { %p12369_p10 = scmp.ne.s32.totalorder %s8827_s9, %s12368_s18  ;;  %p12373_p0 = scmp.lt.u32.totalorder %s8827_s9, %s12706_s12 }
0x30c0   : > { %p12374_p13 = scmp.lt.u32.totalorder %s12372_s13, %s12368_s18  ;;  %p12376_p2 = scmp.lt.u32.totalorder %s12368_s18, %s8827_s9 }
0x30c1   : > { %p12370_p11 = pnand %p12369_p10, %p12753_p5 }
0x30c2   : > { %p12375_p1 = por %p12374_p13, %p12373_p0 }
0x30c3   : > { %p12371_p12 = pneg %p12370_p11 }
0x30c4   : > { %p12377_p6 = por %p12376_p2, %p12375_p1 }
0x30c6   : > { %p12378_p4 = pnand %p12377_p6, %p12371_p12 }
0x30c8   : > { %12381 = shalt.err (!%p12378_p4)
}
0x30c9   : > { %12138 = dma.vmem_to_hbm [thread:$0]  (%p12753_p5), %s13882_s3, 16, %s8827_s9, %s13884_s6  }
0x30ca   : > { %s9592_s17 = sshll.u32 %s12734_s0, 8  ;;  %s8842_s7 = sshll.u32 %s13753_s5, 4  ;;  %s13920_s7 = int_to_ptr.vmem [resolvable:$true] %s8842_s7 }
0x30cb   : > { %s13917_s19 = scalar_lea.hbm %s12711_s20, %s9592_s17  ;;  %s8790_s8 = scalar_lea.sflag [#allocation10], %s13748_s1 }
0x30cc   : > { %s12382_s14 = scalar_lea.vmem %s13920_s7, 256  ;;  %s12524_s18 = smov [#allocation9]  }
0x30cd   : > { %p12383_p6 = scmp.ne.s32.totalorder %s13920_s7, %s12382_s14  ;;  %s12386_s13 = sshll.u32 %s12524_s18, 4  ;;  %s12387_s13 = int_to_ptr.vmem [resolvable:$false] %s12386_s13 }
0x30ce   : > { %s12388_s4 = scalar_lea.vmem %s12387_s13, 512  ;;  %p12389_p8 = scmp.lt.s32.totalorder %s13920_s7, %s12387_s13 }
0x30cf   : > { %p12384_p3 = pnand %p12383_p6, %p12753_p5  ;;  %p12390_p9 = scmp.lt.s32.totalorder %s12388_s4, %s12382_s14 }
0x30d1   : > { %p12385_p7 = pneg %p12384_p3  ;;  %p12391_p10 = por %p12390_p9, %p12389_p8 }
0x30d3   : > { %p12392_p11 = pnand %p12391_p10, %p12385_p7 }
0x30d5   : > { %12395 = shalt.err (!%p12392_p11)
}
0x30d6   : > { %s12396_s5 = scalar_lea.hbm %s13917_s19, 256  ;;  %s12400_s0 = scalar_lea.hbm %s12711_s20, 512 }
0x30d7   : > { %p12397_p12 = scmp.ne.s32.totalorder %s13917_s19, %s12396_s5  ;;  %p12401_p1 = scmp.lt.u32.totalorder %s13917_s19, %s12711_s20 }
0x30d8   : > { %p12402_p2 = scmp.lt.u32.totalorder %s12400_s0, %s12396_s5  ;;  %p12404_p6 = scmp.lt.u32.totalorder %s12396_s5, %s13917_s19 }
0x30d9   : > { %p12398_p0 = pnand %p12397_p12, %p12753_p5 }
0x30da   : > { %p12403_p4 = por %p12402_p2, %p12401_p1 }
0x30db   : > { %p12399_p13 = pneg %p12398_p0 }
0x30dc   : > { %p12405_p3 = por %p12404_p6, %p12403_p4 }
0x30de   : > { %p12406_p7 = pnand %p12405_p3, %p12399_p13 }
0x30e0   : > { %12409 = shalt.err (!%p12406_p7)
}
0x30e1   : > { %s12525_s4 = smov 128   ;;  %s14092_s3 = sld [smem:[#allocation40_spill]]  ;;  %vm8775_vm4 = vcmask 32768  }
0x30e2   : > { %s12526_s6 = smov 8   ;;  %s1069_s9 = scalar_lea.vmem [#allocation4], %s13748_s1 }
0x30e3   : > { %12139 = dma.vmem_to_hbm [thread:$0]  (%p12753_p5), %s13920_s7, 256, %s13917_s19, %s8790_s8, %s12525_s4, %s12525_s4, %s12526_s6  }
0x30e4   : > { %s8803_s17 = sshll.u32 %s1069_s9, 4  ;;  %s13946_s14 = scalar_lea.hbm %s12696_s27, %s13874_s10  ;;  %s13948_s17 = int_to_ptr.vmem [resolvable:$true] %s8803_s17 }
0x30e5   : > { %s8778_s18 = scalar_lea.sflag [#allocation5], %s13748_s1  ;;  %s12410_s13 = scalar_lea.vmem %s13948_s17, 16 }
0x30e6   : > { %p12411_p8 = scmp.ne.s32.totalorder %s13948_s17, %s12410_s13  ;;  %s12527_s19 = smov [#allocation4]  }
0x30e7   : > { %v8704_v44 = vld [vmem:[%s14092_s3] sm:$0x1]  ;;  %s12414_s7 = sshll.u32 %s12527_s19, 4  ;;  %s12415_s7 = int_to_ptr.vmem [resolvable:$false] %s12414_s7 }
0x30e8   : > { %p12412_p9 = pnand %p12411_p8, %p12753_p5  ;;  %s12416_s8 = scalar_lea.vmem %s12415_s7, 32 }
0x30e9   : > { %p12417_p11 = scmp.lt.s32.totalorder %s13948_s17, %s12415_s7  ;;  %p12418_p12 = scmp.lt.s32.totalorder %s12416_s8, %s12410_s13 }
0x30ea   : > { %p12413_p10 = pneg %p12412_p9 }
0x30eb   : > { %p12419_p0 = por %p12418_p12, %p12417_p11 }
0x30ed   : > { %p12420_p13 = pnand %p12419_p0, %p12413_p10 }
0x3178   : > { %v8771_v31 = vpop.f32.mrb[60].mxu0 }
0x3179   : > { %v8772_v2 = vadd.f32 %v8771_v31, %v8704_v44  ;;  %v11225_v56 = vpop.f32.mrb[61].mxu0 }
0x317b   : > { %8776 = vst.msk [vmem:[%s1069_s9] sm:$0x1] %vm8775_vm4, %v8772_v2 }
0x317c   : > { %12423 = shalt.err (!%p12420_p13)
}
0x317d   : > { %s12424_s1 = scalar_lea.hbm %s13946_s14, 16  ;;  %s12428_s10 = scalar_lea.hbm %s12696_s27, 32 }
0x317e   : > { %p12425_p1 = scmp.ne.s32.totalorder %s13946_s14, %s12424_s1  ;;  %p12429_p6 = scmp.lt.u32.totalorder %s13946_s14, %s12696_s27 }
0x317f   : > { %p12430_p3 = scmp.lt.u32.totalorder %s12428_s10, %s12424_s1  ;;  %p12432_p8 = scmp.lt.u32.totalorder %s12424_s1, %s13946_s14 }
0x3180   : > { %p12426_p2 = pnand %p12425_p1, %p12753_p5 }
0x3181   : > { %p12431_p7 = por %p12430_p3, %p12429_p6 }
0x3182   : > { %p12427_p4 = pneg %p12426_p2 }
0x3183   : > { %p12433_p9 = por %p12432_p8, %p12431_p7 }
0x3185   : > { %p12434_p10 = pnand %p12433_p9, %p12427_p4 }
0x3187   : > { %12437 = shalt.err (!%p12434_p10)
}
0x3188   : > { %12136 = dma.vmem_to_hbm [thread:$0]  (%p12753_p5), %s13948_s17, 16, %s13946_s14, %s8778_s18  }
0x3189 PF: > { %p12157_p11 = scmp.ge.s32.totalorder %s12480_s28, 2  ;;  %s8857_s5 = sand.u32 1, %s12468_s22  }
0x318a   : > { %p14093_p12 = scmp.ne.s32.totalorder %s14064_s16, 0  ;;  %s8858_s0 = scalar_lea.sflag [#allocation5], %s8857_s5 }
0x318c   : > { %p12145_p0 = pnand %p12157_p11, %p14093_p12 }
0x318e   : > { %12455 = dma.done.wait (!%p12145_p0), %s8858_s0, 16  }
0x318f   : > { %12457 = vsyncadd (!%p12145_p0), %s8858_s0, 4294967280  ;;  %s14094_s4 = sadd.s32 4294967294, %s12480_s28  }
0x3190   : > { %s8865_s3 = sand.u32 1, %s14094_s4  }
0x3191   : > { %s8866_s6 = scalar_lea.sflag [#allocation7], %s8865_s3 }
0x3192   : > { %12459 = dma.done.wait (!%p12145_p0), %s8866_s6, 32  }
0x3193   : > { %12461 = vsyncadd (!%p12145_p0), %s8866_s6, 4294967264  ;;  %s8882_s15 = scalar_lea.sflag [#allocation10], %s8857_s5 }
0x3194   : > { %12463 = dma.done.wait (!%p12145_p0), %s8882_s15, 256  }
0x3195   : > { %12465 = vsyncadd (!%p12145_p0), %s8882_s15, 4294967040  ;;  %p88_p5 = scmp.ge.s32.totalorder %s12738_s2, 4   ;;  %s14095_s22 = smov %s12472_s23 }
0x3196   : > { %s14096_s23 = smov %s12476_s26  ;;  %s14097_s26 = smov %s12751_s11 }
0x3197   : > { %s14098_s28 = smov %s12738_s2  ;;  %90 = sbr.rel (!%p88_p5) target bundleno = 81 (0x51), region = 335 }
0x319e   :  { %8887 = vsyncpa [#allocation5], 1 }
0x319f   :  { %8889 = vsyncpa [#allocation5 + $0x1], 1 }
0x31a0   :  { %8890 = vsyncpa [#allocation7], 1 }
0x31a1   :  { %8892 = vsyncpa [#allocation7 + $0x1], 1 }
0x31a2   :  { %8893 = vsyncpa [#allocation10], 1 }
0x31a3   :  { %8895 = vsyncpa [#allocation10 + $0x1], 1 }

</bundles_post_ra>
